<compile_context>
chip_gen: v7x
topology: tpu7x:2x2x1
jax: 0.10.0
libtpu: 0.0.40
codegen_flags: <defaults>
</compile_context>

<pallas_src>
import numpy as np
import jax
import jax.numpy as jnp
from jax import lax
from jax.experimental import pallas as pl
from jax.experimental.pallas import tpu as pltpu

DIM = 312
HEADS = 12
HEAD_DIM = DIM // HEADS      # 26
FF = 4 * DIM                 # 1248
EPS = 1e-12                  # nn.LayerNorm eps


def _bert_layer_kernel(x_ref, bias_ref, g1_ref, be1_ref,
                       wqkv_ref, bqkv_ref, wp_ref, bp_ref,
                       w1_ref, b1_ref, w2_ref, b2_ref,
                       out_ref):
    S = x_ref.shape[1]
    xb = x_ref[0]                       # (S, DIM) f32
    g1 = g1_ref[...]                    # (1, DIM) f32
    be1 = be1_ref[...]                  # (1, DIM) f32

    def layer_norm(t):                  # f32 statistics
        mu = jnp.mean(t, axis=-1, keepdims=True)
        c = t - mu
        var = jnp.mean(c * c, axis=-1, keepdims=True)
        return c * lax.rsqrt(var + EPS) * g1 + be1

    def bf16(t):                        # MXU operands in bf16, accumulate in f32
        return t.astype(jnp.bfloat16)

    # ---------------- attention sub-block (pre-norm) ----------------
    ln = layer_norm(xb)
    # Fused QKV projection: one (S,312) x (312,936) bf16 matmul, f32 accumulation.
    qkv = jnp.dot(bf16(ln), wqkv_ref[...],
                  preferred_element_type=jnp.float32) + bqkv_ref[...]
    # (S, 3*DIM) -> (3*HEADS, S, HEAD_DIM); first 12 groups q heads, then k, then v.
    qkv_h = jnp.transpose(qkv.reshape(S, 3 * HEADS, HEAD_DIM), (1, 0, 2))
    qh = bf16(qkv_h[:HEADS])                    # (H, S, Dh)
    kh = bf16(qkv_h[HEADS:2 * HEADS])           # (H, S, Dh)
    vh = bf16(qkv_h[2 * HEADS:])                # (H, S, Dh)

    scores = jnp.einsum('hqd,hkd->hqk', qh, kh,
                        preferred_element_type=jnp.float32)
    scores = scores * (1.0 / np.sqrt(HEAD_DIM)) + bias_ref[0]   # additive mask bias
    # exact f32 softmax (keys on the lane/minor axis)
    scores = scores - jnp.max(scores, axis=-1, keepdims=True)
    e = jnp.exp(scores)
    p = e / jnp.sum(e, axis=-1, keepdims=True)

    ctx = jnp.einsum('hqk,hkd->hqd', bf16(p), vh,
                     preferred_element_type=jnp.float32)        # (H, S, Dh)
    # Head merge folded into the output projection: wp_ref is (H, Dh, DIM); per-head
    # batched matmul then accumulate over heads (no transpose/reshape relayout of ctx).
    attn_h = jnp.einsum('hqd,hde->hqe', bf16(ctx), wp_ref[...],
                        preferred_element_type=jnp.float32)     # (H, S, DIM)
    attn = jnp.sum(attn_h, axis=0) + bp_ref[...]
    out1 = xb + attn                    # residual (dropout p=0.0), f32

    # -------- feed-forward sub-block (pre-norm; source reuses norm1) --------
    ln2 = layer_norm(out1)
    h = jnp.dot(bf16(ln2), w1_ref[...],
                preferred_element_type=jnp.float32) + b1_ref[...]
    h = h * 0.5 * (1.0 + lax.erf(h * (1.0 / np.sqrt(2.0))))     # exact gelu, f32
    h = jnp.dot(bf16(h), w2_ref[...],
                preferred_element_type=jnp.float32) + b2_ref[...]

    out_ref[0] = out1 + h               # residual, lane-dense (S, 312) f32


def bert_layer(hidden_states, attention_mask, params):
    """Pallas BertLayer forward (share='all', norm='pre'). Returns (B, S, DIM) f32."""
    B, S, _ = hidden_states.shape
    maskf = attention_mask.astype(jnp.float32)
    bias = (-10000.0 * (1.0 - maskf)).reshape(B, 1, S)          # additive attention bias

    # f32 LayerNorm params / biases; bf16 weight matrices (half the DMA + VMEM).
    g1 = params["gamma1"].reshape(1, DIM).astype(jnp.float32)
    be1 = params["beta1"].reshape(1, DIM).astype(jnp.float32)
    wqkv = params["wqkv"].astype(jnp.bfloat16)                  # (DIM, 3*DIM) fused q|k|v
    bqkv = params["bqkv"].reshape(1, 3 * DIM).astype(jnp.float32)
    wp_h = params["wproj"].reshape(HEADS, HEAD_DIM, DIM).astype(jnp.bfloat16)
    bp = params["bproj"].reshape(1, DIM).astype(jnp.float32)
    w1 = params["w1"].astype(jnp.bfloat16)
    b1 = params["b1"].reshape(1, FF).astype(jnp.float32)
    w2 = params["w2"].astype(jnp.bfloat16)
    b2 = params["b2"].reshape(1, DIM).astype(jnp.float32)

    def const(shape):
        # Constant block index across the grid -> single-buffer (no wasted 2nd copy).
        return pl.BlockSpec(shape, lambda b, n=len(shape): (0,) * n,
                            pipeline_mode=pl.Buffered(1))

    out = pl.pallas_call(
        _bert_layer_kernel,
        grid=(B,),
        in_specs=[
            pl.BlockSpec((1, S, DIM), lambda b: (b, 0, 0)),      # hidden_states
            pl.BlockSpec((1, 1, S), lambda b: (b, 0, 0)),        # additive mask bias
            const((1, DIM)), const((1, DIM)),                    # LayerNorm1 gamma / beta
            const((DIM, 3 * DIM)), const((1, 3 * DIM)),          # fused QKV weight / bias
            const((HEADS, HEAD_DIM, DIM)), const((1, DIM)),      # output projection (head-split)
            const((DIM, FF)), const((1, FF)),                    # FFN fc1
            const((FF, DIM)), const((1, DIM)),                   # FFN fc2
        ],
        out_specs=pl.BlockSpec((1, S, DIM), lambda b: (b, 0, 0)),
        out_shape=jax.ShapeDtypeStruct((B, S, DIM), jnp.float32),
        compiler_params=pltpu.CompilerParams(
            dimension_semantics=("parallel",),
            vmem_limit_bytes=64 * 1024 * 1024),
    )(hidden_states.astype(jnp.float32), bias, g1, be1, wqkv, bqkv, wp_h, bp,
      w1, b1, w2, b2)
    return out


def _reference(x, mask, p):
    """Plain-JAX f32 reference mirroring the PyTorch BertLayer (pre-norm, share='all')."""
    B, S, _ = x.shape

    def layer_norm(t):
        mu = jnp.mean(t, axis=-1, keepdims=True)
        var = jnp.mean((t - mu) ** 2, axis=-1, keepdims=True)
        return (t - mu) / jnp.sqrt(var + EPS) * p["gamma1"] + p["beta1"]

    wq, wk, wv = p["wqkv"][:, :DIM], p["wqkv"][:, DIM:2 * DIM], p["wqkv"][:, 2 * DIM:]
    bq, bk, bv = p["bqkv"][:DIM], p["bqkv"][DIM:2 * DIM], p["bqkv"][2 * DIM:]

    xn = layer_norm(x)
    q, k, v = xn @ wq + bq, xn @ wk + bk, xn @ wv + bv

    def split(t):
        return t.reshape(B, S, HEADS, HEAD_DIM).transpose(0, 2, 1, 3)

    q, k, v = split(q), split(k), split(v)
    scores = q @ jnp.swapaxes(k, -1, -2) / np.sqrt(HEAD_DIM)
    m = mask.astype(jnp.float32)[:, None, None, :]
    scores = scores - 10000.0 * (1.0 - m)
    scores = jax.nn.softmax(scores, axis=-1)
    attn = (scores @ v).transpose(0, 2, 1, 3).reshape(B, S, DIM)
    h = attn @ p["wproj"] + p["bproj"]
    out = x + h

    xn2 = layer_norm(out)                 # source uses norm1 again in the pre-norm FFN path
    h = xn2 @ p["w1"] + p["b1"]
    h = h * 0.5 * (1.0 + lax.erf(h / np.sqrt(2.0)))
    h = h @ p["w2"] + p["b2"]
    return out + h


if __name__ == "__main__":
    B, S = 2, 8
    key = jax.random.PRNGKey(0)
    keys = jax.random.split(key, 12)

    x = jax.random.normal(keys[0], (B, S, DIM), dtype=jnp.float32)
    mask = (jax.random.uniform(keys[1], (B, S)) > 0.25).astype(jnp.float32)

    scale = 0.05
    params = {
        "gamma1": 1.0 + scale * jax.random.normal(keys[2], (DIM,), jnp.float32),
        "beta1":  scale * jax.random.normal(keys[3], (DIM,), jnp.float32),
        "wqkv":   scale * jax.random.normal(keys[4], (DIM, 3 * DIM), jnp.float32),
        "bqkv":   scale * jax.random.normal(keys[5], (3 * DIM,), jnp.float32),
        "wproj":  scale * jax.random.normal(keys[6], (DIM, DIM), jnp.float32),
        "bproj":  scale * jax.random.normal(keys[7], (DIM,), jnp.float32),
        "w1":     scale * jax.random.normal(keys[8], (DIM, FF), jnp.float32),
        "b1":     scale * jax.random.normal(keys[9], (FF,), jnp.float32),
        "w2":     scale * jax.random.normal(keys[10], (FF, DIM), jnp.float32),
        "b2":     scale * jax.random.normal(keys[11], (DIM,), jnp.float32),
    }

    out = bert_layer(x, mask, params)
    out = jax.block_until_ready(out)

    out_ref = _reference(x, mask, params)
    # bf16 MXU operands (f32 accumulation) vs. the pure-f32 reference: bf16-appropriate
    # tolerance; LayerNorm/softmax/gelu/residual stay in f32 inside the kernel.
    np.testing.assert_allclose(np.asarray(out), np.asarray(out_ref), atol=2e-2, rtol=2e-2)

    print("KERNEL_OK")
</pallas_src>

<mosaic_0001>
module attributes {stable_mosaic.version = 11 : i64} {
  func.func @_bert_layer_kernel(%arg0: i32, %arg1: memref<1x8x312xf32, #tpu.memory_space<vmem>>, %arg2: memref<1x1x8xf32, #tpu.memory_space<vmem>>, %arg3: memref<1x312xf32, #tpu.memory_space<vmem>>, %arg4: memref<1x312xf32, #tpu.memory_space<vmem>>, %arg5: memref<312x936xbf16, #tpu.memory_space<vmem>>, %arg6: memref<1x936xf32, #tpu.memory_space<vmem>>, %arg7: memref<12x26x312xbf16, #tpu.memory_space<vmem>>, %arg8: memref<1x312xf32, #tpu.memory_space<vmem>>, %arg9: memref<312x1248xbf16, #tpu.memory_space<vmem>>, %arg10: memref<1x1248xf32, #tpu.memory_space<vmem>>, %arg11: memref<1248x312xbf16, #tpu.memory_space<vmem>>, %arg12: memref<1x312xf32, #tpu.memory_space<vmem>>, %arg13: memref<1x8x312xf32, #tpu.memory_space<vmem>>) attributes {dimension_semantics = [#tpu.dimension_semantics<parallel>], iteration_bounds = array<i64: 2>, scalar_prefetch = 0 : i64, scratch_operands = 0 : i64, tpu.core_type = #tpu.core_type<tc>, window_params = [{transform_indices = @transform_0, window_bounds = array<i64: 1, 8, 312>}, {transform_indices = @transform_1, window_bounds = array<i64: 1, 1, 8>}, {pipeline_mode = #tpu.pipeline_mode<synchronous>, transform_indices = @transform_2, window_bounds = array<i64: 1, 312>}, {pipeline_mode = #tpu.pipeline_mode<synchronous>, transform_indices = @transform_3, window_bounds = array<i64: 1, 312>}, {pipeline_mode = #tpu.pipeline_mode<synchronous>, transform_indices = @transform_4, window_bounds = array<i64: 312, 936>}, {pipeline_mode = #tpu.pipeline_mode<synchronous>, transform_indices = @transform_5, window_bounds = array<i64: 1, 936>}, {pipeline_mode = #tpu.pipeline_mode<synchronous>, transform_indices = @transform_6, window_bounds = array<i64: 12, 26, 312>}, {pipeline_mode = #tpu.pipeline_mode<synchronous>, transform_indices = @transform_7, window_bounds = array<i64: 1, 312>}, {pipeline_mode = #tpu.pipeline_mode<synchronous>, transform_indices = @transform_8, window_bounds = array<i64: 312, 1248>}, {pipeline_mode = #tpu.pipeline_mode<synchronous>, transform_indices = @transform_9, window_bounds = array<i64: 1, 1248>}, {pipeline_mode = #tpu.pipeline_mode<synchronous>, transform_indices = @transform_10, window_bounds = array<i64: 1248, 312>}, {pipeline_mode = #tpu.pipeline_mode<synchronous>, transform_indices = @transform_11, window_bounds = array<i64: 1, 312>}, {transform_indices = @transform_12, window_bounds = array<i64: 1, 8, 312>}]} {
    %c0 = arith.constant 0 : index
    %c0_0 = arith.constant 0 : index
    %c0_1 = arith.constant 0 : index
    %0 = vector.load %arg1[%c0, %c0_0, %c0_1] : memref<1x8x312xf32, #tpu.memory_space<vmem>>, vector<1x8x312xf32>
    %1 = vector.shape_cast %0 : vector<1x8x312xf32> to vector<8x312xf32>
    %c0_2 = arith.constant 0 : index
    %c0_3 = arith.constant 0 : index
    %2 = vector.load %arg3[%c0_2, %c0_3] : memref<1x312xf32, #tpu.memory_space<vmem>>, vector<1x312xf32>
    %c0_4 = arith.constant 0 : index
    %c0_5 = arith.constant 0 : index
    %3 = vector.load %arg4[%c0_4, %c0_5] : memref<1x312xf32, #tpu.memory_space<vmem>>, vector<1x312xf32>
    %cst = arith.constant dense<0.000000e+00> : vector<8xf32>
    %4 = vector.multi_reduction <add>, %1, %cst [1] : vector<8x312xf32> to vector<8xf32>
    %5 = vector.shape_cast %4 : vector<8xf32> to vector<8x1xf32>
    %cst_6 = arith.constant 3.120000e+02 : f32
    %6 = vector.broadcast %cst_6 : f32 to vector<8x1xf32>
    %7 = arith.divf %5, %6 : vector<8x1xf32>
    %8 = vector.broadcast %7 : vector<8x1xf32> to vector<8x312xf32>
    %9 = arith.subf %1, %8 : vector<8x312xf32>
    %10 = arith.mulf %9, %9 : vector<8x312xf32>
    %cst_7 = arith.constant dense<0.000000e+00> : vector<8xf32>
    %11 = vector.multi_reduction <add>, %10, %cst_7 [1] : vector<8x312xf32> to vector<8xf32>
    %12 = vector.shape_cast %11 : vector<8xf32> to vector<8x1xf32>
    %cst_8 = arith.constant 3.120000e+02 : f32
    %13 = vector.broadcast %cst_8 : f32 to vector<8x1xf32>
    %14 = arith.divf %12, %13 : vector<8x1xf32>
    %cst_9 = arith.constant 9.99999996E-13 : f32
    %15 = vector.broadcast %cst_9 : f32 to vector<8x1xf32>
    %16 = arith.addf %14, %15 : vector<8x1xf32>
    %17 = math.rsqrt %16 : vector<8x1xf32>
    %18 = vector.broadcast %17 : vector<8x1xf32> to vector<8x312xf32>
    %19 = arith.mulf %9, %18 : vector<8x312xf32>
    %20 = vector.broadcast %2 : vector<1x312xf32> to vector<8x312xf32>
    %21 = arith.mulf %19, %20 : vector<8x312xf32>
    %22 = vector.broadcast %3 : vector<1x312xf32> to vector<8x312xf32>
    %23 = arith.addf %21, %22 : vector<8x312xf32>
    %24 = arith.truncf %23 : vector<8x312xf32> to vector<8x312xbf16>
    %c0_10 = arith.constant 0 : index
    %c0_11 = arith.constant 0 : index
    %25 = vector.load %arg5[%c0_10, %c0_11] : memref<312x936xbf16, #tpu.memory_space<vmem>>, vector<312x936xbf16>
    %cst_12 = arith.constant dense<0.000000e+00> : vector<8x936xf32>
    %26 = tpu.matmul %24, %25, %cst_12 {dimension_numbers = #tpu.dot_dimension_numbers<[1], [0], [0], [1], [0, 0, 1, 1], [], []>} : vector<8x312xbf16>, vector<312x936xbf16>, vector<8x936xf32> -> vector<8x936xf32>
    %c0_13 = arith.constant 0 : index
    %c0_14 = arith.constant 0 : index
    %27 = vector.load %arg6[%c0_13, %c0_14] : memref<1x936xf32, #tpu.memory_space<vmem>>, vector<1x936xf32>
    %28 = vector.broadcast %27 : vector<1x936xf32> to vector<8x936xf32>
    %29 = arith.addf %26, %28 : vector<8x936xf32>
    %30 = vector.shape_cast %29 : vector<8x936xf32> to vector<8x36x26xf32>
    %31 = tpu.transpose %30, [1, 0, 2] : vector<8x36x26xf32> -> vector<36x8x26xf32>
    %32 = vector.extract_strided_slice %31 {offsets = [0, 0, 0], sizes = [12, 8, 26], strides = [1, 1, 1]} : vector<36x8x26xf32> to vector<12x8x26xf32>
    %33 = arith.truncf %32 : vector<12x8x26xf32> to vector<12x8x26xbf16>
    %34 = vector.extract_strided_slice %31 {offsets = [12, 0, 0], sizes = [12, 8, 26], strides = [1, 1, 1]} : vector<36x8x26xf32> to vector<12x8x26xf32>
    %35 = arith.truncf %34 : vector<12x8x26xf32> to vector<12x8x26xbf16>
    %36 = vector.extract_strided_slice %31 {offsets = [24, 0, 0], sizes = [12, 8, 26], strides = [1, 1, 1]} : vector<36x8x26xf32> to vector<12x8x26xf32>
    %37 = arith.truncf %36 : vector<12x8x26xf32> to vector<12x8x26xbf16>
    "tpu.trace_start"() <{level = 10 : i32, message = "hqd,hkd->hqk"}> : () -> ()
    %cst_15 = arith.constant dense<0.000000e+00> : vector<12x8x8xf32>
    %38 = tpu.matmul %33, %35, %cst_15 {dimension_numbers = #tpu.dot_dimension_numbers<[2], [2], [1], [1], [0, 0, 0, 1, 1, 1], [0], [0]>} : vector<12x8x26xbf16>, vector<12x8x26xbf16>, vector<12x8x8xf32> -> vector<12x8x8xf32>
    "tpu.trace_stop"() : () -> ()
    %cst_16 = arith.constant 0.196116135 : f32
    %39 = vector.broadcast %cst_16 : f32 to vector<12x8x8xf32>
    %40 = arith.mulf %38, %39 : vector<12x8x8xf32>
    %c0_17 = arith.constant 0 : index
    %c0_18 = arith.constant 0 : index
    %c0_19 = arith.constant 0 : index
    %41 = vector.load %arg2[%c0_17, %c0_18, %c0_19] : memref<1x1x8xf32, #tpu.memory_space<vmem>>, vector<1x1x8xf32>
    %42 = vector.shape_cast %41 : vector<1x1x8xf32> to vector<1x8xf32>
    %43 = vector.shape_cast %42 : vector<1x8xf32> to vector<1x1x8xf32>
    %44 = vector.broadcast %43 : vector<1x1x8xf32> to vector<12x8x8xf32>
    %45 = arith.addf %40, %44 : vector<12x8x8xf32>
    %cst_20 = arith.constant dense<0xFF800000> : vector<12x8xf32>
    %46 = vector.multi_reduction <maximumf>, %45, %cst_20 [2] : vector<12x8x8xf32> to vector<12x8xf32>
    %47 = vector.shape_cast %46 : vector<12x8xf32> to vector<12x8x1xf32>
    %48 = vector.broadcast %47 : vector<12x8x1xf32> to vector<12x8x8xf32>
    %49 = arith.subf %45, %48 : vector<12x8x8xf32>
    %50 = math.exp %49 : vector<12x8x8xf32>
    %cst_21 = arith.constant dense<0.000000e+00> : vector<12x8xf32>
    %51 = vector.multi_reduction <add>, %50, %cst_21 [2] : vector<12x8x8xf32> to vector<12x8xf32>
    %52 = vector.shape_cast %51 : vector<12x8xf32> to vector<12x8x1xf32>
    %53 = vector.broadcast %52 : vector<12x8x1xf32> to vector<12x8x8xf32>
    %54 = arith.divf %50, %53 : vector<12x8x8xf32>
    %55 = arith.truncf %54 : vector<12x8x8xf32> to vector<12x8x8xbf16>
    "tpu.trace_start"() <{level = 10 : i32, message = "hqk,hkd->hqd"}> : () -> ()
    %cst_22 = arith.constant dense<0.000000e+00> : vector<12x8x26xf32>
    %56 = tpu.matmul %55, %37, %cst_22 {dimension_numbers = #tpu.dot_dimension_numbers<[2], [1], [1], [2], [0, 0, 0, 1, 1, 2], [0], [0]>} : vector<12x8x8xbf16>, vector<12x8x26xbf16>, vector<12x8x26xf32> -> vector<12x8x26xf32>
    "tpu.trace_stop"() : () -> ()
    %57 = arith.truncf %56 : vector<12x8x26xf32> to vector<12x8x26xbf16>
    %c0_23 = arith.constant 0 : index
    %c0_24 = arith.constant 0 : index
    %c0_25 = arith.constant 0 : index
    %58 = vector.load %arg7[%c0_23, %c0_24, %c0_25] : memref<12x26x312xbf16, #tpu.memory_space<vmem>>, vector<12x26x312xbf16>
    "tpu.trace_start"() <{level = 10 : i32, message = "hqd,hde->hqe"}> : () -> ()
    %cst_26 = arith.constant dense<0.000000e+00> : vector<12x8x312xf32>
    %59 = tpu.matmul %57, %58, %cst_26 {dimension_numbers = #tpu.dot_dimension_numbers<[2], [1], [1], [2], [0, 0, 0, 1, 1, 2], [0], [0]>} : vector<12x8x26xbf16>, vector<12x26x312xbf16>, vector<12x8x312xf32> -> vector<12x8x312xf32>
    "tpu.trace_stop"() : () -> ()
    %cst_27 = arith.constant dense<0.000000e+00> : vector<8x312xf32>
    %60 = vector.multi_reduction <add>, %59, %cst_27 [0] : vector<12x8x312xf32> to vector<8x312xf32>
    %c0_28 = arith.constant 0 : index
    %c0_29 = arith.constant 0 : index
    %61 = vector.load %arg8[%c0_28, %c0_29] : memref<1x312xf32, #tpu.memory_space<vmem>>, vector<1x312xf32>
    %62 = vector.broadcast %61 : vector<1x312xf32> to vector<8x312xf32>
    %63 = arith.addf %60, %62 : vector<8x312xf32>
    %64 = arith.addf %1, %63 : vector<8x312xf32>
    %cst_30 = arith.constant dense<0.000000e+00> : vector<8xf32>
    %65 = vector.multi_reduction <add>, %64, %cst_30 [1] : vector<8x312xf32> to vector<8xf32>
    %66 = vector.shape_cast %65 : vector<8xf32> to vector<8x1xf32>
    %cst_31 = arith.constant 3.120000e+02 : f32
    %67 = vector.broadcast %cst_31 : f32 to vector<8x1xf32>
    %68 = arith.divf %66, %67 : vector<8x1xf32>
    %69 = vector.broadcast %68 : vector<8x1xf32> to vector<8x312xf32>
    %70 = arith.subf %64, %69 : vector<8x312xf32>
    %71 = arith.mulf %70, %70 : vector<8x312xf32>
    %cst_32 = arith.constant dense<0.000000e+00> : vector<8xf32>
    %72 = vector.multi_reduction <add>, %71, %cst_32 [1] : vector<8x312xf32> to vector<8xf32>
    %73 = vector.shape_cast %72 : vector<8xf32> to vector<8x1xf32>
    %cst_33 = arith.constant 3.120000e+02 : f32
    %74 = vector.broadcast %cst_33 : f32 to vector<8x1xf32>
    %75 = arith.divf %73, %74 : vector<8x1xf32>
    %cst_34 = arith.constant 9.99999996E-13 : f32
    %76 = vector.broadcast %cst_34 : f32 to vector<8x1xf32>
    %77 = arith.addf %75, %76 : vector<8x1xf32>
    %78 = math.rsqrt %77 : vector<8x1xf32>
    %79 = vector.broadcast %78 : vector<8x1xf32> to vector<8x312xf32>
    %80 = arith.mulf %70, %79 : vector<8x312xf32>
    %81 = vector.broadcast %2 : vector<1x312xf32> to vector<8x312xf32>
    %82 = arith.mulf %80, %81 : vector<8x312xf32>
    %83 = vector.broadcast %3 : vector<1x312xf32> to vector<8x312xf32>
    %84 = arith.addf %82, %83 : vector<8x312xf32>
    %85 = arith.truncf %84 : vector<8x312xf32> to vector<8x312xbf16>
    %c0_35 = arith.constant 0 : index
    %c0_36 = arith.constant 0 : index
    %86 = vector.load %arg9[%c0_35, %c0_36] : memref<312x1248xbf16, #tpu.memory_space<vmem>>, vector<312x1248xbf16>
    %cst_37 = arith.constant dense<0.000000e+00> : vector<8x1248xf32>
    %87 = tpu.matmul %85, %86, %cst_37 {dimension_numbers = #tpu.dot_dimension_numbers<[1], [0], [0], [1], [0, 0, 1, 1], [], []>} : vector<8x312xbf16>, vector<312x1248xbf16>, vector<8x1248xf32> -> vector<8x1248xf32>
    %c0_38 = arith.constant 0 : index
    %c0_39 = arith.constant 0 : index
    %88 = vector.load %arg10[%c0_38, %c0_39] : memref<1x1248xf32, #tpu.memory_space<vmem>>, vector<1x1248xf32>
    %89 = vector.broadcast %88 : vector<1x1248xf32> to vector<8x1248xf32>
    %90 = arith.addf %87, %89 : vector<8x1248xf32>
    %cst_40 = arith.constant 5.000000e-01 : f32
    %91 = vector.broadcast %cst_40 : f32 to vector<8x1248xf32>
    %92 = arith.mulf %90, %91 : vector<8x1248xf32>
    %cst_41 = arith.constant 0.707106769 : f32
    %93 = vector.broadcast %cst_41 : f32 to vector<8x1248xf32>
    %94 = arith.mulf %90, %93 : vector<8x1248xf32>
    %95 = math.erf %94 : vector<8x1248xf32>
    %cst_42 = arith.constant 1.000000e+00 : f32
    %96 = vector.broadcast %cst_42 : f32 to vector<8x1248xf32>
    %97 = arith.addf %96, %95 : vector<8x1248xf32>
    %98 = arith.mulf %92, %97 : vector<8x1248xf32>
    %99 = arith.truncf %98 : vector<8x1248xf32> to vector<8x1248xbf16>
    %c0_43 = arith.constant 0 : index
    %c0_44 = arith.constant 0 : index
    %100 = vector.load %arg11[%c0_43, %c0_44] : memref<1248x312xbf16, #tpu.memory_space<vmem>>, vector<1248x312xbf16>
    %cst_45 = arith.constant dense<0.000000e+00> : vector<8x312xf32>
    %101 = tpu.matmul %99, %100, %cst_45 {dimension_numbers = #tpu.dot_dimension_numbers<[1], [0], [0], [1], [0, 0, 1, 1], [], []>} : vector<8x1248xbf16>, vector<1248x312xbf16>, vector<8x312xf32> -> vector<8x312xf32>
    %c0_46 = arith.constant 0 : index
    %c0_47 = arith.constant 0 : index
    %102 = vector.load %arg12[%c0_46, %c0_47] : memref<1x312xf32, #tpu.memory_space<vmem>>, vector<1x312xf32>
    %103 = vector.broadcast %102 : vector<1x312xf32> to vector<8x312xf32>
    %104 = arith.addf %101, %103 : vector<8x312xf32>
    %105 = arith.addf %64, %104 : vector<8x312xf32>
    %c0_48 = arith.constant 0 : index
    %c0_49 = arith.constant 0 : index
    %c0_50 = arith.constant 0 : index
    %106 = vector.load %arg13[%c0_48, %c0_49, %c0_50] : memref<1x8x312xf32, #tpu.memory_space<vmem>>, vector<1x8x312xf32>
    %107 = vector.shape_cast %106 : vector<1x8x312xf32> to vector<8x312xf32>
    %108 = vector.shape_cast %105 : vector<8x312xf32> to vector<1x8x312xf32>
    tpu.vector_store %arg13[%c0_48, %c0_49, %c0_50], %108 {strides = array<i32>} : memref<1x8x312xf32, #tpu.memory_space<vmem>>, vector<1x8x312xf32>,
    return
  }
  func.func @transform_0(%arg0: i32) -> (i32, i32, i32) {
    %c0_i32 = arith.constant 0 : i32
    %c0_i32_0 = arith.constant 0 : i32
    %c0_i32_1 = arith.constant 0 : i32
    return %arg0, %c0_i32, %c0_i32_0 : i32, i32, i32
  }
  func.func @transform_1(%arg0: i32) -> (i32, i32, i32) {
    %c0_i32 = arith.constant 0 : i32
    %c0_i32_0 = arith.constant 0 : i32
    %c0_i32_1 = arith.constant 0 : i32
    return %arg0, %c0_i32, %c0_i32_0 : i32, i32, i32
  }
  func.func @transform_2(%arg0: i32) -> (i32, i32) {
    %c0_i32 = arith.constant 0 : i32
    %c0_i32_0 = arith.constant 0 : i32
    %c0_i32_1 = arith.constant 0 : i32
    return %c0_i32, %c0_i32_0 : i32, i32
  }
  func.func @transform_3(%arg0: i32) -> (i32, i32) {
    %c0_i32 = arith.constant 0 : i32
    %c0_i32_0 = arith.constant 0 : i32
    %c0_i32_1 = arith.constant 0 : i32
    return %c0_i32, %c0_i32_0 : i32, i32
  }
  func.func @transform_4(%arg0: i32) -> (i32, i32) {
    %c0_i32 = arith.constant 0 : i32
    %c0_i32_0 = arith.constant 0 : i32
    %c0_i32_1 = arith.constant 0 : i32
    return %c0_i32, %c0_i32_0 : i32, i32
  }
  func.func @transform_5(%arg0: i32) -> (i32, i32) {
    %c0_i32 = arith.constant 0 : i32
    %c0_i32_0 = arith.constant 0 : i32
    %c0_i32_1 = arith.constant 0 : i32
    return %c0_i32, %c0_i32_0 : i32, i32
  }
  func.func @transform_6(%arg0: i32) -> (i32, i32, i32) {
    %c0_i32 = arith.constant 0 : i32
    %c0_i32_0 = arith.constant 0 : i32
    %c0_i32_1 = arith.constant 0 : i32
    %c0_i32_2 = arith.constant 0 : i32
    return %c0_i32, %c0_i32_0, %c0_i32_1 : i32, i32, i32
  }
  func.func @transform_7(%arg0: i32) -> (i32, i32) {
    %c0_i32 = arith.constant 0 : i32
    %c0_i32_0 = arith.constant 0 : i32
    %c0_i32_1 = arith.constant 0 : i32
    return %c0_i32, %c0_i32_0 : i32, i32
  }
  func.func @transform_8(%arg0: i32) -> (i32, i32) {
    %c0_i32 = arith.constant 0 : i32
    %c0_i32_0 = arith.constant 0 : i32
    %c0_i32_1 = arith.constant 0 : i32
    return %c0_i32, %c0_i32_0 : i32, i32
  }
  func.func @transform_9(%arg0: i32) -> (i32, i32) {
    %c0_i32 = arith.constant 0 : i32
    %c0_i32_0 = arith.constant 0 : i32
    %c0_i32_1 = arith.constant 0 : i32
    return %c0_i32, %c0_i32_0 : i32, i32
  }
  func.func @transform_10(%arg0: i32) -> (i32, i32) {
    %c0_i32 = arith.constant 0 : i32
    %c0_i32_0 = arith.constant 0 : i32
    %c0_i32_1 = arith.constant 0 : i32
    return %c0_i32, %c0_i32_0 : i32, i32
  }
  func.func @transform_11(%arg0: i32) -> (i32, i32) {
    %c0_i32 = arith.constant 0 : i32
    %c0_i32_0 = arith.constant 0 : i32
    %c0_i32_1 = arith.constant 0 : i32
    return %c0_i32, %c0_i32_0 : i32, i32
  }
  func.func @transform_12(%arg0: i32) -> (i32, i32, i32) {
    %c0_i32 = arith.constant 0 : i32
    %c0_i32_0 = arith.constant 0 : i32
    %c0_i32_1 = arith.constant 0 : i32
    return %arg0, %c0_i32, %c0_i32_0 : i32, i32, i32
  }
}

</mosaic_0001>

<bundles_post_ra>
// kernel: tpu_custom_call.1
= control target key start
LH: loop header
LB: loop body
LE: loop exit
PB: predicated region body
PF: predicated region fallthrough
CT: control target
= control target key end

     0   :  { %s14539_s0 = inlined_call_operand.hbm [shape: f32[2,8,312], index: 0, kind: input, shape index: {}]   ;;  %s14540_s1 = inlined_call_operand.hbm [shape: f32[2,1,8], index: 1, kind: input, shape index: {}]   ;;  %s14541_s2 = inlined_call_operand.hbm [shape: f32[1,312], index: 2, kind: input, shape index: {}]   ;;  %s14542_s3 = inlined_call_operand.hbm [shape: f32[1,312], index: 3, kind: input, shape index: {}]   ;;  %s14543_s4 = inlined_call_operand.hbm [shape: bf16[312,936], index: 4, kind: input, shape index: {}]   ;;  %s14544_s5 = inlined_call_operand.hbm [shape: f32[1,936], index: 5, kind: input, shape index: {}]   ;;  %s14545_s6 = inlined_call_operand.hbm [shape: bf16[12,26,312], index: 6, kind: input, shape index: {}]   ;;  %s14546_s7 = inlined_call_operand.hbm [shape: f32[1,312], index: 7, kind: input, shape index: {}]   ;;  %s14547_s8 = inlined_call_operand.hbm [shape: bf16[312,1248], index: 8, kind: input, shape index: {}]   ;;  %s14548_s9 = inlined_call_operand.hbm [shape: f32[1,1248], index: 9, kind: input, shape index: {}]   ;;  %s14549_s10 = inlined_call_operand.hbm [shape: bf16[1248,312], index: 10, kind: input, shape index: {}]   ;;  %s14550_s11 = inlined_call_operand.hbm [shape: f32[1,312], index: 11, kind: input, shape index: {}]   ;;  %s14551_s12 = inlined_call_operand.hbm [shape: f32[2,8,312], index: 12, kind: output, shape index: {}]  }
   0x1   :  { %14561 = sst [smem:[#allocation33_spill]] %s14539_s0 }
   0x2   :  { %14562 = sst [smem:[#allocation34_spill]] %s14540_s1 }
   0x3   :  { %14563 = sst [smem:[#allocation35_spill]] %s14541_s2 }
   0x4   :  { %14564 = sst [smem:[#allocation36_spill]] %s14542_s3 }
   0x5   :  { %14565 = sst [smem:[#allocation37_spill]] %s14543_s4 }
   0x6   :  { %14566 = sst [smem:[#allocation38_spill]] %s14544_s5 }
   0x7   :  { %14567 = sst [smem:[#allocation39_spill]] %s14551_s12 }
   0x8   :  { %17 = vsyncpa [#allocation3], 0 }
   0x9   :  { %19 = vsyncpa [#allocation3 + $0x1], 0 }
   0xa   :  { %20 = vsyncpa [#allocation6], 0 }
   0xb   :  { %22 = vsyncpa [#allocation6 + $0x1], 0 }
   0xc   :  { %23 = vsyncpa [#allocation9], 0 }
   0xd   :  { %24 = vsyncpa [#allocation12], 0 }
   0xe   :  { %25 = vsyncpa [#allocation15], 0 }
   0xf   :  { %26 = vsyncpa [#allocation18], 0 }
  0x10   :  { %27 = vsyncpa [#allocation21], 0 }
  0x11   :  { %28 = vsyncpa [#allocation4], 0 }
  0x12   :  { %30 = vsyncpa [#allocation4 + $0x1], 0  ;;  %s13103_s21 = smov 0   ;;  %s13105_s22 = smov 0  }
  0x13   :  { %s13107_s23 = smov 0   ;;  %s13109_s24 = smov 0  }
  0x14 LB: > { %s12979_s25 = smov [#allocation7]   ;;  %s13124_s27 = sadd.s32 4294967295, %s12977_s24   ;;  %s12977_s24 = sphi %s13109_s24, %s14608_s24   ;;  %s12973_s23 = sphi %s13107_s23, %s14607_s23   ;;  %s12969_s22 = sphi %s13105_s22, %s14606_s22   ;;  %s12965_s21 = sphi %s13103_s21, %s14605_s21  }
  0x15   : > { %s342_s26 = sshll.u32 %s12979_s25, 4  ;;  %p10278_p0 = scmp.ge.s32.totalorder %s12977_s24, 1  ;;  %s13129_s26 = int_to_ptr.vmem [resolvable:$true] %s342_s26 }
  0x16   : > { %p14555_p1 = scmp.eq.s32.totalorder %s13124_s27, 0  ;;  %p329_p2 = scmp.lt.s32.totalorder %s12977_s24, 3 }
  0x17   : > { %s12980_s29 = smov [#allocation8]   ;;  %s12981_s13 = smov [#allocation11]  }
  0x18   : > { %p13131_p3 = pnand %p10278_p0, %p329_p2  ;;  %s353_s30 = sshll.u32 %s12980_s29, 4  ;;  %s13138_s30 = int_to_ptr.vmem [resolvable:$true] %s353_s30 }
  0x19   : > { %s377_s14 = sshll.u32 %s12981_s13, 4  ;;  %s12982_s16 = smov [#allocation14]   ;;  %s13146_s14 = int_to_ptr.vmem [resolvable:$true] %s377_s14 }
  0x1a   : > { %s14568_s28 = scalar_select %p13131_p3, 1, 0 }
  0x1b   : > { %p11601_p5 = pneg %p13131_p3  ;;  %s13148_s17 = sshll.u32 %s12982_s16, 4  ;;  %s402_s17 = int_to_ptr.vmem [resolvable:$true] %s13148_s17 }
  0x1c   : > { %14569 = sst [smem:[#allocation32_spill]] %s14568_s28  ;;  %s14571_s2 = sld [smem:[#allocation35_spill]] }
  0x1d   : > { %p13142_p6 = pnand %p11601_p5, %p14555_p1 }
  0x1f   : > { %p13158_p8 = pneg %p13142_p6 }
  0x22   : > { %s12543_s20 = scalar_lea.hbm %s14571_s2, 48 }
  0x23   : > { %p12544_p7 = scmp.ne.s32.totalorder %s14571_s2, %s12543_s20  ;;  %p12550_p11 = scmp.lt.u32.totalorder %s12543_s20, %s14571_s2 }
  0x25   : > { %p12546_p9 = pnand %p13158_p8, %p12544_p7 }
  0x27   : > { %p12547_p10 = pneg %p12546_p9 }
  0x29   : > { %p12552_p12 = pnand %p12550_p11, %p12547_p10 }
  0x2b   : > { %12555 = shalt.err (!%p12552_p12)
}
  0x2c   : > { %s12556_s18 = scalar_lea.vmem %s13129_s26, 48  ;;  %s12563_s19 = scalar_lea.vmem %s13129_s26, 64 }
  0x2d   : > { %p12557_p13 = scmp.ne.s32.totalorder %s13129_s26, %s12556_s18  ;;  %p12564_p5 = scmp.lt.s32.totalorder %s13129_s26, %s13129_s26 }
  0x2e   : > { %p12565_p7 = scmp.lt.s32.totalorder %s12563_s19, %s12556_s18 }
  0x2f   : > { %p12559_p0 = pnand %p12557_p13, %p13158_p8 }
  0x30   : > { %p12566_p9 = por %p12565_p7, %p12564_p5 }
  0x31   : > { %p12560_p2 = pneg %p12559_p0 }
  0x33   : > { %p12567_p4 = pnand %p12566_p9, %p12560_p2 }
  0x35   : > { %12570 = shalt.err (!%p12567_p4)
}
  0x36   : > { %11604 = dma.hbm_to_vmem [thread:$0]  (!%p13142_p6), %s14571_s2, 48, %s13129_s26, [#allocation6]  }
  0x37   : > { %s14573_s3 = sld [smem:[#allocation36_spill]] }
  0x3d   : > { %s12571_s16 = scalar_lea.hbm %s14573_s3, 48 }
  0x3e   : > { %p12572_p10 = scmp.ne.s32.totalorder %s14573_s3, %s12571_s16  ;;  %p12578_p4 = scmp.lt.u32.totalorder %s12571_s16, %s14573_s3 }
  0x40   : > { %p12574_p11 = pnand %p12572_p10, %p13158_p8 }
  0x42   : > { %p12575_p12 = pneg %p12574_p11 }
  0x44   : > { %p12580_p13 = pnand %p12578_p4, %p12575_p12 }
  0x46   : > { %12583 = shalt.err (!%p12580_p13)
}
  0x47   : > { %s12584_s26 = scalar_lea.vmem %s13138_s30, 48  ;;  %s12591_s1 = scalar_lea.vmem %s13138_s30, 64 }
  0x48   : > { %p12585_p0 = scmp.ne.s32.totalorder %s13138_s30, %s12584_s26  ;;  %p12592_p7 = scmp.lt.s32.totalorder %s13138_s30, %s13138_s30 }
  0x49   : > { %p12593_p9 = scmp.lt.s32.totalorder %s12591_s1, %s12584_s26 }
  0x4a   : > { %p12587_p2 = pnand %p12585_p0, %p13158_p8 }
  0x4b   : > { %p12594_p10 = por %p12593_p9, %p12592_p7 }
  0x4c   : > { %p12588_p5 = pneg %p12587_p2 }
  0x4e   : > { %p12595_p11 = pnand %p12594_p10, %p12588_p5 }
  0x50   : > { %12598 = shalt.err (!%p12595_p11)
}
  0x51   : > { %11607 = dma.hbm_to_vmem [thread:$0]  (!%p13142_p6), %s14573_s3, 48, %s13138_s30, [#allocation9]  }
  0x52   : > { %s14574_s5 = sld [smem:[#allocation38_spill]] }
  0x58   : > { %s12599_s29 = scalar_lea.hbm %s14574_s5, 128 }
  0x59   : > { %p12600_p12 = scmp.ne.s32.totalorder %s14574_s5, %s12599_s29  ;;  %p12606_p0 = scmp.lt.u32.totalorder %s12599_s29, %s14574_s5 }
  0x5b   : > { %p12602_p4 = pnand %p12600_p12, %p13158_p8 }
  0x5d   : > { %p12603_p13 = pneg %p12602_p4 }
  0x5f   : > { %p12608_p2 = pnand %p12606_p0, %p12603_p13 }
  0x61   : > { %12611 = shalt.err (!%p12608_p2)
}
  0x62   : > { %s12612_s30 = scalar_lea.vmem %s13146_s14, 128  ;;  %p12620_p10 = scmp.lt.s32.totalorder %s13146_s14, %s13146_s14 }
  0x63   : > { %p12613_p5 = scmp.ne.s32.totalorder %s13146_s14, %s12612_s30  ;;  %p12621_p11 = scmp.lt.s32.totalorder %s12612_s30, %s12612_s30 }
  0x65   : > { %p12615_p7 = pnand %p12613_p5, %p13158_p8  ;;  %p12622_p12 = por %p12621_p11, %p12620_p10 }
  0x67   : > { %p12616_p9 = pneg %p12615_p7 }
  0x69   : > { %p12623_p4 = pnand %p12622_p12, %p12616_p9 }
  0x6b   : > { %12626 = shalt.err (!%p12623_p4)
}
  0x6c   : > { %11613 = dma.hbm_to_vmem [thread:$0]  (!%p13142_p6), %s14574_s5, 128, %s13146_s14, [#allocation12]  }
  0x6d   : > { %s12983_s12 = smov [#allocation17]   ;;  %s12627_s16 = scalar_lea.hbm %s14546_s7, 48 }
  0x6e   : > { %s425_s20 = sshll.u32 %s12983_s12, 4  ;;  %p12628_p13 = scmp.ne.s32.totalorder %s14546_s7, %s12627_s16  ;;  %s426_s20 = int_to_ptr.vmem [resolvable:$true] %s425_s20 }
  0x6f   : > { %p12634_p5 = scmp.lt.u32.totalorder %s12627_s16, %s14546_s7 }
  0x70   : > { %p12630_p0 = pnand %p12628_p13, %p13158_p8 }
  0x72   : > { %p12631_p2 = pneg %p12630_p0 }
  0x74   : > { %p12636_p7 = pnand %p12634_p5, %p12631_p2 }
  0x76   : > { %12639 = shalt.err (!%p12636_p7)
}
  0x77   : > { %s12640_s14 = scalar_lea.vmem %s402_s17, 48  ;;  %s12647_s1 = scalar_lea.vmem %s402_s17, 64 }
  0x78   : > { %p12641_p9 = scmp.ne.s32.totalorder %s402_s17, %s12640_s14  ;;  %p12648_p12 = scmp.lt.s32.totalorder %s402_s17, %s402_s17 }
  0x79   : > { %p12649_p4 = scmp.lt.s32.totalorder %s12647_s1, %s12640_s14 }
  0x7a   : > { %p12643_p10 = pnand %p12641_p9, %p13158_p8 }
  0x7b   : > { %p12650_p1 = por %p12649_p4, %p12648_p12 }
  0x7c   : > { %p12644_p11 = pneg %p12643_p10 }
  0x7e   : > { %p12651_p3 = pnand %p12650_p1, %p12644_p11 }
  0x80   : > { %12654 = shalt.err (!%p12651_p3)
}
  0x81   : > { %11619 = dma.hbm_to_vmem [thread:$0]  (!%p13142_p6), %s14546_s7, 48, %s402_s17, [#allocation15]  }
  0x82   : > { %s12655_s16 = scalar_lea.hbm %s14548_s9, 160 }
  0x83   : > { %p12656_p13 = scmp.ne.s32.totalorder %s14548_s9, %s12655_s16  ;;  %p12662_p3 = scmp.lt.u32.totalorder %s12655_s16, %s14548_s9 }
  0x85   : > { %p12658_p0 = pnand %p12656_p13, %p13158_p8 }
  0x87   : > { %p12659_p1 = pneg %p12658_p0 }
  0x89   : > { %p12664_p2 = pnand %p12662_p3, %p12659_p1 }
  0x8b   : > { %12667 = shalt.err (!%p12664_p2)
}
  0x8c   : > { %s12668_s14 = scalar_lea.vmem %s426_s20, 160  ;;  %p12676_p10 = scmp.lt.s32.totalorder %s426_s20, %s426_s20 }
  0x8d   : > { %p12669_p5 = scmp.ne.s32.totalorder %s426_s20, %s12668_s14  ;;  %p12677_p11 = scmp.lt.s32.totalorder %s12668_s14, %s12668_s14 }
  0x8f   : > { %p12671_p7 = pnand %p12669_p5, %p13158_p8  ;;  %p12678_p12 = por %p12677_p11, %p12676_p10 }
  0x91   : > { %p12672_p9 = pneg %p12671_p7 }
  0x93   : > { %p12679_p4 = pnand %p12678_p12, %p12672_p9 }
  0x95   : > { %12682 = shalt.err (!%p12679_p4)
}
  0x96   : > { %11625 = dma.hbm_to_vmem [thread:$0]  (!%p13142_p6), %s14548_s9, 160, %s426_s20, [#allocation18]  }
  0x97   : > { %s12984_s28 = smov [#allocation10]   ;;  %s14575_s4 = sld [smem:[#allocation37_spill]] }
  0x98   : > { %s363_s12 = sshll.u32 %s12984_s28, 4  ;;  %s364_s12 = int_to_ptr.vmem [resolvable:$true] %s363_s12 }
  0x9d   : > { %s12683_s16 = scalar_lea.hbm %s14575_s4, 19968 }
  0x9e   : > { %p12684_p13 = scmp.ne.s32.totalorder %s14575_s4, %s12683_s16  ;;  %p12690_p3 = scmp.lt.u32.totalorder %s12683_s16, %s14575_s4 }
  0xa0   : > { %p12686_p0 = pnand %p12684_p13, %p13158_p8 }
  0xa2   : > { %p12687_p1 = pneg %p12686_p0 }
  0xa4   : > { %p12692_p2 = pnand %p12690_p3, %p12687_p1 }
  0xa6   : > { %12695 = shalt.err (!%p12692_p2)
}
  0xa7   : > { %s12696_s20 = scalar_lea.vmem %s364_s12, 19968  ;;  %p12704_p10 = scmp.lt.s32.totalorder %s364_s12, %s364_s12 }
  0xa8   : > { %p12697_p5 = scmp.ne.s32.totalorder %s364_s12, %s12696_s20  ;;  %p12705_p11 = scmp.lt.s32.totalorder %s12696_s20, %s12696_s20 }
  0xaa   : > { %p12699_p7 = pnand %p12697_p5, %p13158_p8  ;;  %p12706_p12 = por %p12705_p11, %p12704_p10 }
  0xac   : > { %p12700_p9 = pneg %p12699_p7 }
  0xae   : > { %p12707_p4 = pnand %p12706_p12, %p12700_p9 }
  0xb0   : > { %12710 = shalt.err (!%p12707_p4)
}
  0xb1   : > { %s12985_s14 = smov 512   ;;  %s12986_s17 = smov 32  }
  0xb2   : > { %11610 = dma.hbm_to_vmem [thread:$0]  (!%p13142_p6), %s14575_s4, 19968, %s364_s12, [#allocation9], %s12985_s14, %s12985_s14, %s12986_s17  }
  0xb3   : > { %s12987_s25 = smov [#allocation13]   ;;  %s12711_s19 = scalar_lea.hbm %s14545_s6, 9216 }
  0xb4   : > { %s387_s29 = sshll.u32 %s12987_s25, 4  ;;  %p12712_p13 = scmp.ne.s32.totalorder %s14545_s6, %s12711_s19  ;;  %s388_s29 = int_to_ptr.vmem [resolvable:$true] %s387_s29 }
  0xb5   : > { %p12718_p3 = scmp.lt.u32.totalorder %s12711_s19, %s14545_s6 }
  0xb6   : > { %p12714_p0 = pnand %p12712_p13, %p13158_p8 }
  0xb8   : > { %p12715_p1 = pneg %p12714_p0 }
  0xba   : > { %p12720_p2 = pnand %p12718_p3, %p12715_p1 }
  0xbc   : > { %12723 = shalt.err (!%p12720_p2)
}
  0xbd   : > { %s12724_s12 = scalar_lea.vmem %s388_s29, 9216  ;;  %p12732_p10 = scmp.lt.s32.totalorder %s388_s29, %s388_s29 }
  0xbe   : > { %p12725_p5 = scmp.ne.s32.totalorder %s388_s29, %s12724_s12  ;;  %p12733_p11 = scmp.lt.s32.totalorder %s12724_s12, %s12724_s12 }
  0xc0   : > { %p12727_p7 = pnand %p12725_p5, %p13158_p8  ;;  %p12734_p12 = por %p12733_p11, %p12732_p10 }
  0xc2   : > { %p12728_p9 = pneg %p12727_p7 }
  0xc4   : > { %p12735_p4 = pnand %p12734_p12, %p12728_p9 }
  0xc6   : > { %12738 = shalt.err (!%p12735_p4)
}
  0xc7   : > { %s14557_s14 = smov 192   ;;  %s14558_s17 = smov 12  }
  0xc8   : > { %11616 = dma.hbm_to_vmem [thread:$0]  (!%p13142_p6), %s14545_s6, 9216, %s388_s29, [#allocation12], %s14557_s14, %s14557_s14, %s14558_s17  }
  0xc9   : > { %s12990_s28 = smov [#allocation16]   ;;  %s12739_s19 = scalar_lea.hbm %s14547_s8, 24960 }
  0xca   : > { %s411_s25 = sshll.u32 %s12990_s28, 4  ;;  %p12740_p13 = scmp.ne.s32.totalorder %s14547_s8, %s12739_s19  ;;  %s412_s25 = int_to_ptr.vmem [resolvable:$true] %s411_s25 }
  0xcb   : > { %p12746_p3 = scmp.lt.u32.totalorder %s12739_s19, %s14547_s8 }
  0xcc   : > { %p12742_p0 = pnand %p12740_p13, %p13158_p8 }
  0xce   : > { %p12743_p1 = pneg %p12742_p0 }
  0xd0   : > { %p12748_p2 = pnand %p12746_p3, %p12743_p1 }
  0xd2   : > { %12751 = shalt.err (!%p12748_p2)
}
  0xd3   : > { %s12752_s29 = scalar_lea.vmem %s412_s25, 24960  ;;  %p12760_p10 = scmp.lt.s32.totalorder %s412_s25, %s412_s25 }
  0xd4   : > { %p12753_p5 = scmp.ne.s32.totalorder %s412_s25, %s12752_s29  ;;  %p12761_p11 = scmp.lt.s32.totalorder %s12752_s29, %s12752_s29 }
  0xd6   : > { %p12755_p7 = pnand %p12753_p5, %p13158_p8  ;;  %p12762_p12 = por %p12761_p11, %p12760_p10 }
  0xd8   : > { %p12756_p9 = pneg %p12755_p7 }
  0xda   : > { %p12763_p4 = pnand %p12762_p12, %p12756_p9 }
  0xdc   : > { %12766 = shalt.err (!%p12763_p4)
}
  0xdd   : > { %s12991_s2 = smov 640   ;;  %s12992_s1 = smov 40  }
  0xde   : > { %11622 = dma.hbm_to_vmem [thread:$0]  (!%p13142_p6), %s14547_s8, 24960, %s412_s25, [#allocation15], %s12991_s2, %s12991_s2, %s12992_s1  }
  0xdf   : > { %s12993_s18 = smov [#allocation19]   ;;  %s12994_s26 = smov [#allocation20]  }
  0xe0   : > { %s435_s19 = sshll.u32 %s12993_s18, 4  ;;  %s449_s30 = sshll.u32 %s12994_s26, 4  ;;  %s436_s19 = int_to_ptr.vmem [resolvable:$true] %s435_s19  ;;  %s13321_s30 = int_to_ptr.vmem [resolvable:$true] %s449_s30 }
  0xe1   : > { %s12767_s29 = scalar_lea.hbm %s14549_s10, 29952 }
  0xe2   : > { %p12768_p13 = scmp.ne.s32.totalorder %s14549_s10, %s12767_s29  ;;  %p12774_p3 = scmp.lt.u32.totalorder %s12767_s29, %s14549_s10 }
  0xe4   : > { %p12770_p0 = pnand %p12768_p13, %p13158_p8 }
  0xe6   : > { %p12771_p1 = pneg %p12770_p0 }
  0xe8   : > { %p12776_p2 = pnand %p12774_p3, %p12771_p1 }
  0xea   : > { %12779 = shalt.err (!%p12776_p2)
}
  0xeb   : > { %s12780_s2 = scalar_lea.vmem %s436_s19, 29952  ;;  %p12788_p10 = scmp.lt.s32.totalorder %s436_s19, %s436_s19 }
  0xec   : > { %p12781_p5 = scmp.ne.s32.totalorder %s436_s19, %s12780_s2  ;;  %p12789_p11 = scmp.lt.s32.totalorder %s12780_s2, %s12780_s2 }
  0xee   : > { %p12783_p7 = pnand %p12781_p5, %p13158_p8  ;;  %p12790_p12 = por %p12789_p11, %p12788_p10 }
  0xf0   : > { %p12784_p9 = pneg %p12783_p7 }
  0xf2   : > { %p12791_p4 = pnand %p12790_p12, %p12784_p9 }
  0xf4   : > { %12794 = shalt.err (!%p12791_p4)
}
  0xf5   : > { %s14576_s14 = smov 12   ;;  %s14577_s17 = smov 192  }
  0xf6   : > { %11628 = dma.hbm_to_vmem [thread:$0]  (!%p13142_p6), %s14549_s10, 29952, %s436_s19, [#allocation18], %s14577_s17, %s14577_s17, %s14576_s14  }
  0xf7   : > { %s12795_s20 = scalar_lea.hbm %s14550_s11, 48 }
  0xf8   : > { %p12796_p13 = scmp.ne.s32.totalorder %s14550_s11, %s12795_s20  ;;  %p12802_p3 = scmp.lt.u32.totalorder %s12795_s20, %s14550_s11 }
  0xfa   : > { %p12798_p0 = pnand %p12796_p13, %p13158_p8 }
  0xfc   : > { %p12799_p1 = pneg %p12798_p0 }
  0xfe   : > { %p12804_p2 = pnand %p12802_p3, %p12799_p1 }
 0x100   : > { %12807 = shalt.err (!%p12804_p2)
}
 0x101   : > { %s12808_s19 = scalar_lea.vmem %s13321_s30, 48  ;;  %s12815_s2 = scalar_lea.vmem %s13321_s30, 64 }
 0x102   : > { %p12809_p5 = scmp.ne.s32.totalorder %s13321_s30, %s12808_s19  ;;  %p12816_p10 = scmp.lt.s32.totalorder %s13321_s30, %s13321_s30 }
 0x103   : > { %p12817_p11 = scmp.lt.s32.totalorder %s12815_s2, %s12808_s19 }
 0x104   : > { %p12811_p7 = pnand %p12809_p5, %p13158_p8 }
 0x105   : > { %p12818_p12 = por %p12817_p11, %p12816_p10 }
 0x106   : > { %p12812_p9 = pneg %p12811_p7 }
 0x108   : > { %p12819_p4 = pnand %p12818_p12, %p12812_p9 }
 0x10a   : > { %12822 = shalt.err (!%p12819_p4)
}
 0x10b   : > { %11631 = dma.hbm_to_vmem [thread:$0]  (!%p13142_p6), %s14550_s11, 48, %s13321_s30, [#allocation21]  }
 0x10c   : > { %s10277_s15 = sadd.s32 4294967294, %s12977_s24   ;;  %s13370_s13 = sadd.s32 1, %s12977_s24  }
 0x10d   : > { %s40_s1 = ssub.s32 %s12977_s24, %s13370_s13  ;;  %s43_s16 = sadd.s32 1, %s12973_s23 }
 0x10e   : > { %p41_p8 = scmp.eq.s32.totalorder %s40_s1, 0  ;;  %p50_p13 = scmp.ne.s32.totalorder %s12973_s23, %s12969_s22 }
 0x10f   : > { %p51_p0 = scmp.eq.s32.totalorder %s12977_s24, 0  ;;  %p56_p1 = scmp.ne.s32.totalorder %s12969_s22, %s12965_s21 }
 0x110   : > { %s13381_s18 = scalar_select %p41_p8, %s12973_s23, %s43_s16  }
 0x111   : > { %p52_p3 = por %p51_p0, %p50_p13  ;;  %p14578_p2 = scmp.eq.s32.totalorder %s13124_s27, 0 }
 0x112   : > { %p316_p6 = scmp.eq.s32.totalorder %s13124_s27, 1  ;;  %p322_p7 = scmp.eq.s32.totalorder %s10277_s15, 1 }
 0x113   : > { %p13385_p5 = por %p14578_p2, %p56_p1  ;;  %p11653_p9 = scmp.lt.s32.totalorder %s12977_s24, 2 }
 0x114   : > { %s13392_s30 = sand.u32 1, %s12973_s23   ;;  %p13394_p10 = por %p316_p6, %p50_p13 }
 0x115   : > { %s14579_s26 = scalar_select %p13385_p5, 1, 0 }
 0x116   : > { %s14580_s20 = scalar_select %p13394_p10, 1, 0 }
 0x117   : > { %p13398_p11 = por %p322_p7, %p56_p1  ;;  %s11551_s29 = smul.u32 24, %s13392_s30 }
 0x118   : > { %s11552_s28 = smul.u32 384, %s12977_s24  ;;  %p13404_p12 = pnand %p11653_p9, %p52_p3 }
 0x119   : > { %s14581_s12 = scalar_select %p13398_p11, 1, 0 }
 0x11a   : > { %s14583_s0 = sld [smem:[#allocation33_spill]]  ;;  %s464_s15 = scalar_lea.vmem [#allocation2], %s11551_s29 }
 0x11b   : > { %s472_s1 = sshll.u32 %s464_s15, 4  ;;  %s461_s16 = scalar_lea.sflag [#allocation3], %s13392_s30  ;;  %s13414_s1 = int_to_ptr.vmem [resolvable:$true] %s472_s1 }
 0x11c   : > { %p12825_p8 = pneg %p13404_p12 }
 0x120   : > { %s13412_s17 = scalar_lea.hbm %s14583_s0, %s11552_s28  ;;  %s12828_s14 = scalar_lea.hbm %s14583_s0, 768 }
 0x121   : > { %s12823_s3 = scalar_lea.hbm %s13412_s17, 384  ;;  %p12829_p1 = scmp.lt.u32.totalorder %s13412_s17, %s14583_s0 }
 0x122   : > { %p12824_p4 = scmp.ne.s32.totalorder %s13412_s17, %s12823_s3  ;;  %p12830_p3 = scmp.lt.u32.totalorder %s12828_s14, %s12823_s3 }
 0x123   : > { %p12832_p6 = scmp.lt.u32.totalorder %s12823_s3, %s13412_s17 }
 0x124   : > { %p12826_p13 = pnand %p12825_p8, %p12824_p4  ;;  %p12831_p2 = por %p12830_p3, %p12829_p1 }
 0x126   : > { %p12827_p0 = pneg %p12826_p13  ;;  %p12833_p7 = por %p12832_p6, %p12831_p2 }
 0x128   : > { %p12834_p9 = pnand %p12833_p7, %p12827_p0 }
 0x12a   : > { %12837 = shalt.err (!%p12834_p9)
}
 0x12b   : > { %s12838_s29 = scalar_lea.vmem %s13414_s1, 384  ;;  %s12995_s15 = smov [#allocation2]  }
 0x12c   : > { %p12839_p4 = scmp.ne.s32.totalorder %s13414_s1, %s12838_s29  ;;  %s12843_s2 = sshll.u32 %s12995_s15, 4  ;;  %s12844_s2 = int_to_ptr.vmem [resolvable:$false] %s12843_s2 }
 0x12d   : > { %s12845_s4 = scalar_lea.vmem %s12844_s2, 768  ;;  %p12846_p10 = scmp.lt.s32.totalorder %s13414_s1, %s12844_s2 }
 0x12e   : > { %p12841_p13 = pnand %p12839_p4, %p12825_p8  ;;  %p12847_p1 = scmp.lt.s32.totalorder %s12845_s4, %s12838_s29 }
 0x130   : > { %p12842_p11 = pneg %p12841_p13  ;;  %p12848_p3 = por %p12847_p1, %p12846_p10 }
 0x132   : > { %p12849_p2 = pnand %p12848_p3, %p12842_p11 }
 0x134   : > { %12852 = shalt.err (!%p12849_p2)
}
 0x135   : > { %11635 = dma.hbm_to_vmem [thread:$0]  (!%p13404_p12), %s13412_s17, 384, %s13414_s1, %s461_s16  }
 0x136   : > { %s10291_s3 = sshll.u32 %s12977_s24, 4  ;;  %s482_s19 = scalar_lea.vmem [#allocation5], %s13392_s30 }
 0x137   : > { %s489_s28 = sshll.u32 %s482_s19, 4  ;;  %s14584_s0 = sld [smem:[#allocation34_spill]]  ;;  %s490_s28 = int_to_ptr.vmem [resolvable:$true] %s489_s28 }
 0x138   : > { %s14585_s29 = sand.u32 1, %s12977_s24  }
 0x139   : > { %s480_s4 = scalar_lea.sflag [#allocation6], %s14585_s29 }
 0x13d   : > { %s13447_s2 = scalar_lea.hbm %s14584_s0, %s10291_s3  ;;  %s12858_s1 = scalar_lea.hbm %s14584_s0, 32 }
 0x13e   : > { %s12853_s5 = scalar_lea.hbm %s13447_s2, 16  ;;  %p12859_p6 = scmp.lt.u32.totalorder %s13447_s2, %s14584_s0 }
 0x13f   : > { %p12854_p10 = scmp.ne.s32.totalorder %s13447_s2, %s12853_s5  ;;  %p12860_p7 = scmp.lt.u32.totalorder %s12858_s1, %s12853_s5 }
 0x140   : > { %p12862_p4 = scmp.lt.u32.totalorder %s12853_s5, %s13447_s2 }
 0x141   : > { %p12856_p11 = pnand %p12854_p10, %p12825_p8  ;;  %p12861_p9 = por %p12860_p7, %p12859_p6 }
 0x143   : > { %p12857_p0 = pneg %p12856_p11  ;;  %p12863_p13 = por %p12862_p4, %p12861_p9 }
 0x145   : > { %p12864_p1 = pnand %p12863_p13, %p12857_p0 }
 0x147   : > { %12867 = shalt.err (!%p12864_p1)
}
 0x148   : > { %s12868_s19 = scalar_lea.vmem %s490_s28, 16  ;;  %s12996_s14 = smov [#allocation5]  }
 0x149   : > { %p12869_p3 = scmp.ne.s32.totalorder %s490_s28, %s12868_s19  ;;  %s12873_s15 = sshll.u32 %s12996_s14, 4  ;;  %s12874_s15 = int_to_ptr.vmem [resolvable:$false] %s12873_s15 }
 0x14a   : > { %s12875_s29 = scalar_lea.vmem %s12874_s15, 32  ;;  %p12876_p11 = scmp.lt.s32.totalorder %s490_s28, %s12874_s15 }
 0x14b   : > { %p12871_p2 = pnand %p12869_p3, %p12825_p8  ;;  %p12877_p5 = scmp.lt.s32.totalorder %s12875_s29, %s12868_s19 }
 0x14d   : > { %p12872_p10 = pneg %p12871_p2  ;;  %p12878_p6 = por %p12877_p5, %p12876_p11 }
 0x14f   : > { %p12879_p7 = pnand %p12878_p6, %p12872_p10 }
 0x151   : > { %12882 = shalt.err (!%p12879_p7)
}
 0x152   : > { %11638 = dma.hbm_to_vmem [thread:$0]  (!%p13404_p12), %s13447_s2, 16, %s490_s28, %s480_s4  }
 0x153   : > { %s14586_s5 = sld [smem:[#allocation32_spill]] }
 0x159   : > { %p14587_p0 = scmp.ne.s32.totalorder %s14586_s5, 0 }
 0x15a   : > { %s13473_s30 = sand.u32 (!%p14587_p0), 1, %s12969_s22   ;;  %p14588_p5 = scmp.ne.s32.totalorder (!%p14587_p0), %s14579_s26, 0 }
 0x15b   : > { %498 = sbr.rel (%p14587_p0) target bundleno = 3276 (0xccc), region = 68  ;;  %s501_s1 = scalar_lea.sflag (!%p14587_p0), [#allocation3], %s13473_s30 }
 0x15c   : > { %s11553_s17 = smul.u32 (!%p14587_p0), 24, %s13473_s30 }
 0x15e   : > { %s13479_s16 = scalar_lea.vmem (!%p14587_p0), [#allocation2], %s11553_s17 }
 0x162   : > { %12928 = dma.done.wait (%p14588_p5), %s501_s1, 384  }
 0x163   : > { %12930 = vsyncadd (%p14588_p5), %s501_s1, 4294966912  ;;  %s509_s25 = sand.u32 1, %s13124_s27   ;;  %s512_s2 = scalar_lea.vmem [#allocation5], %s13473_s30 }
 0x164   : > { %s510_s28 = scalar_lea.sflag [#allocation6], %s509_s25 }
 0x165   : > { %12932 = dma.done.wait (%p14588_p5), %s510_s28, 16  }
 0x166   : > { %12934 = vsyncadd (%p14588_p5), %s510_s28, 4294967280  ;;  %p14589_p12 = scmp.eq.s32.totalorder %s13124_s27, 0 }
 0x168   : > { %12936 = dma.done.wait (%p14589_p12), [#allocation6], 48   ;;  %p14590_p8 = pmov %p14589_p12 }
 0x16a   : > { %12938 = vsyncadd (%p14590_p8), [#allocation6], 4294967248  ;;  %p14591_p9 = pmov %p14590_p8 }
 0x16b   : > { %p14592_p4 = pmov %p14590_p8 }
 0x16c   : > { %12940 = dma.done.wait (%p14591_p9), [#allocation9], 20016  }
 0x16d   : > { %12942 = vsyncadd (%p14592_p4), [#allocation9], 4294947280  ;;  %p14593_p13 = pmov %p14592_p4 }
 0x16e   : > { %p14594_p1 = pmov %p14592_p4 }
 0x16f   : > { %12944 = dma.done.wait (%p14593_p13), [#allocation12], 9344  }
 0x170   : > { %12946 = vsyncadd (%p14594_p1), [#allocation12], 4294957952  ;;  %p14595_p3 = pmov %p14594_p1 }
 0x171   : > { %p14596_p2 = pmov %p14594_p1 }
 0x172   : > { %12948 = dma.done.wait (%p14595_p3), [#allocation15], 25008  }
 0x173   : > { %12950 = vsyncadd (%p14596_p2), [#allocation15], 4294942288  ;;  %p14597_p10 = pmov %p14594_p1 }
 0x174   : > { %p14598_p11 = pmov %p14594_p1 }
 0x175   : > { %12952 = dma.done.wait (%p14597_p10), [#allocation18], 30112  }
 0x176   : > { %12954 = vsyncadd (%p14598_p11), [#allocation18], 4294937184  ;;  %p14599_p6 = pmov %p14594_p1 }
 0x177   : > { %p14600_p7 = pmov %p14594_p1 }
 0x178   : > { %12956 = dma.done.wait (%p14599_p6), [#allocation21], 48  }
 0x179   : > { %12958 = vsyncadd (%p14600_p7), [#allocation21], 4294967248  ;;  %vm604_vm0 = vcmask 457728   ;;  %v598_v0 = vld [vmem:[%s13479_s16] sm:$0xff]  ;;  %v599_v1 = vld [vmem:[%s13479_s16 + $0x8] sm:$0xff]  ;;  %vm1650_vm1 = vcmask 1043456  }
 0x17a   : > { %v600_v2 = vld [vmem:[%s13479_s16 + $0x10] sm:$0xff]  ;;  %v603_v3 = vadd.f32 %v599_v1, %v598_v0  ;;  %v669_v6 = vld [vmem:[#allocation10] sm:$0xff]  ;;  %s12998_s26 = smov 72   ;;  %s12999_s4 = smov 20   ;;  %vm13007_vm2 = vmmov 0   ;;  %vm2058_vm3 = vcmask 162816  }
 0x17b   : > { %v605_v4 = vsel %vm604_vm0, %v600_v2, 0.0  ;;  %v673_v7 = vld [vmem:[#allocation10 + $0x20] sm:$0xff]  ;;  %v670_v8 = vld [vmem:[#allocation10 + $0x8] sm:$0xff]  ;;  %s13000_s3 = smov 70   ;;  %s13001_s19 = smov 102   ;;  %vm3404_vm4 = vcmask 211968  }
 0x17c   : > { %v606_v5 = vadd.f32 %v605_v4, %v603_v3  ;;  %v10304_v9 = vcombine.high %v669_v6, %v673_v7  ;;  %v674_v10 = vld [vmem:[#allocation10 + $0x28] sm:$0xff]  ;;  %v10303_v11 = vcombine.low %v669_v6, %v673_v7  ;;  %v677_v12 = vld [vmem:[#allocation10 + $0x40] sm:$0xff]  ;;  %s13002_s14 = smov 46   ;;  %s13003_s15 = smov 122   ;;  %vm2078_vm5 = vcmask 146432  }
 0x17d   : > { %v681_v13 = vld [vmem:[#allocation10 + $0x60] sm:$0xff]  ;;  %v10306_v14 = vcombine.high %v670_v8, %v674_v10  ;;  %v10305_v15 = vcombine.low %v670_v8, %v674_v10  ;;  %v678_v17 = vld [vmem:[#allocation10 + $0x48] sm:$0xff]  ;;  %s13004_s29 = smov 76   ;;  %s13005_s5 = smov 50   ;;  %vm2018_vm6 = vcmask 195584   ;;  %vm2038_vm7 = vcmask 179200  }
 0x17e   : > { %607 = vadd.xlane.f32.xlu0 %v606_v5  ;;  %v10312_v16 = vcombine.high %v677_v12, %v681_v13  ;;  %v682_v18 = vld [vmem:[#allocation10 + $0x68] sm:$0xff]  ;;  %v685_v19 = vld [vmem:[#allocation10 + $0x80] sm:$0xff]  ;;  %1675 = vmatprep.subr.bf16.mxu0 %v10304_v9  ;;  %v10311_v24 = vcombine.low %v677_v12, %v681_v13  ;;  %s13008_s1 = smov 18   ;;  %s13009_s25 = smov 96   ;;  %vm2118_vm8 = vcmask 113664   ;;  %vm2098_vm9 = vcmask 130048  }
 0x17f   : > { %v10314_v20 = vcombine.high %v678_v17, %v682_v18  ;;  %v689_v21 = vld [vmem:[#allocation10 + $0xa0] sm:$0xff]  ;;  %v686_v22 = vld [vmem:[#allocation10 + $0x88] sm:$0xff]  ;;  %1757 = vmatprep.subr.bf16.mxu1 %v10306_v14  ;;  %1676 = vmatpush1.bf16.msra.mxu0 %v10303_v11  ;;  %v10313_v25 = vcombine.low %v678_v17, %v682_v18  ;;  %s13010_s28 = smov 44   ;;  %vm3988_vm10 = vcmask 64512   ;;  %vm2138_vm11 = vcmask 97280   ;;  %p14602_p5 = scmp.ne.s32.totalorder %s14580_s20, 0 }
 0x180   : > { %v690_v23 = vld [vmem:[#allocation10 + $0xa8] sm:$0xff]  ;;  %1758 = vmatpush1.bf16.msra.mxu1 %v10305_v15  ;;  %1677 = vmatprep.subr.bf16.mxu0 %v10312_v16  ;;  %v10320_v26 = vcombine.high %v685_v19, %v689_v21  ;;  %v693_v28 = vld [vmem:[#allocation10 + $0xc0] sm:$0xff]  ;;  %v10319_v32 = vcombine.low %v685_v19, %v689_v21  ;;  %vm4825_vm12 = vcmask 1044480   ;;  %vm9662_vm13 = vcmask 785408  }
 0x181   : > { %1759 = vmatprep.subr.bf16.mxu1 %v10314_v20  ;;  %v10322_v27 = vcombine.high %v686_v22, %v690_v23  ;;  %v697_v29 = vld [vmem:[#allocation10 + $0xe0] sm:$0xff]  ;;  %v694_v30 = vld [vmem:[#allocation10 + $0xc8] sm:$0xff]  ;;  %v10321_v33 = vcombine.low %v686_v22, %v690_v23 }
 0x182   : > { %v698_v31 = vld [vmem:[#allocation10 + $0xe8] sm:$0xff]  ;;  %v10328_v34 = vcombine.high %v693_v28, %v697_v29  ;;  %v701_v36 = vld [vmem:[#allocation10 + $0x100] sm:$0xff]  ;;  %v10327_v40 = vcombine.low %v693_v28, %v697_v29 }
 0x183   : > { %1678 = vmatpush1.bf16.msra.mxu0 %v10311_v24  ;;  %v10330_v35 = vcombine.high %v694_v30, %v698_v31  ;;  %v705_v37 = vld [vmem:[#allocation10 + $0x120] sm:$0xff]  ;;  %v702_v38 = vld [vmem:[#allocation10 + $0x108] sm:$0xff]  ;;  %v10329_v41 = vcombine.low %v694_v30, %v698_v31 }
 0x184   : > { %1760 = vmatpush1.bf16.msra.mxu1 %v10313_v25  ;;  %1679 = vmatprep.subr.bf16.mxu0 %v10320_v26  ;;  %v706_v39 = vld [vmem:[#allocation10 + $0x128] sm:$0xff]  ;;  %v10336_v42 = vcombine.high %v701_v36, %v705_v37  ;;  %v709_v43 = vld [vmem:[#allocation10 + $0x140] sm:$0xff]  ;;  %v10335_v48 = vcombine.low %v701_v36, %v705_v37 }
 0x185   : > { %1761 = vmatprep.subr.bf16.mxu1 %v10322_v27  ;;  %v713_v44 = vld [vmem:[#allocation10 + $0x160] sm:$0xff]  ;;  %v10338_v45 = vcombine.high %v702_v38, %v706_v39  ;;  %v710_v46 = vld [vmem:[#allocation10 + $0x148] sm:$0xff]  ;;  %v10337_v51 = vcombine.low %v702_v38, %v706_v39 }
 0x186   : > { %v714_v47 = vld [vmem:[#allocation10 + $0x168] sm:$0xff]  ;;  %v717_v49 = vld [vmem:[#allocation10 + $0x180] sm:$0xff]  ;;  %v10344_v52 = vcombine.high %v709_v43, %v713_v44  ;;  %v10343_v56 = vcombine.low %v709_v43, %v713_v44 }
 0x187   : > { %1680 = vmatpush1.bf16.msra.mxu0 %v10319_v32  ;;  %v721_v50 = vld [vmem:[#allocation10 + $0x1a0] sm:$0xff]  ;;  %v718_v53 = vld [vmem:[#allocation10 + $0x188] sm:$0xff]  ;;  %v10346_v55 = vcombine.high %v710_v46, %v714_v47  ;;  %v10345_v59 = vcombine.low %v710_v46, %v714_v47 }
 0x188   : > { %1762 = vmatpush1.bf16.msra.mxu1 %v10321_v33  ;;  %1681 = vmatprep.subr.bf16.mxu0 %v10328_v34  ;;  %v722_v54 = vld [vmem:[#allocation10 + $0x1a8] sm:$0xff]  ;;  %v725_v57 = vld [vmem:[#allocation10 + $0x1c0] sm:$0xff]  ;;  %v10352_v60 = vcombine.high %v717_v49, %v721_v50  ;;  %v10351_v0 = vcombine.low %v717_v49, %v721_v50 }
 0x189   : > { %1763 = vmatprep.subr.bf16.mxu1 %v10330_v35  ;;  %v729_v58 = vld [vmem:[#allocation10 + $0x1e0] sm:$0xff]  ;;  %v726_v61 = vld [vmem:[#allocation10 + $0x1c8] sm:$0xff]  ;;  %v10354_v63 = vcombine.high %v718_v53, %v722_v54  ;;  %v10353_v3 = vcombine.low %v718_v53, %v722_v54 }
 0x18a   : > { %v730_v62 = vld [vmem:[#allocation10 + $0x1e8] sm:$0xff]  ;;  %v733_v1 = vld [vmem:[#allocation10 + $0x200] sm:$0xff]  ;;  %v10360_v4 = vcombine.high %v725_v57, %v729_v58  ;;  %v10359_v8 = vcombine.low %v725_v57, %v729_v58 }
 0x18b   : > { %1682 = vmatpush1.bf16.msra.mxu0 %v10327_v40  ;;  %v737_v2 = vld [vmem:[#allocation10 + $0x220] sm:$0xff]  ;;  %v734_v5 = vld [vmem:[#allocation10 + $0x208] sm:$0xff]  ;;  %v10362_v7 = vcombine.high %v726_v61, %v730_v62  ;;  %v10361_v11 = vcombine.low %v726_v61, %v730_v62 }
 0x18c   : > { %1764 = vmatpush1.bf16.msra.mxu1 %v10329_v41  ;;  %1683 = vmatprep.subr.bf16.mxu0 %v10336_v42  ;;  %v738_v6 = vld [vmem:[#allocation10 + $0x228] sm:$0xff]  ;;  %v741_v9 = vld [vmem:[#allocation10 + $0x240] sm:$0xff]  ;;  %v10368_v12 = vcombine.high %v733_v1, %v737_v2  ;;  %v10367_v16 = vcombine.low %v733_v1, %v737_v2 }
 0x18d   : > { %1765 = vmatprep.subr.bf16.mxu1 %v10338_v45  ;;  %v745_v10 = vld [vmem:[#allocation10 + $0x260] sm:$0xff]  ;;  %v742_v13 = vld [vmem:[#allocation10 + $0x248] sm:$0xff]  ;;  %v10370_v15 = vcombine.high %v734_v5, %v738_v6  ;;  %v10369_v19 = vcombine.low %v734_v5, %v738_v6 }
 0x18e   : > { %v746_v14 = vld [vmem:[#allocation10 + $0x268] sm:$0xff]  ;;  %v749_v17 = vld [vmem:[#allocation10 + $0x280] sm:$0xff]  ;;  %v10376_v20 = vcombine.high %v741_v9, %v745_v10  ;;  %v10375_v24 = vcombine.low %v741_v9, %v745_v10 }
 0x18f   : > { %1684 = vmatpush1.bf16.msra.mxu0 %v10335_v48  ;;  %v753_v18 = vld [vmem:[#allocation10 + $0x2a0] sm:$0xff]  ;;  %v750_v21 = vld [vmem:[#allocation10 + $0x288] sm:$0xff]  ;;  %v10378_v23 = vcombine.high %v742_v13, %v746_v14  ;;  %v10377_v25 = vcombine.low %v742_v13, %v746_v14 }
 0x190   : > { %1766 = vmatpush1.bf16.msra.mxu1 %v10337_v51  ;;  %1685 = vmatprep.subr.bf16.mxu0 %v10344_v52  ;;  %v754_v22 = vld [vmem:[#allocation10 + $0x2a8] sm:$0xff]  ;;  %v10384_v26 = vcombine.high %v749_v17, %v753_v18  ;;  %v10383_v42 = vcombine.low %v749_v17, %v753_v18  ;;  %v757_v44 = vld [vmem:[#allocation10 + $0x2c0] sm:$0xff] }
 0x191   : > { %1767 = vmatprep.subr.bf16.mxu1 %v10346_v55  ;;  %v10386_v27 = vcombine.high %v750_v21, %v754_v22  ;;  %v12536_v30 = vld [vmem:[%s13479_s16] sm:$0xff]  ;;  %v12537_v32 = vld [vmem:[%s13479_s16 + $0x8] sm:$0xff]  ;;  %v12538_v34 = vld [vmem:[%s13479_s16 + $0x10] sm:$0xff]  ;;  %v10385_v43 = vcombine.low %v750_v21, %v754_v22 }
 0x192   : > { %v761_v45 = vld [vmem:[#allocation10 + $0x2e0] sm:$0xff]  ;;  %v758_v46 = vld [vmem:[#allocation10 + $0x2c8] sm:$0xff]  ;;  %v672_v22 = vld [vmem:[#allocation10 + $0x18] sm:$0xff] }
 0x193   : > { %1686 = vmatpush1.bf16.msra.mxu0 %v10343_v56  ;;  %v10392_v47 = vcombine.high %v757_v44, %v761_v45  ;;  %v762_v48 = vld [vmem:[#allocation10 + $0x2e8] sm:$0xff]  ;;  %v10391_v50 = vcombine.low %v757_v44, %v761_v45  ;;  %v765_v52 = vld [vmem:[#allocation10 + $0x300] sm:$0xff] }
 0x194   : > { %1768 = vmatpush1.bf16.msra.mxu1 %v10345_v59  ;;  %1687 = vmatprep.subr.bf16.mxu0 %v10352_v60  ;;  %v10394_v49 = vcombine.high %v758_v46, %v762_v48  ;;  %v10393_v51 = vcombine.low %v758_v46, %v762_v48  ;;  %v769_v53 = vld [vmem:[#allocation10 + $0x320] sm:$0xff]  ;;  %v766_v54 = vld [vmem:[#allocation10 + $0x308] sm:$0xff] }
 0x195   : > { %1769 = vmatprep.subr.bf16.mxu1 %v10354_v63  ;;  %v10400_v55 = vcombine.high %v765_v52, %v769_v53  ;;  %v770_v56 = vld [vmem:[#allocation10 + $0x328] sm:$0xff]  ;;  %v10399_v57 = vcombine.low %v765_v52, %v769_v53  ;;  %v773_v58 = vld [vmem:[#allocation10 + $0x340] sm:$0xff]  ;;  %v680_v53 = vld [vmem:[#allocation10 + $0x58] sm:$0xff] }
 0x196   : > { %v777_v59 = vld [vmem:[#allocation10 + $0x360] sm:$0xff]  ;;  %v10402_v60 = vcombine.high %v766_v54, %v770_v56  ;;  %v10401_v61 = vcombine.low %v766_v54, %v770_v56  ;;  %v774_v63 = vld [vmem:[#allocation10 + $0x348] sm:$0xff] }
 0x197   : > { %1688 = vmatpush1.bf16.msra.mxu0 %v10351_v0  ;;  %v10408_v62 = vcombine.high %v773_v58, %v777_v59  ;;  %v778_v0 = vld [vmem:[#allocation10 + $0x368] sm:$0xff]  ;;  %v781_v1 = vld [vmem:[#allocation10 + $0x380] sm:$0xff]  ;;  %v10407_v6 = vcombine.low %v773_v58, %v777_v59 }
 0x198   : > { %1770 = vmatpush1.bf16.msra.mxu1 %v10353_v3  ;;  %1689 = vmatprep.subr.bf16.mxu0 %v10360_v4  ;;  %v10410_v2 = vcombine.high %v774_v63, %v778_v0  ;;  %v785_v3 = vld [vmem:[#allocation10 + $0x3a0] sm:$0xff]  ;;  %v782_v4 = vld [vmem:[#allocation10 + $0x388] sm:$0xff] }
 0x199   : > { %1771 = vmatprep.subr.bf16.mxu1 %v10362_v7  ;;  %v786_v5 = vld [vmem:[#allocation10 + $0x3a8] sm:$0xff]  ;;  %v10409_v7 = vcombine.low %v774_v63, %v778_v0  ;;  %v789_v9 = vld [vmem:[#allocation10 + $0x3c0] sm:$0xff]  ;;  %v10415_v14 = vcombine.low %v781_v1, %v785_v3 }
 0x19a   : > { %v793_v10 = vld [vmem:[#allocation10 + $0x3e0] sm:$0xff]  ;;  %v794_v13 = vld [vmem:[#allocation10 + $0x3e8] sm:$0xff] }
 0x19b   : > { %1690 = vmatpush1.bf16.msra.mxu0 %v10359_v8  ;;  %v10416_v8 = vcombine.high %v781_v1, %v785_v3  ;;  %v10423_v18 = vcombine.low %v789_v9, %v793_v10  ;;  %v801_v21 = vld [vmem:[#allocation10 + $0x420] sm:$0xff] }
 0x19c   : > { %1772 = vmatpush1.bf16.msra.mxu1 %v10361_v11  ;;  %1691 = vmatprep.subr.bf16.mxu0 %v10368_v12  ;;  %v790_v11 = vld [vmem:[#allocation10 + $0x3c8] sm:$0xff]  ;;  %v10418_v12 = vcombine.high %v782_v4, %v786_v5  ;;  %v809_v52 = vld [vmem:[#allocation10 + $0x460] sm:$0xff] }
 0x19d   : > { %1773 = vmatprep.subr.bf16.mxu1 %v10370_v15  ;;  %v10417_v15 = vcombine.low %v782_v4, %v786_v5  ;;  %v10426_v17 = vcombine.high %v790_v11, %v794_v13  ;;  %v817_v59 = vld [vmem:[#allocation10 + $0x4a0] sm:$0xff]  ;;  %v696_v5 = vld [vmem:[#allocation10 + $0xd8] sm:$0xff] }
 0x19e   : > { %v821_v3 = vld [vmem:[#allocation10 + $0x4c0] sm:$0xff] }
 0x19f   : > { %1692 = vmatpush1.bf16.msra.mxu0 %v10367_v16  ;;  %v10424_v16 = vcombine.high %v789_v9, %v793_v10 }
 0x1a0   : > { %1774 = vmatpush1.bf16.msra.mxu1 %v10369_v19  ;;  %1693 = vmatprep.subr.bf16.mxu0 %v10376_v20  ;;  %v10425_v19 = vcombine.low %v790_v11, %v794_v13  ;;  %v797_v20 = vld [vmem:[#allocation10 + $0x400] sm:$0xff]  ;;  %v10456_v11 = vcombine.high %v821_v3, %v821_v3  ;;  %v10455_v13 = vcombine.low %v821_v3, %v821_v3 }
 0x1a1   : > { %1775 = vmatprep.subr.bf16.mxu1 %v10378_v23  ;;  %v10432_v23 = vcombine.high %v797_v20, %v801_v21 }
 0x1a3   : > { %1694 = vmatpush1.bf16.msra.mxu0 %v10375_v24  ;;  %v676_v24 = vld [vmem:[#allocation10 + $0x38] sm:$0xff] }
 0x1a4   : > { %1776 = vmatpush1.bf16.msra.mxu1 %v10377_v25  ;;  %1695 = vmatprep.subr.bf16.mxu0 %v10384_v26  ;;  %v10431_v25 = vcombine.low %v797_v20, %v801_v21  ;;  %v10309_v26 = vcombine.low %v672_v22, %v676_v24 }
 0x1a5   : > { %1777 = vmatprep.subr.bf16.mxu1 %v10386_v27  ;;  %v10310_v27 = vcombine.high %v672_v22, %v676_v24  ;;  %v810_v24 = vld [vmem:[#allocation10 + $0x468] sm:$0xff] }
 0x1a7   : > { %1696 = vmatpush1.bf16.msra.mxu0 %v10383_v42 }
 0x1a8   : > { %1778 = vmatpush1.bf16.msra.mxu1 %v10385_v43  ;;  %1697 = vmatprep.subr.bf16.mxu0 %v10392_v47 }
 0x1a9   : > { %1779 = vmatprep.subr.bf16.mxu1 %v10394_v49 }
 0x1ab   : > { %1698 = vmatpush1.bf16.msra.mxu0 %v10391_v50 }
 0x1ac   : > { %1780 = vmatpush1.bf16.msra.mxu1 %v10393_v51  ;;  %1699 = vmatprep.subr.bf16.mxu0 %v10400_v55  ;;  %v805_v51 = vld [vmem:[#allocation10 + $0x440] sm:$0xff] }
 0x1ad   : > { %1781 = vmatprep.subr.bf16.mxu1 %v10402_v60  ;;  %v10440_v56 = vcombine.high %v805_v51, %v809_v52  ;;  %v688_v60 = vld [vmem:[#allocation10 + $0x98] sm:$0xff] }
 0x1af   : > { %1700 = vmatpush1.bf16.msra.mxu0 %v10399_v57  ;;  %v813_v57 = vld [vmem:[#allocation10 + $0x480] sm:$0xff] }
 0x1b0   : > { %1782 = vmatpush1.bf16.msra.mxu1 %v10401_v61  ;;  %1701 = vmatprep.subr.bf16.mxu0 %v10408_v62  ;;  %v692_v61 = vld [vmem:[#allocation10 + $0xb8] sm:$0xff]  ;;  %v10439_v62 = vcombine.low %v805_v51, %v809_v52  ;;  %v10448_v1 = vcombine.high %v813_v57, %v817_v59  ;;  %v10447_v9 = vcombine.low %v813_v57, %v817_v59  ;;  %v671_v59 = vld [vmem:[#allocation10 + $0x10] sm:$0xff] }
 0x1b1   : > { %1783 = vmatprep.subr.bf16.mxu1 %v10410_v2  ;;  %v10326_v2 = vcombine.high %v688_v60, %v692_v61  ;;  %v10325_v10 = vcombine.low %v688_v60, %v692_v61  ;;  %v728_v51 = vld [vmem:[#allocation10 + $0x1d8] sm:$0xff]  ;;  %v675_v60 = vld [vmem:[#allocation10 + $0x30] sm:$0xff] }
 0x1b2   : > { %v732_v52 = vld [vmem:[#allocation10 + $0x1f8] sm:$0xff] }
 0x1b3   : > { %1702 = vmatpush1.bf16.msra.mxu0 %v10407_v6  ;;  %v700_v6 = vld [vmem:[#allocation10 + $0xf8] sm:$0xff]  ;;  %v10366_v57 = vcombine.high %v728_v51, %v732_v52 }
 0x1b4   : > { %1784 = vmatpush1.bf16.msra.mxu1 %v10409_v7  ;;  %1703 = vmatprep.subr.bf16.mxu0 %v10416_v8  ;;  %v12997_v7 = vmov 0   ;;  %v736_v61 = vld [vmem:[#allocation10 + $0x218] sm:$0xff] }
 0x1b5   : > { %1785 = vmatprep.subr.bf16.mxu1 %v10418_v12  ;;  %v10334_v12 = vcombine.high %v696_v5, %v700_v6 }
 0x1b7   : > { %1704 = vmatpush1.bf16.msra.mxu0 %v10415_v14  ;;  %v798_v14 = vld [vmem:[#allocation10 + $0x408] sm:$0xff] }
 0x1b8   : > { %1786 = vmatpush1.bf16.msra.mxu1 %v10417_v15  ;;  %1705 = vmatprep.subr.bf16.mxu0 %v10424_v16  ;;  %v802_v15 = vld [vmem:[#allocation10 + $0x428] sm:$0xff]  ;;  %v704_v16 = vld [vmem:[#allocation10 + $0x118] sm:$0xff] }
 0x1b9   : > { %1787 = vmatprep.subr.bf16.mxu1 %v10426_v17  ;;  %v708_v17 = vld [vmem:[#allocation10 + $0x138] sm:$0xff]  ;;  %v10434_v21 = vcombine.high %v798_v14, %v802_v15 }
 0x1ba   : > { %v10342_v22 = vcombine.high %v704_v16, %v708_v17 }
 0x1bb   : > { %1706 = vmatpush1.bf16.msra.mxu0 %v10423_v18  ;;  %v10333_v18 = vcombine.low %v696_v5, %v700_v6  ;;  %v683_v5 = vld [vmem:[#allocation10 + $0x70] sm:$0xff]  ;;  %v744_v6 = vld [vmem:[#allocation10 + $0x258] sm:$0xff] }
 0x1bc   : > { %1788 = vmatpush1.bf16.msra.mxu1 %v10425_v19  ;;  %1716 = vmatprep.subr.bf16.mxu0 %v10432_v23  ;;  %v1652_v19 = vsel %vm1650_vm1, %v10455_v13, 0  ;;  %v806_v23 = vld [vmem:[#allocation10 + $0x448] sm:$0xff] }
 0x1bd   : > { %1921 = vmatprep.subr.bf16.mxu1 %v10310_v27  ;;  %v10433_v27 = vcombine.low %v798_v14, %v802_v15  ;;  %v691_v14 = vld [vmem:[#allocation10 + $0xb0] sm:$0xff]  ;;  %v752_v15 = vld [vmem:[#allocation10 + $0x298] sm:$0xff] }
 0x20b   : > { %v608_v28 = vpop.xlane.xlu0 %607 }
 0x20c   : > { %v610_v29 = vmul.f32 0.0032051282, %v608_v28 }
 0x20e   : > { %v13520_v31 = vsub.f32 %v12536_v30, %v610_v29  ;;  %v13523_v33 = vsub.f32 %v12537_v32, %v610_v29  ;;  %v13526_v35 = vsub.f32 %v12538_v34, %v610_v29  ;;  %v629_v30 = vlaneseq }
 0x210   : > { %v614_v36 = vmul.f32 %v13520_v31, %v13520_v31  ;;  %v615_v37 = vmul.f32 %v13523_v33, %v13523_v33  ;;  %v616_v38 = vmul.f32 %v13526_v35, %v13526_v35  ;;  %v13535_v34 = vshrl.u32 %v629_v30, 7 }
 0x211   : > { %v10442_v30 = vcombine.high %v806_v23, %v810_v24 }
 0x212   : > { %v617_v39 = vadd.f32 %v615_v37, %v614_v36  ;;  %v618_v40 = vsel %vm604_vm0, %v616_v38, 0.0  ;;  %v13538_v36 = vsub.s32 1, %v13535_v34  ;;  %v13541_v37 = vsub.s32 0, %v13535_v34  ;;  %v601_v38 = vld [vmem:[#allocation7] sm:$0x7] }
 0x214   : > { %v619_v41 = vadd.f32 %v618_v40, %v617_v39  ;;  %v602_v39 = vld [vmem:[#allocation8] sm:$0x7]  ;;  %v13544_v40 = vrot.slane %v601_v38, %v13538_v36 }
 0x215   : > { %v13551_v44 = vrot.slane %v602_v39, %v13538_v36  ;;  %v13555_v46 = vrot.slane %v602_v39, %v13541_v37 }
 0x216   : > { %620 = vadd.xlane.f32.xlu0 %v619_v41  ;;  %v13547_v41 = vrot.slane %v601_v38, %v13541_v37 }
 0x2a3   : > { %v621_v28 = vpop.xlane.xlu0 %620 }
 0x2a4   : > { %v622_v29 = vmul.f32 0.0032051282, %v621_v28  ;;  %v10341_v28 = vcombine.low %v704_v16, %v708_v17  ;;  %v756_v16 = vld [vmem:[#allocation10 + $0x2b8] sm:$0xff] }
 0x2a6   : > { %v623_v32 = vadd.f32 1e-12, %v622_v29 }
 0x2a8   : > { %12464 = vrsqrt.f32 %v623_v32 }
 0x2b2   : > { %v12465_v42 = vpop.eup %12464 }
 0x2b3   : > { %v626_v43 = vmul.f32 %v12465_v42, %v13523_v33  ;;  %v625_v45 = vmul.f32 %v12465_v42, %v13520_v31  ;;  %v684_v33 = vld [vmem:[#allocation10 + $0x78] sm:$0xff]  ;;  %v13566_v31 = vsub.s32 2, %v13535_v34  ;;  %v627_v4 = vmul.f32 %v12465_v42, %v13526_v35 }
 0x2b4   : > { %v10318_v58 = vcombine.high %v680_v53, %v684_v33  ;;  %v10317_v63 = vcombine.low %v680_v53, %v684_v33  ;;  %v720_v42 = vld [vmem:[#allocation10 + $0x198] sm:$0xff] }
 0x2b5   : > { %v645_v47 = vmul.f32 %v13544_v40, %v626_v43  ;;  %v644_v48 = vmul.f32 %v13547_v41, %v625_v45  ;;  %v13573_v0 = vrot.slane %v601_v38, %v13566_v31  ;;  %v13579_v8 = vrot.slane %v602_v39, %v13566_v31  ;;  %v814_v38 = vld [vmem:[#allocation10 + $0x488] sm:$0xff]  ;;  %v724_v43 = vld [vmem:[#allocation10 + $0x1b8] sm:$0xff] }
 0x2b6   : > { %v818_v39 = vld [vmem:[#allocation10 + $0x4a8] sm:$0xff]  ;;  %v10441_v45 = vcombine.low %v806_v23, %v810_v24  ;;  %v10357_v33 = vcombine.low %v720_v42, %v724_v43  ;;  %v760_v23 = vld [vmem:[#allocation10 + $0x2d8] sm:$0xff] }
 0x2b7   : > { %v664_v49 = vadd.f32 %v13551_v44, %v645_v47  ;;  %v663_v50 = vadd.f32 %v13555_v46, %v644_v48  ;;  %v646_v35 = vmul.f32 %v13573_v0, %v627_v4  ;;  %v10450_v48 = vcombine.high %v814_v38, %v818_v39  ;;  %v679_v4 = vld [vmem:[#allocation10 + $0x50] sm:$0xff]  ;;  %v764_v24 = vld [vmem:[#allocation10 + $0x2f8] sm:$0xff] }
 0x2b8   : > { %v10449_v53 = vcombine.low %v814_v38, %v818_v39  ;;  %v10315_v17 = vcombine.low %v679_v4, %v683_v5  ;;  %v772_v38 = vld [vmem:[#allocation10 + $0x338] sm:$0xff] }
 0x2b9   : > { %v13561_v54 = vpack.c.bf16 %v664_v49, %v664_v49  ;;  %v13563_v55 = vpack.c.bf16 %v663_v50, %v663_v50  ;;  %v665_v20 = vadd.f32 %v13579_v8, %v646_v35  ;;  %v10358_v49 = vcombine.high %v720_v42, %v724_v43  ;;  %v822_v50 = vld [vmem:[#allocation10 + $0x4c8] sm:$0xff]  ;;  %v687_v35 = vld [vmem:[#allocation10 + $0x90] sm:$0xff] }
 0x2ba   : > { %v10397_v42 = vcombine.low %v760_v23, %v764_v24 }
 0x2bb   : > { %1707 = vmatprep.mubr.bf16.mxu0 %v13561_v54  ;;  %1789 = vmatprep.mubr.bf16.mxu1 %v13561_v54  ;;  %v13585_v29 = vpack.c.bf16 %v665_v20, %v665_v20  ;;  %v10390_v20 = vcombine.high %v752_v15, %v756_v16 }
 0x2bc   : > { %1708 = vmatmul.mubr.bf16.vlgmr.msra.gmra.mrb[0].mxu0 %v13563_v55  ;;  %1790 = vmatmul.mubr.bf16.vlgmr.msra.gmra.mrb[0].mxu1 %v13563_v55 }
 0x2bd   : > { %1717 = vmatpush1.bf16.msra.mxu0 %v10431_v25  ;;  %1922 = vmatpush1.bf16.msra.mxu1 %v10309_v26  ;;  %v712_v25 = vld [vmem:[#allocation10 + $0x158] sm:$0xff] }
 0x2be   : > { %1953 = vmatprep.mubr.bf16.mxu1 %v13561_v54  ;;  %1718 = vmatprep.subr.bf16.mxu0 %v10440_v56  ;;  %v716_v26 = vld [vmem:[#allocation10 + $0x178] sm:$0xff]  ;;  %v10458_v56 = vcombine.high %v822_v50, %v822_v50 }
 0x2bf   : > { %1923 = vmatprep.subr.bf16.mxu1 %v10318_v58  ;;  %1748 = vmatprep.mubr.bf16.mxu0 %v12997_v7  ;;  %v10350_v32 = vcombine.high %v712_v25, %v716_v26  ;;  %v10349_v47 = vcombine.low %v712_v25, %v716_v26  ;;  %v10457_v58 = vcombine.low %v822_v50, %v822_v50  ;;  %v780_v50 = vld [vmem:[#allocation10 + $0x378] sm:$0xff] }
 0x2c0   : > { %v10323_v25 = vcombine.low %v687_v35, %v691_v14  ;;  %v10389_v26 = vcombine.low %v752_v15, %v756_v16 }
 0x2c1   : > { %1719 = vmatpush1.bf16.msra.mxu0 %v10439_v62  ;;  %1924 = vmatpush1.bf16.msra.mxu1 %v10317_v63  ;;  %v740_v62 = vld [vmem:[#allocation10 + $0x238] sm:$0xff]  ;;  %v10365_v63 = vcombine.low %v728_v51, %v732_v52 }
 0x2c2   : > { %1720 = vmatprep.subr.bf16.mxu0 %v10448_v1  ;;  %1925 = vmatprep.subr.bf16.mxu1 %v10326_v2  ;;  %v1658_v1 = vsel %vm1650_vm1, %v10457_v58, 0  ;;  %v10308_v2 = vcombine.high %v671_v59, %v675_v60  ;;  %v10374_v3 = vcombine.high %v736_v61, %v740_v62  ;;  %v784_v58 = vld [vmem:[#allocation10 + $0x398] sm:$0xff] }
 0x2c5   : > { %1721 = vmatpush1.bf16.msra.mxu0 %v10447_v9  ;;  %1926 = vmatpush1.bf16.msra.mxu1 %v10325_v10  ;;  %v748_v9 = vld [vmem:[#allocation10 + $0x278] sm:$0xff]  ;;  %v10307_v10 = vcombine.low %v671_v59, %v675_v60 }
 0x2c6   : > { %10463 = vmatprep.subr.msk.bf16.mxu0 %vm1650_vm1, %v10456_v11  ;;  %1927 = vmatprep.subr.bf16.mxu1 %v10334_v12  ;;  %v10373_v11 = vcombine.low %v736_v61, %v740_v62  ;;  %v10316_v12 = vcombine.high %v679_v4, %v683_v5  ;;  %v10382_v13 = vcombine.high %v744_v6, %v748_v9  ;;  %v788_v59 = vld [vmem:[#allocation10 + $0x3b8] sm:$0xff] }
 0x2c7   : > { %v796_v4 = vld [vmem:[#allocation10 + $0x3f8] sm:$0xff] }
 0x2c9   : > { %1723 = vmatpush1.bf16.msra.mxu0 %v1652_v19  ;;  %1928 = vmatpush1.bf16.msra.mxu1 %v10333_v18  ;;  %v10381_v18 = vcombine.low %v744_v6, %v748_v9  ;;  %v10324_v19 = vcombine.high %v687_v35, %v691_v14  ;;  %v10421_v6 = vcombine.low %v784_v58, %v788_v59  ;;  %v804_v35 = vld [vmem:[#allocation10 + $0x438] sm:$0xff] }
 0x2ca   : > { %1798 = vmatprep.subr.bf16.mxu0 %v10434_v21  ;;  %1929 = vmatprep.subr.bf16.mxu1 %v10342_v22  ;;  %v695_v21 = vld [vmem:[#allocation10 + $0xd0] sm:$0xff] }
 0x2cb   : > { %v699_v22 = vld [vmem:[#allocation10 + $0xf0] sm:$0xff] }
 0x2cc   : > { %10464 = vmatmul.mubr.msk.bf16.vlgmr.msra.gmra.mrb[0].mxu0 %vm604_vm0, %v13585_v29  ;;  %v10331_v39 = vcombine.low %v695_v21, %v699_v22 }
 0x2cd   : > { %1799 = vmatpush1.bf16.msra.mxu0 %v10433_v27  ;;  %1930 = vmatpush1.bf16.msra.mxu1 %v10341_v28  ;;  %v10332_v27 = vcombine.high %v695_v21, %v699_v22  ;;  %v10398_v28 = vcombine.high %v760_v23, %v764_v24  ;;  %v812_v21 = vld [vmem:[#allocation10 + $0x478] sm:$0xff] }
 0x2ce   : > { %1800 = vmatprep.subr.bf16.mxu0 %v10442_v30  ;;  %1931 = vmatprep.subr.bf16.mxu1 %v10350_v32  ;;  %v707_v30 = vld [vmem:[#allocation10 + $0x130] sm:$0xff]  ;;  %v768_v32 = vld [vmem:[#allocation10 + $0x318] sm:$0xff] }
 0x2cf   : > { %1830 = vmatprep.mubr.bf16.mxu0 %v12997_v7  ;;  %v10405_v52 = vcombine.low %v768_v32, %v772_v38 }
 0x2d1   : > { %1801 = vmatpush1.bf16.msra.mxu0 %v10441_v45  ;;  %1932 = vmatpush1.bf16.msra.mxu1 %v10349_v47  ;;  %v10406_v45 = vcombine.high %v768_v32, %v772_v38  ;;  %v711_v47 = vld [vmem:[#allocation10 + $0x150] sm:$0xff] }
 0x2d2   : > { %1802 = vmatprep.subr.bf16.mxu0 %v10450_v48  ;;  %1933 = vmatprep.subr.bf16.mxu1 %v10358_v49  ;;  %v715_v48 = vld [vmem:[#allocation10 + $0x170] sm:$0xff]  ;;  %v776_v49 = vld [vmem:[#allocation10 + $0x358] sm:$0xff] }
 0x2d3   : > { %v10347_v60 = vcombine.low %v711_v47, %v715_v48  ;;  %v10413_v61 = vcombine.low %v776_v49, %v780_v50 }
 0x2d5   : > { %1803 = vmatpush1.bf16.msra.mxu0 %v10449_v53  ;;  %1934 = vmatpush1.bf16.msra.mxu1 %v10357_v33  ;;  %v10348_v53 = vcombine.high %v711_v47, %v715_v48  ;;  %v10414_v33 = vcombine.high %v776_v49, %v780_v50 }
 0x2d6   : > { %10465 = vmatprep.subr.msk.bf16.mxu0 %vm1650_vm1, %v10458_v56  ;;  %1935 = vmatprep.subr.bf16.mxu1 %v10366_v57  ;;  %v719_v56 = vld [vmem:[#allocation10 + $0x190] sm:$0xff] }
 0x2d7   : > { %v723_v57 = vld [vmem:[#allocation10 + $0x1b0] sm:$0xff] }
 0x2d8   : > { %v10356_v62 = vcombine.high %v719_v56, %v723_v57  ;;  %v10355_v5 = vcombine.low %v719_v56, %v723_v57 }
 0x2d9   : > { %1805 = vmatpush1.bf16.msra.mxu0 %v1658_v1  ;;  %1936 = vmatpush1.bf16.msra.mxu1 %v10365_v63  ;;  %v10422_v63 = vcombine.high %v784_v58, %v788_v59  ;;  %v727_v1 = vld [vmem:[#allocation10 + $0x1d0] sm:$0xff] }
 0x2da   : > { %1839 = vmatprep.subr.bf16.mxu0 %v10308_v2  ;;  %1937 = vmatprep.subr.bf16.mxu1 %v10374_v3  ;;  %v731_v2 = vld [vmem:[#allocation10 + $0x1f0] sm:$0xff]  ;;  %v792_v3 = vld [vmem:[#allocation10 + $0x3d8] sm:$0xff] }
 0x2db   : > { %v10364_v9 = vcombine.high %v727_v1, %v731_v2  ;;  %v10363_v14 = vcombine.low %v727_v1, %v731_v2  ;;  %v10429_v15 = vcombine.low %v792_v3, %v796_v4  ;;  %v775_v58 = vld [vmem:[#allocation10 + $0x350] sm:$0xff] }
 0x2dc   : > { %10466 = vmatmul.mubr.msk.bf16.vlgmr.msra.gmra.mrb[4].mxu0 %vm604_vm0, %v13585_v29  ;;  %v779_v59 = vld [vmem:[#allocation10 + $0x370] sm:$0xff] }
 0x2dd   : > { %1840 = vmatpush1.bf16.msra.mxu0 %v10307_v10  ;;  %1871 = vmatprep.mubr.bf16.mxu0 %v13561_v54  ;;  %v703_v54 = vld [vmem:[#allocation10 + $0x110] sm:$0xff]  ;;  %v10430_v10 = vcombine.high %v792_v3, %v796_v4  ;;  %v10411_v1 = vcombine.low %v775_v58, %v779_v59 }
 0x2de   : > { %1938 = vmatpush1.bf16.msra.mxu1 %v10373_v11  ;;  %1841 = vmatprep.subr.bf16.mxu0 %v10316_v12  ;;  %v10340_v43 = vcombine.high %v703_v54, %v707_v30  ;;  %v10339_v51 = vcombine.low %v703_v54, %v707_v30  ;;  %v735_v11 = vld [vmem:[#allocation10 + $0x210] sm:$0xff]  ;;  %v820_v54 = vld [vmem:[#allocation10 + $0x4b8] sm:$0xff] }
 0x2df   : > { %1939 = vmatprep.subr.bf16.mxu1 %v10382_v13  ;;  %v739_v12 = vld [vmem:[#allocation10 + $0x230] sm:$0xff]  ;;  %v800_v13 = vld [vmem:[#allocation10 + $0x418] sm:$0xff] }
 0x2e0   : > { %v10372_v16 = vcombine.high %v735_v11, %v739_v12  ;;  %v10371_v22 = vcombine.low %v735_v11, %v739_v12  ;;  %v10437_v23 = vcombine.low %v800_v13, %v804_v35  ;;  %v791_v3 = vld [vmem:[#allocation10 + $0x3d0] sm:$0xff] }
 0x2e1   : > { %1842 = vmatpush1.bf16.msra.mxu0 %v10315_v17  ;;  %v10438_v17 = vcombine.high %v800_v13, %v804_v35  ;;  %v795_v4 = vld [vmem:[#allocation10 + $0x3f0] sm:$0xff] }
 0x2e2   : > { %1940 = vmatpush1.bf16.msra.mxu1 %v10381_v18  ;;  %1843 = vmatprep.subr.bf16.mxu0 %v10324_v19  ;;  %v743_v18 = vld [vmem:[#allocation10 + $0x250] sm:$0xff]  ;;  %v10427_v11 = vcombine.low %v791_v3, %v795_v4 }
 0x2e3   : > { %1941 = vmatprep.subr.bf16.mxu1 %v10390_v20  ;;  %v747_v19 = vld [vmem:[#allocation10 + $0x270] sm:$0xff]  ;;  %v808_v20 = vld [vmem:[#allocation10 + $0x458] sm:$0xff] }
 0x2e4   : > { %v10380_v24 = vcombine.high %v743_v18, %v747_v19  ;;  %v10379_v30 = vcombine.low %v743_v18, %v747_v19  ;;  %v10445_v32 = vcombine.low %v808_v20, %v812_v21  ;;  %v807_v13 = vld [vmem:[#allocation10 + $0x450] sm:$0xff] }
 0x2e5   : > { %1844 = vmatpush1.bf16.msra.mxu0 %v10323_v25  ;;  %v10446_v25 = vcombine.high %v808_v20, %v812_v21  ;;  %v811_v35 = vld [vmem:[#allocation10 + $0x470] sm:$0xff] }
 0x2e6   : > { %1942 = vmatpush1.bf16.msra.mxu1 %v10389_v26  ;;  %1845 = vmatprep.subr.bf16.mxu0 %v10332_v27  ;;  %v751_v26 = vld [vmem:[#allocation10 + $0x290] sm:$0xff]  ;;  %v10443_v18 = vcombine.low %v807_v13, %v811_v35 }
 0x2e7   : > { %1943 = vmatprep.subr.bf16.mxu1 %v10398_v28  ;;  %v755_v27 = vld [vmem:[#allocation10 + $0x2b0] sm:$0xff]  ;;  %v816_v28 = vld [vmem:[#allocation10 + $0x498] sm:$0xff] }
 0x2e8   : > { %v10388_v38 = vcombine.high %v751_v26, %v755_v27  ;;  %v10387_v47 = vcombine.low %v751_v26, %v755_v27  ;;  %v10453_v48 = vcombine.low %v816_v28, %v820_v54  ;;  %v823_v20 = vld [vmem:[#allocation10 + $0x4d0] sm:$0xff] }
 0x2e9   : > { %1846 = vmatpush1.bf16.msra.mxu0 %v10331_v39  ;;  %v10454_v39 = vcombine.high %v816_v28, %v820_v54 }
 0x2ea   : > { %1944 = vmatpush1.bf16.msra.mxu1 %v10397_v42  ;;  %1847 = vmatprep.subr.bf16.mxu0 %v10340_v43  ;;  %v759_v42 = vld [vmem:[#allocation10 + $0x2d0] sm:$0xff] }
 0x2eb   : > { %1945 = vmatprep.subr.bf16.mxu1 %v10406_v45  ;;  %v763_v43 = vld [vmem:[#allocation10 + $0x2f0] sm:$0xff]  ;;  %v824_v45 = vld [vmem:[#allocation10 + $0x4d8] sm:$0xff] }
 0x2ec   : > { %v10396_v49 = vcombine.high %v759_v42, %v763_v43  ;;  %v10462_v50 = vcombine.high %v824_v45, %v824_v45 }
 0x2ed   : > { %1848 = vmatpush1.bf16.msra.mxu0 %v10339_v51  ;;  %v10461_v51 = vcombine.low %v824_v45, %v824_v45 }
 0x2ee   : > { %1946 = vmatpush1.bf16.msra.mxu1 %v10405_v52  ;;  %1849 = vmatprep.subr.bf16.mxu0 %v10348_v53  ;;  %v767_v52 = vld [vmem:[#allocation10 + $0x310] sm:$0xff] }
 0x2ef   : > { %1947 = vmatprep.subr.bf16.mxu1 %v10414_v33  ;;  %v771_v53 = vld [vmem:[#allocation10 + $0x330] sm:$0xff]  ;;  %v10395_v33 = vcombine.low %v759_v42, %v763_v43  ;;  %v1670_v57 = vsel %vm1650_vm1, %v10461_v51, 0 }
 0x2f0   : > { %v10404_v56 = vcombine.high %v767_v52, %v771_v53 }
 0x2f1   : > { %1850 = vmatpush1.bf16.msra.mxu0 %v10347_v60  ;;  %v10403_v60 = vcombine.low %v767_v52, %v771_v53 }
 0x2f2   : > { %1948 = vmatpush1.bf16.msra.mxu1 %v10413_v61  ;;  %1851 = vmatprep.subr.bf16.mxu0 %v10356_v62  ;;  %v10412_v61 = vcombine.high %v775_v58, %v779_v59  ;;  %v783_v62 = vld [vmem:[#allocation10 + $0x390] sm:$0xff] }
 0x2f3   : > { %1949 = vmatprep.subr.bf16.mxu1 %v10422_v63  ;;  %v787_v63 = vld [vmem:[#allocation10 + $0x3b0] sm:$0xff] }
 0x2f4   : > { %v10420_v2 = vcombine.high %v783_v62, %v787_v63 }
 0x2f5   : > { %1852 = vmatpush1.bf16.msra.mxu0 %v10355_v5  ;;  %v10419_v5 = vcombine.low %v783_v62, %v787_v63  ;;  %v845_v63 = vsub.s32 4, %v13535_v34 }
 0x2f6   : > { %1950 = vmatpush1.bf16.msra.mxu1 %v10421_v6  ;;  %1853 = vmatprep.subr.bf16.mxu0 %v10364_v9  ;;  %v10428_v6 = vcombine.high %v791_v3, %v795_v4  ;;  %v799_v9 = vld [vmem:[#allocation10 + $0x410] sm:$0xff] }
 0x2f7   : > { %1951 = vmatprep.subr.bf16.mxu1 %v10430_v10  ;;  %v803_v10 = vld [vmem:[#allocation10 + $0x430] sm:$0xff] }
 0x2f8   : > { %v10436_v12 = vcombine.high %v799_v9, %v803_v10 }
 0x2f9   : > { %1854 = vmatpush1.bf16.msra.mxu0 %v10363_v14  ;;  %v10435_v14 = vcombine.low %v799_v9, %v803_v10  ;;  %v853_v9 = vsub.s32 6, %v13535_v34 }
 0x2fa   : > { %1952 = vmatpush1.bf16.msra.mxu1 %v10429_v15  ;;  %1855 = vmatprep.subr.bf16.mxu0 %v10372_v16  ;;  %v10444_v15 = vcombine.high %v807_v13, %v811_v35  ;;  %v815_v16 = vld [vmem:[#allocation10 + $0x490] sm:$0xff] }
 0x2fb   : > { %1962 = vmatprep.subr.bf16.mxu1 %v10438_v17  ;;  %v819_v17 = vld [vmem:[#allocation10 + $0x4b0] sm:$0xff] }
 0x2fc   : > { %v10452_v19 = vcombine.high %v815_v16, %v819_v17  ;;  %v10451_v21 = vcombine.low %v815_v16, %v819_v17  ;;  %v13030_v16 = vmov 1983009808  }
 0x2fd   : > { %1954 = vmatmul.mubr.bf16.vlgmr.msra.gmra.mrb[4].mxu1 %v13563_v55  ;;  %1856 = vmatpush1.bf16.msra.mxu0 %v10371_v22  ;;  %v10460_v22 = vcombine.high %v823_v20, %v823_v20  ;;  %v2147_v17 = vunpack.c.l.s4 %v13030_v16 }
 0x2fe   : > { %1963 = vmatpush1.bf16.msra.mxu1 %v10437_v23  ;;  %1857 = vmatprep.subr.bf16.mxu0 %v10380_v24  ;;  %v10459_v23 = vcombine.low %v823_v20, %v823_v20 }
 0x2ff   : > { %1964 = vmatprep.subr.bf16.mxu1 %v10446_v25  ;;  %1994 = vmatprep.mubr.bf16.mxu1 %v12997_v7 }
 0x300   : > { %v1664_v24 = vsel %vm1650_vm1, %v10459_v23, 0 }
 0x301   : > { %1858 = vmatpush1.bf16.msra.mxu0 %v10379_v30 }
 0x302   : > { %1965 = vmatpush1.bf16.msra.mxu1 %v10445_v32  ;;  %1859 = vmatprep.subr.bf16.mxu0 %v10388_v38  ;;  %v13607_v38 = vld [vmem:[#allocation11] sm:$0xff] }
 0x303   : > { %1966 = vmatprep.subr.bf16.mxu1 %v10454_v39  ;;  %v841_v39 = vsub.s32 3, %v13535_v34  ;;  %v838_v42 = vrot.slane %v13607_v38, %v13566_v31  ;;  %v854_v10 = vrot.slane %v13607_v38, %v853_v9 }
 0x305   : > { %1860 = vmatpush1.bf16.msra.mxu0 %v10387_v47  ;;  %v842_v43 = vrot.slane %v13607_v38, %v841_v39 }
 0x306   : > { %1967 = vmatpush1.bf16.msra.mxu1 %v10453_v48  ;;  %1861 = vmatprep.subr.bf16.mxu0 %v10396_v49  ;;  %v830_v48 = vrot.slane %v13607_v38, %v13541_v37 }
 0x307   : > { %10469 = vmatprep.subr.msk.bf16.mxu1 %vm1650_vm1, %v10462_v50 }
 0x309   : > { %1862 = vmatpush1.bf16.msra.mxu0 %v10395_v33 }
 0x30a   : > { %1969 = vmatpush1.bf16.msra.mxu1 %v1670_v57  ;;  %1863 = vmatprep.subr.bf16.mxu0 %v10404_v56  ;;  %v13006_v56 = vmov 0.0   ;;  %v834_v57 = vrot.slane %v13607_v38, %v13538_v36 }
 0x30b   : > { %11277 = vmatprep.subr.bf16.mxu1 %v13006_v56 }
 0x30d   : > { %10470 = vmatmul.mubr.msk.bf16.vlgmr.msra.gmra.mrb[4].mxu1 %vm604_vm0, %v13585_v29  ;;  %1864 = vmatpush1.bf16.msra.mxu0 %v10403_v60 }
 0x30e   : > { %1865 = vmatprep.subr.bf16.mxu0 %v10412_v61  ;;  %11279 = vmatprep.mubr.msk.bf16.mxu1 %vm13007_vm2, %v13006_v56 }
 0x311   : > { %1866 = vmatpush1.bf16.msra.mxu0 %v10411_v1  ;;  %v846_v1 = vrot.slane %v13607_v38, %v845_v63 }
 0x312   : > { %1867 = vmatprep.subr.bf16.mxu0 %v10420_v2 }
 0x315   : > { %1868 = vmatpush1.bf16.msra.mxu0 %v10419_v5 }
 0x316   : > { %1869 = vmatprep.subr.bf16.mxu0 %v10428_v6 }
 0x319   : > { %1870 = vmatpush1.bf16.msra.mxu0 %v10427_v11  ;;  %v849_v11 = vsub.s32 5, %v13535_v34 }
 0x31a   : > { %1880 = vmatprep.subr.bf16.mxu0 %v10436_v12 }
 0x31b   : > { %v850_v13 = vrot.slane %v13607_v38, %v849_v11 }
 0x31c   : > { %1872 = vmatmul.mubr.bf16.vlgmr.msra.gmra.mrb[8].mxu0 %v13563_v55 }
 0x31d   : > { %1881 = vmatpush1.bf16.msra.mxu0 %v10435_v14  ;;  %1912 = vmatprep.mubr.bf16.mxu0 %v12997_v7 }
 0x31e   : > { %1882 = vmatprep.subr.bf16.mxu0 %v10444_v15 }
 0x321   : > { %1883 = vmatpush1.bf16.msra.mxu0 %v10443_v18 }
 0x322   : > { %1884 = vmatprep.subr.bf16.mxu0 %v10452_v19  ;;  %v13031_v19 = vmov 1934713408  }
 0x323   : > { %v2211_v20 = vunpack.c.l.s4 %v13031_v19 }
 0x325   : > { %1885 = vmatpush1.bf16.msra.mxu0 %v10451_v21  ;;  %v2148_v21 = vunpack.c.0.s8 %v2147_v17 }
 0x326   : > { %10467 = vmatprep.subr.msk.bf16.mxu0 %vm1650_vm1, %v10460_v22 }
 0x329   : > { %1887 = vmatpush1.bf16.msra.mxu0 %v1664_v24  ;;  %v2212_v24 = vunpack.c.0.s8 %v2211_v20 }
 0x32a   : > { %11259 = vmatprep.subr.bf16.mxu0 %v13006_v56 }
 0x32c   : > { %10468 = vmatmul.mubr.msk.bf16.vlgmr.msra.gmra.mrb[8].mxu0 %vm604_vm0, %v13585_v29 }
 0x32d   : > { %11261 = vmatprep.mubr.msk.bf16.mxu0 %vm13007_vm2, %v13006_v56 }
 0x38f   : > { %v1791_v55 = vpop.f32.mrb[0].mxu1 }
 0x390   : > { %v1793_v25 = vpop.f32.mrb[1].mxu1  ;;  %v1792_v29 = vadd.f32 %v1791_v55, %v838_v42 }
 0x391   : > { %v1795_v26 = vpop.f32.mrb[2].mxu1  ;;  %v1794_v45 = vadd.f32 %v1793_v25, %v842_v43  ;;  %v13660_v25 = vsub.s32 %v2148_v21, %v13535_v34 }
 0x392   : > { %v1796_v27 = vpop.f32.mrb[3].mxu1 }
 0x39f   : > { %v1750_v28 = vpop.f32.mrb[0].mxu0 }
 0x3a0   : > { %v1752_v54 = vpop.f32.mrb[1].mxu0  ;;  %v13621_v33 = vadd.f32 %v1750_v28, %v830_v48 }
 0x3a1   : > { %v1754_v30 = vpop.f32.mrb[2].mxu0  ;;  %v11500_v58 = vadd.f32 %v1752_v54, %v834_v57 }
 0x3a2   : > { %v1755_v32 = vpop.f32.mrb[3].mxu0 }
 0x3a3   : > { %v13663_v32 = vsub.s32 %v2212_v24, %v13535_v34 }
 0x3af   : > { %v1832_v47 = vpop.f32.mrb[4].mxu0 }
 0x3b0   : > { %v13617_v49 = vadd.f32 %v1832_v47, %v1792_v29  ;;  %v1834_v50 = vpop.f32.mrb[5].mxu0 }
 0x3b1   : > { %v1835_v51 = vadd.f32 %v1834_v50, %v1794_v45  ;;  %v1836_v52 = vpop.f32.mrb[6].mxu0 }
 0x3b2   : > { %v1837_v53 = vpop.f32.mrb[7].mxu0  ;;  %2047 = vrot.lane.b32.xlu0 %v13617_v49, %s12998_s26  ;;  %2054 = vrot.lane.b32.xlu1 %v13617_v49, %s12999_s4  ;;  %s13011_s26 = smov 24  }
 0x3b6   : > { %2067 = vrot.lane.b32.xlu0 %v1835_v51, %s13000_s3  ;;  %2004 = vrot.lane.b32.xlu1 %v13621_v33, %s13001_s19  ;;  %s13013_s3 = smov 22   ;;  %s13014_s19 = smov 120  }
 0x3ba   : > { %2050 = vrot.lane.b32.xlu1 %v13617_v49, %s13002_s14  ;;  %s13015_s14 = smov 68  }
 0x3be   : > { %2056 = vrot.lane.b32.xlu1 %v1835_v51, %s12999_s4  ;;  %s13012_s4 = smov 100  }
 0x3c2   : > { %2061 = vrot.lane.b32.xlu1 %v1835_v51, %s13003_s15  ;;  %s13016_s15 = smov 126  }
 0x3c6   : > { %2007 = vrot.lane.b32.xlu1 %v13621_v33, %s13004_s29  ;;  %s13017_s29 = smov 48  }
 0x3ca   : > { %2010 = vrot.lane.b32.xlu1 %v13621_v33, %s13005_s5  ;;  %s13018_s5 = smov 74  }
 0x3ce   : > { %2074 = vrot.lane.b32.xlu1 %v1835_v51, %s13008_s1 }
 0x3d2   : > { %2064 = vrot.lane.b32.xlu1 %v1835_v51, %s13009_s25  ;;  %s13020_s25 = smov 94  }
 0x3d6   : > { %2070 = vrot.lane.b32.xlu1 %v1835_v51, %s13010_s28  ;;  %s13021_s28 = smov 116  }
 0x3da   : > { %2016 = vrot.lane.b32.xlu1 %v11500_v58, %s13011_s26 }
 0x3de   : > { %2024 = vrot.lane.b32.xlu1 %v11500_v58, %s13012_s4  ;;  %s13023_s4 = smov 16  }
 0x3e0   : > { %v1996_v59 = vpop.f32.mrb[4].mxu1 }
 0x3e1   : > { %v13635_v60 = vpop.f32.mrb[5].mxu1  ;;  %v13649_v12 = vadd.f32 %v1996_v59, %v854_v10 }
 0x3e2   : > { %v2000_v61 = vpop.f32.mrb[6].mxu1  ;;  %2034 = vrot.lane.b32.xlu1 %v11500_v58, %s13013_s3 }
 0x3e3   : > { %v2001_v62 = vpop.f32.mrb[7].mxu1 }
 0x3ff   : > { %v1914_v2 = vpop.f32.mrb[8].mxu0 }
 0x400   : > { %v11505_v3 = vadd.f32 %v1914_v2, %v846_v1  ;;  %v1916_v4 = vpop.f32.mrb[9].mxu0 }
 0x401   : > { %v1918_v5 = vpop.f32.mrb[10].mxu0  ;;  %v11506_v35 = vadd.f32 %v1916_v4, %v850_v13 }
 0x402   : > { %v1919_v6 = vpop.f32.mrb[11].mxu0  ;;  %2076 = vrot.lane.b32.xlu0 %v11505_v3, %s13008_s1  ;;  %2081 = vrot.lane.b32.xlu1 %v11505_v3, %s13014_s19  ;;  %s13019_s1 = smov 98   ;;  %s13024_s19 = smov 118  }
 0x406   : > { %2014 = vrot.lane.b32.xlu0 %v13621_v33, %s13011_s26  ;;  %2087 = vrot.lane.b32.xlu1 %v11505_v3, %s13015_s14  ;;  %s13022_s26 = smov 42   ;;  %s13025_s14 = smov 124  }
 0x40a   : > { %2021 = vrot.lane.b32.xlu0 %v11500_v58, %s13016_s15  ;;  %2030 = vrot.lane.b32.xlu1 %v11500_v58, %s13017_s29  ;;  %s13026_s15 = smov 66   ;;  %s13027_s29 = smov 14  }
 0x40e   : > { %2027 = vrot.lane.b32.xlu0 %v11500_v58, %s13018_s5  ;;  %2044 = vrot.lane.b32.xlu1 %v13617_v49, %s13019_s1  ;;  %s13028_s5 = smov 40   ;;  %s13029_s1 = smov 92  }
 0x412   : > { %2084 = vrot.lane.b32.xlu0 %v11505_v3, %s13020_s25  ;;  %2121 = vrot.lane.b32.xlu1 %v13649_v12, %s13021_s28  ;;  %s13034_s25 = smov 64   ;;  %s13035_s28 = smov 38  }
 0x416   : > { %2090 = vrot.lane.b32.xlu0 %v11505_v3, %s13022_s26  ;;  %2096 = vrot.lane.b32.xlu1 %v11506_v35, %s13023_s4  ;;  %s13036_s26 = smov 114  }
 0x41a   : > { %2036 = vrot.lane.b32.xlu0 %v13617_v49, %s13013_s3  ;;  %2101 = vrot.lane.b32.xlu1 %v11506_v35, %s13024_s19  ;;  %s13033_s3 = smov 12  }
 0x41e   : > { %2041 = vrot.lane.b32.xlu0 %v13617_v49, %s13025_s14  ;;  %2107 = vrot.lane.b32.xlu1 %v11506_v35, %s13026_s15  ;;  %s14601_s15 = sld [smem:[#allocation39_spill]] }
 0x422   : > { %2116 = vrot.lane.b32.xlu0 %v13649_v12, %s13027_s29  ;;  %2114 = vrot.lane.b32.xlu1 %v11506_v35, %s13027_s29 }
 0x424   : > { %v2055_v14 = vpop.permute.xlu1 %2054  ;;  %v2048_v55 = vpop.permute.xlu0 %2047 }
 0x426   : > { %2094 = vrot.lane.b32.xlu0 %v11505_v3, %s13023_s4  ;;  %2110 = vrot.lane.b32.xlu1 %v11506_v35, %s13028_s5 }
 0x428   : > { %v2005_v15 = vpop.permute.xlu1 %2004 }
 0x42a   : > { %2104 = vrot.lane.b32.xlu0 %v11506_v35, %s13029_s1  ;;  %s13037_s1 = smov [#allocation22]  }
 0x42c   : > { %v2051_v18 = vpop.permute.xlu1 %2050 }
 0x430   : > { %v2057_v22 = vpop.permute.xlu1 %2056 }
 0x431   : > { %v2059_v23 = vsel %vm2058_vm3, %v2055_v14, %v2057_v22 }
 0x432   : > { %v2312_v26 = vcombine.low %v2048_v55, %v2059_v23  ;;  %v2313_v27 = vcombine.high %v2048_v55, %v2059_v23 }
 0x434   : > { %v2062_v28 = vpop.permute.xlu1 %2061  ;;  %v2320_v38 = vrot.slane %v2312_v26, %v13660_v25  ;;  %v2327_v42 = vrot.slane %v2313_v27, %v13660_v25 }
 0x435   : > { %v2328_v54 = vcombine.low %v2051_v18, %v2062_v28  ;;  %v2329_v30 = vcombine.high %v2051_v18, %v2062_v28 }
 0x437   : > { %v2336_v43 = vrot.slane %v2328_v54, %v13660_v25  ;;  %v2343_v29 = vrot.slane %v2329_v30, %v13660_v25 }
 0x438   : > { %v2008_v45 = vpop.permute.xlu1 %2007 }
 0x439   : > { %v2376_v47 = vcombine.low %v2320_v38, %v2336_v43  ;;  %v2377_v48 = vcombine.high %v2320_v38, %v2336_v43  ;;  %v2392_v49 = vcombine.low %v2327_v42, %v2343_v29  ;;  %v2393_v50 = vcombine.high %v2327_v42, %v2343_v29 }
 0x43a   : > { %v2144_v58 = vcombine.low %v13621_v33, %v2008_v45  ;;  %v2145_v59 = vcombine.high %v13621_v33, %v2008_v45 }
 0x43b   : > { %v2384_v51 = vrot.slane %v2376_v47, %v13663_v32  ;;  %v2391_v52 = vrot.slane %v2377_v48, %v13663_v32  ;;  %v2400_v53 = vrot.slane %v2392_v49, %v13663_v32  ;;  %v2407_v57 = vrot.slane %v2393_v50, %v13663_v32 }
 0x43c   : > { %v2011_v61 = vpop.permute.xlu1 %2010  ;;  %v2152_v14 = vrot.slane %v2144_v58, %v13660_v25  ;;  %v2159_v16 = vrot.slane %v2145_v59, %v13660_v25 }
 0x43d   : > { %v10480_v62 = vcombine.low %v2384_v51, %v2391_v52  ;;  %v10482_v1 = vcombine.high %v2384_v51, %v2391_v52  ;;  %v10484_v2 = vcombine.low %v2400_v53, %v2407_v57  ;;  %v10486_v3 = vcombine.high %v2400_v53, %v2407_v57 }
 0x43e   : > { %v2160_v4 = vcombine.low %v2005_v15, %v2011_v61  ;;  %v2161_v5 = vcombine.high %v2005_v15, %v2011_v61 }
 0x43f   : > { %v2907_v6 = vrot.slane %v10480_v62, %v13660_v25  ;;  %v2923_v10 = vrot.slane %v10482_v1, %v13660_v25  ;;  %v2939_v13 = vrot.slane %v10484_v2, %v13660_v25  ;;  %v2955_v35 = vrot.slane %v10486_v3, %v13660_v25 }
 0x440   : > { %v2168_v33 = vrot.slane %v2160_v4, %v13660_v25  ;;  %v2175_v17 = vrot.slane %v2161_v5, %v13660_v25 }
 0x441   : > { %v2972_v18 = vcombine.low %v2907_v6, %v2923_v10  ;;  %v3004_v19 = vcombine.low %v2939_v13, %v2955_v35  ;;  %v2973_v20 = vcombine.high %v2907_v6, %v2923_v10  ;;  %v3005_v15 = vcombine.high %v2939_v13, %v2955_v35 }
 0x442   : > { %v2208_v21 = vcombine.low %v2152_v14, %v2168_v33  ;;  %v2209_v22 = vcombine.high %v2152_v14, %v2168_v33  ;;  %v2224_v23 = vcombine.low %v2159_v16, %v2175_v17  ;;  %v2225_v24 = vcombine.high %v2159_v16, %v2175_v17 }
 0x443   : > { %v2980_v55 = vrot.slane %v2972_v18, %v13663_v32  ;;  %v3012_v26 = vrot.slane %v3004_v19, %v13663_v32  ;;  %v2987_v27 = vrot.slane %v2973_v20, %v13663_v32  ;;  %v3019_v28 = vrot.slane %v3005_v15, %v13663_v32  ;;  %v2075_v18 = vpop.permute.xlu1 %2074 }
 0x444   : > { %v2216_v54 = vrot.slane %v2208_v21, %v13663_v32  ;;  %v2223_v30 = vrot.slane %v2209_v22, %v13663_v32  ;;  %v2232_v38 = vrot.slane %v2224_v23, %v13663_v32  ;;  %v2239_v42 = vrot.slane %v2225_v24, %v13663_v32 }
 0x445   : > { %v3024_v43 = vcombine.low %v2980_v55, %v3012_v26  ;;  %v3027_v29 = vcombine.high %v2987_v27, %v3019_v28  ;;  %v3025_v62 = vcombine.high %v2980_v55, %v3012_v26  ;;  %v3026_v20 = vcombine.low %v2987_v27, %v3019_v28 }
 0x446   : > { %v10471_v45 = vcombine.low %v2216_v54, %v2223_v30  ;;  %v10473_v47 = vcombine.high %v2216_v54, %v2223_v30  ;;  %v10475_v48 = vcombine.low %v2232_v38, %v2239_v42  ;;  %v10477_v49 = vcombine.high %v2232_v38, %v2239_v42  ;;  %v2068_v30 = vpop.permute.xlu0 %2067 }
 0x447   : > { %v3380_v50 = vpack.c.bf16 %v3024_v43, %v3024_v43  ;;  %v3383_v51 = vpack.c.bf16 %v3027_v29, %v3027_v29  ;;  %v3381_v16 = vpack.c.bf16 %v3025_v62, %v3025_v62  ;;  %v3382_v21 = vpack.c.bf16 %v3026_v20, %v3026_v20  ;;  %v2065_v22 = vpop.permute.xlu1 %2064 }
 0x448   : > { %v2764_v52 = vrot.slane %v10471_v45, %v13660_v25  ;;  %v2780_v53 = vrot.slane %v10473_v47, %v13660_v25  ;;  %v2796_v57 = vrot.slane %v10475_v48, %v13660_v25  ;;  %v2812_v58 = vrot.slane %v10477_v49, %v13660_v25 }
 0x449   : > { %v3409_v59 = vsel %vm3404_vm4, %v3380_v50, 0  ;;  %v3547_v61 = vsel %vm3404_vm4, %v3383_v51, 0  ;;  %v3455_v19 = vsel %vm3404_vm4, %v3381_v16, 0  ;;  %v3501_v24 = vsel %vm3404_vm4, %v3382_v21, 0 }
 0x44a   : > { %v2820_v1 = vcombine.low %v2764_v52, %v2780_v53  ;;  %v2821_v2 = vcombine.high %v2764_v52, %v2780_v53  ;;  %v2852_v3 = vcombine.low %v2796_v57, %v2812_v58  ;;  %v2853_v4 = vcombine.high %v2796_v57, %v2812_v58  ;;  %11260 = vmatpush3.bf16.xpose.msra.mxu0 %v3409_v59 }
 0x44b   : > { %11278 = vmatpush3.bf16.xpose.msra.mxu1 %v3547_v61  ;;  %11265 = vmatprep.subr.bf16.mxu0 %v13006_v56  ;;  %v2071_v26 = vpop.permute.xlu1 %2070 }
 0x44c   : > { %v2828_v5 = vrot.slane %v2820_v1, %v13663_v32  ;;  %v2860_v6 = vrot.slane %v2852_v3, %v13663_v32  ;;  %v2835_v10 = vrot.slane %v2821_v2, %v13663_v32  ;;  %v2867_v13 = vrot.slane %v2853_v4, %v13663_v32  ;;  %11289 = vmatprep.subr.bf16.mxu1 %v13006_v56 }
 0x44d   : > { %v2416_v42 = vcombine.low %v2065_v22, %v2071_v26  ;;  %v2417_v43 = vcombine.high %v2065_v22, %v2071_v26 }
 0x44e   : > { %v2884_v35 = vcombine.low %v2828_v5, %v2860_v6  ;;  %v2887_v14 = vcombine.high %v2835_v10, %v2867_v13  ;;  %v2885_v15 = vcombine.high %v2828_v5, %v2860_v6  ;;  %v2886_v55 = vcombine.low %v2835_v10, %v2867_v13 }
 0x44f   : > { %v2017_v28 = vpop.permute.xlu1 %2016  ;;  %v2424_v50 = vrot.slane %v2416_v42, %v13660_v25  ;;  %v2431_v51 = vrot.slane %v2417_v43, %v13660_v25 }
 0x450   : > { %v3368_v33 = vpack.c.bf16 %v2884_v35, %v2884_v35  ;;  %v3371_v17 = vpack.c.bf16 %v2887_v14, %v2887_v14  ;;  %v3369_v23 = vpack.c.bf16 %v2885_v15, %v2885_v15  ;;  %v3370_v27 = vpack.c.bf16 %v2886_v55, %v2886_v55 }
 0x452   : > { %11262 = vmatmul.mubr.msk.bf16.vlgmr.msra.gmra.mrb[12].mxu0 %vm3404_vm4, %v3368_v33  ;;  %11280 = vmatmul.mubr.msk.bf16.vlgmr.msra.gmra.mrb[8].mxu1 %vm3404_vm4, %v3371_v17 }
 0x453   : > { %11266 = vmatpush3.bf16.xpose.msra.mxu0 %v3455_v19  ;;  %11267 = vmatprep.mubr.msk.bf16.mxu0 %vm13007_vm2, %v13006_v56  ;;  %v2025_v54 = vpop.permute.xlu1 %2024 }
 0x454   : > { %11271 = vmatprep.subr.bf16.mxu0 %v13006_v56  ;;  %11291 = vmatprep.mubr.msk.bf16.mxu1 %vm13007_vm2, %v13006_v56 }
 0x457   : > { %v13719_v38 = vpop.permute.xlu1 %2034 }
 0x45a   : > { %11268 = vmatmul.mubr.msk.bf16.vlgmr.msra.gmra.mrb[16].mxu0 %vm3404_vm4, %v3369_v23 }
 0x45b   : > { %11272 = vmatpush3.bf16.xpose.msra.mxu0 %v3501_v24  ;;  %11273 = vmatprep.mubr.msk.bf16.mxu0 %vm13007_vm2, %v13006_v56 }
 0x45c   : > { %11283 = vmatprep.subr.bf16.mxu0 %v13006_v56 }
 0x462   : > { %11274 = vmatmul.mubr.msk.bf16.vlgmr.msra.gmra.mrb[20].mxu0 %vm3404_vm4, %v3370_v27 }
 0x463   : > { %11285 = vmatprep.mubr.msk.bf16.mxu0 %vm13007_vm2, %v13006_v56 }
 0x474   : > { %v2077_v29 = vpop.permute.xlu0 %2076  ;;  %v13721_v45 = vpop.permute.xlu1 %2081 }
 0x475   : > { %v2079_v47 = vsel %vm2078_vm5, %v2075_v18, %v2077_v29 }
 0x476   : > { %v2432_v48 = vcombine.low %v2068_v30, %v2079_v47  ;;  %v2433_v49 = vcombine.high %v2068_v30, %v2079_v47 }
 0x478   : > { %v2440_v52 = vrot.slane %v2432_v48, %v13660_v25  ;;  %v2447_v53 = vrot.slane %v2433_v49, %v13660_v25  ;;  %v2015_v57 = vpop.permute.xlu0 %2014  ;;  %v13727_v58 = vpop.permute.xlu1 %2087 }
 0x479   : > { %v2019_v2 = vsel %vm2018_vm6, %v2015_v57, %v2017_v28  ;;  %v2448_v24 = vcombine.low %v13721_v45, %v13727_v58 }
 0x47a   : > { %v2480_v59 = vcombine.low %v2424_v50, %v2440_v52  ;;  %v2481_v61 = vcombine.high %v2424_v50, %v2440_v52  ;;  %v2496_v62 = vcombine.low %v2431_v51, %v2447_v53  ;;  %v2497_v1 = vcombine.high %v2431_v51, %v2447_v53 }
 0x47b   : > { %v2176_v17 = vcombine.low %v2019_v2, %v2025_v54  ;;  %v2177_v18 = vcombine.high %v2019_v2, %v2025_v54  ;;  %v2456_v2 = vrot.slane %v2448_v24, %v13660_v25 }
 0x47c   : > { %v2488_v3 = vrot.slane %v2480_v59, %v13663_v32  ;;  %v2495_v4 = vrot.slane %v2481_v61, %v13663_v32  ;;  %v2504_v5 = vrot.slane %v2496_v62, %v13663_v32  ;;  %v2511_v6 = vrot.slane %v2497_v1, %v13663_v32  ;;  %v2022_v10 = vpop.permute.xlu0 %2021  ;;  %v13733_v13 = vpop.permute.xlu1 %2030 }
 0x47d   : > { %v2184_v42 = vrot.slane %v2176_v17, %v13660_v25  ;;  %v2191_v43 = vrot.slane %v2177_v18, %v13660_v25  ;;  %v2449_v1 = vcombine.high %v13721_v45, %v13727_v58 }
 0x47e   : > { %v10487_v35 = vcombine.low %v2488_v3, %v2495_v4  ;;  %v10489_v14 = vcombine.high %v2488_v3, %v2495_v4  ;;  %v10491_v16 = vcombine.low %v2504_v5, %v2511_v6  ;;  %v10493_v33 = vcombine.high %v2504_v5, %v2511_v6 }
 0x480   : > { %v2028_v19 = vpop.permute.xlu0 %2027  ;;  %v13735_v20 = vpop.permute.xlu1 %2044  ;;  %v3036_v15 = vrot.slane %v10487_v35, %v13660_v25  ;;  %v3052_v21 = vrot.slane %v10489_v14, %v13660_v25  ;;  %v3068_v22 = vrot.slane %v10491_v16, %v13660_v25  ;;  %v3084_v23 = vrot.slane %v10493_v33, %v13660_v25 }
 0x481   : > { %v2192_v55 = vcombine.low %v2022_v10, %v2028_v19  ;;  %v2193_v26 = vcombine.high %v2022_v10, %v2028_v19 }
 0x482   : > { %v3092_v27 = vcombine.low %v3036_v15, %v3052_v21  ;;  %v3124_v28 = vcombine.low %v3068_v22, %v3084_v23  ;;  %v3093_v30 = vcombine.high %v3036_v15, %v3052_v21  ;;  %v3125_v54 = vcombine.high %v3068_v22, %v3084_v23 }
 0x483   : > { %v2200_v29 = vrot.slane %v2192_v55, %v13660_v25  ;;  %v2207_v47 = vrot.slane %v2193_v26, %v13660_v25 }
 0x484   : > { %v2085_v48 = vpop.permute.xlu0 %2084  ;;  %v13747_v49 = vpop.permute.xlu1 %2121  ;;  %v3100_v50 = vrot.slane %v3092_v27, %v13663_v32  ;;  %v3132_v51 = vrot.slane %v3124_v28, %v13663_v32  ;;  %v3107_v52 = vrot.slane %v3093_v30, %v13663_v32  ;;  %v3139_v53 = vrot.slane %v3125_v54, %v13663_v32 }
 0x485   : > { %v2240_v57 = vcombine.low %v2184_v42, %v2200_v29  ;;  %v2241_v59 = vcombine.high %v2184_v42, %v2200_v29  ;;  %v2256_v61 = vcombine.low %v2191_v43, %v2207_v47  ;;  %v2257_v62 = vcombine.high %v2191_v43, %v2207_v47 }
 0x486   : > { %v3156_v3 = vcombine.low %v3100_v50, %v3132_v51  ;;  %v3157_v4 = vcombine.high %v3100_v50, %v3132_v51  ;;  %v3158_v18 = vcombine.low %v3107_v52, %v3139_v53  ;;  %v13762_v19 = vcombine.high %v3107_v52, %v3139_v53 }
 0x487   : > { %v2248_v5 = vrot.slane %v2240_v57, %v13663_v32  ;;  %v2255_v6 = vrot.slane %v2241_v59, %v13663_v32  ;;  %v2264_v10 = vrot.slane %v2256_v61, %v13663_v32  ;;  %v2271_v35 = vrot.slane %v2257_v62, %v13663_v32 }
 0x488   : > { %v2091_v14 = vpop.permute.xlu0 %2090  ;;  %v13760_v16 = vpop.permute.xlu1 %2096  ;;  %v3384_v33 = vpack.c.bf16 %v3156_v3, %v3156_v3  ;;  %v3385_v17 = vpack.c.bf16 %v3157_v4, %v3157_v4  ;;  %v2463_v54 = vrot.slane %v2449_v1, %v13660_v25  ;;  %v3386_v51 = vpack.c.bf16 %v3158_v18, %v3158_v18 }
 0x489   : > { %v10472_v45 = vcombine.low %v2248_v5, %v2255_v6  ;;  %v10474_v58 = vcombine.high %v2248_v5, %v2255_v6  ;;  %v10476_v15 = vcombine.low %v2264_v10, %v2271_v35  ;;  %v10478_v21 = vcombine.high %v2264_v10, %v2271_v35 }
 0x48a   : > { %v2464_v22 = vcombine.low %v2085_v48, %v2091_v14  ;;  %v2465_v23 = vcombine.high %v2085_v48, %v2091_v14  ;;  %v3593_v24 = vsel %vm3404_vm4, %v3384_v33, 0  ;;  %v3639_v55 = vsel %vm3404_vm4, %v3385_v17, 0 }
 0x48b   : > { %v2771_v26 = vrot.slane %v10472_v45, %v13660_v25  ;;  %v2787_v27 = vrot.slane %v10474_v58, %v13660_v25  ;;  %v13769_v28 = vrot.slane %v10476_v15, %v13660_v25  ;;  %v13772_v30 = vrot.slane %v10478_v21, %v13660_v25  ;;  %11284 = vmatpush3.bf16.xpose.msra.mxu0 %v3593_v24 }
 0x48c   : > { %v2472_v42 = vrot.slane %v2464_v22, %v13660_v25  ;;  %v2479_v43 = vrot.slane %v2465_v23, %v13660_v25  ;;  %11290 = vmatpush3.bf16.xpose.msra.mxu1 %v3639_v55  ;;  %v2037_v29 = vpop.permute.xlu0 %2036  ;;  %v13777_v47 = vpop.permute.xlu1 %2101  ;;  %11295 = vmatprep.subr.bf16.mxu0 %v13006_v56  ;;  %v3387_v1 = vpack.c.bf16 %v13762_v19, %v13762_v19  ;;  %v3685_v45 = vsel %vm3404_vm4, %v3386_v51, 0 }
 0x48d   : > { %v2836_v48 = vcombine.low %v2771_v26, %v2787_v27  ;;  %v2868_v50 = vcombine.low %v13769_v28, %v13772_v30  ;;  %11301 = vmatprep.subr.bf16.mxu1 %v13006_v56  ;;  %v2837_v61 = vcombine.high %v2771_v26, %v2787_v27  ;;  %v2039_v62 = vsel %vm2038_vm7, %v13719_v38, %v2037_v29 }
 0x48e   : > { %v2512_v52 = vcombine.low %v2456_v2, %v2472_v42  ;;  %v2513_v53 = vcombine.high %v2456_v2, %v2472_v42  ;;  %v2528_v57 = vcombine.low %v2463_v54, %v2479_v43  ;;  %v2529_v59 = vcombine.high %v2463_v54, %v2479_v43 }
 0x48f   : > { %v2296_v2 = vcombine.low %v2039_v62, %v13735_v20  ;;  %v2297_v14 = vcombine.high %v2039_v62, %v13735_v20  ;;  %v2844_v18 = vrot.slane %v2836_v48, %v13663_v32  ;;  %v2876_v19 = vrot.slane %v2868_v50, %v13663_v32 }
 0x490   : > { %v2520_v3 = vrot.slane %v2512_v52, %v13663_v32  ;;  %v2527_v4 = vrot.slane %v2513_v53, %v13663_v32  ;;  %v2536_v5 = vrot.slane %v2528_v57, %v13663_v32  ;;  %v2543_v6 = vrot.slane %v2529_v59, %v13663_v32  ;;  %v2042_v10 = vpop.permute.xlu0 %2041  ;;  %v13790_v35 = vpop.permute.xlu1 %2107 }
 0x491   : > { %v2280_v38 = vcombine.low %v13733_v13, %v2042_v10  ;;  %v2281_v33 = vcombine.high %v13733_v13, %v2042_v10  ;;  %v2304_v58 = vrot.slane %v2296_v2, %v13660_v25  ;;  %v2311_v15 = vrot.slane %v2297_v14, %v13660_v25 }
 0x492   : > { %v10488_v17 = vcombine.low %v2520_v3, %v2527_v4  ;;  %v2869_v22 = vcombine.high %v13769_v28, %v13772_v30  ;;  %v10490_v13 = vcombine.high %v2520_v3, %v2527_v4  ;;  %v10492_v23 = vcombine.low %v2536_v5, %v2543_v6 }
 0x493   : > { %v2288_v21 = vrot.slane %v2280_v38, %v13660_v25  ;;  %v2295_v20 = vrot.slane %v2281_v33, %v13660_v25  ;;  %v2851_v26 = vrot.slane %v2837_v61, %v13663_v32  ;;  %v10494_v48 = vcombine.high %v2536_v5, %v2543_v6 }
 0x494   : > { %v2117_v24 = vpop.permute.xlu0 %2116  ;;  %v2115_v55 = vpop.permute.xlu1 %2114  ;;  %v13807_v29 = vrot.slane %v10488_v17, %v13660_v25  ;;  %v2888_v51 = vcombine.low %v2844_v18, %v2876_v19  ;;  %v13817_v57 = vrot.slane %v10490_v13, %v13660_v25  ;;  %v2568_v59 = vcombine.low %v13777_v47, %v13790_v35 }
 0x495   : > { %v2344_v27 = vcombine.low %v2288_v21, %v2304_v58  ;;  %v2345_v54 = vcombine.high %v2288_v21, %v2304_v58  ;;  %v2360_v42 = vcombine.low %v2295_v20, %v2311_v15  ;;  %v2361_v43 = vcombine.high %v2295_v20, %v2311_v15 }
 0x496   : > { %v13810_v50 = vsel %vm2118_vm8, %v2115_v55, %v2117_v24  ;;  %v3372_v61 = vpack.c.bf16 %v2888_v51, %v2888_v51  ;;  %v2889_v62 = vcombine.high %v2844_v18, %v2876_v19  ;;  %v13822_v2 = vrot.slane %v10492_v23, %v13660_v25 }
 0x497   : > { %v2352_v28 = vrot.slane %v2344_v27, %v13663_v32  ;;  %v2359_v30 = vrot.slane %v2345_v54, %v13663_v32  ;;  %v2368_v52 = vrot.slane %v2360_v42, %v13663_v32  ;;  %v2375_v53 = vrot.slane %v2361_v43, %v13663_v32 }
 0x498   : > { %v2095_v3 = vpop.permute.xlu0 %2094  ;;  %v13825_v14 = vrot.slane %v10494_v48, %v13660_v25  ;;  %v2569_v38 = vcombine.high %v13777_v47, %v13790_v35  ;;  %11286 = vmatmul.mubr.msk.bf16.vlgmr.msra.gmra.mrb[24].mxu0 %vm3404_vm4, %v3372_v61  ;;  %v3373_v33 = vpack.c.bf16 %v2889_v62, %v2889_v62  ;;  %v3731_v47 = vsel %vm3404_vm4, %v3387_v1, 0 }
 0x499   : > { %v10479_v4 = vcombine.low %v2352_v28, %v2359_v30  ;;  %v10481_v5 = vcombine.high %v2352_v28, %v2359_v30  ;;  %v10483_v6 = vcombine.low %v2368_v52, %v2375_v53  ;;  %v10485_v10 = vcombine.high %v2368_v52, %v2375_v53  ;;  %11296 = vmatpush3.bf16.xpose.msra.mxu0 %v3685_v45 }
 0x49a   : > { %11292 = vmatmul.mubr.msk.bf16.vlgmr.msra.gmra.mrb[12].mxu1 %vm3404_vm4, %v3373_v33  ;;  %11297 = vmatprep.mubr.msk.bf16.mxu0 %vm13007_vm2, %v13006_v56  ;;  %v2883_v15 = vrot.slane %v2869_v22, %v13663_v32  ;;  %v2576_v13 = vrot.slane %v2568_v59, %v13660_v25  ;;  %v2099_v45 = vsel %vm2098_vm9, %v2095_v3, %v13760_v16 }
 0x49b   : > { %v13831_v17 = vrot.slane %v10479_v4, %v13660_v25  ;;  %v13834_v18 = vrot.slane %v10481_v5, %v13660_v25  ;;  %v13837_v19 = vrot.slane %v10483_v6, %v13660_v25  ;;  %v13840_v58 = vrot.slane %v10485_v10, %v13660_v25  ;;  %11302 = vmatpush3.bf16.xpose.msra.mxu1 %v3731_v47 }
 0x49c   : > { %v2105_v35 = vpop.permute.xlu0 %2104  ;;  %11303 = vmatprep.mubr.msk.bf16.mxu1 %vm13007_vm2, %v13006_v56  ;;  %v2890_v24 = vcombine.low %v2851_v26, %v2883_v15  ;;  %v2891_v55 = vcombine.high %v2851_v26, %v2883_v15  ;;  %v2583_v22 = vrot.slane %v2569_v38, %v13660_v25  ;;  %11307 = vmatprep.subr.bf16.mxu0 %v13006_v56 }
 0x49d   : > { %v2956_v21 = vcombine.low %v13831_v17, %v13834_v18  ;;  %v2988_v20 = vcombine.low %v13837_v19, %v13840_v58  ;;  %v2552_v23 = vcombine.low %v2099_v45, %v2105_v35  ;;  %v2553_v1 = vcombine.high %v2099_v45, %v2105_v35  ;;  %11313 = vmatprep.subr.bf16.mxu1 %v13006_v56 }
 0x49e   : > { %v3108_v27 = vcombine.low %v13807_v29, %v13817_v57  ;;  %v3140_v54 = vcombine.low %v13822_v2, %v13825_v14  ;;  %v3374_v43 = vpack.c.bf16 %v2890_v24, %v2890_v24  ;;  %v3375_v26 = vpack.c.bf16 %v2891_v55, %v2891_v55 }
 0x49f   : > { %v2560_v16 = vrot.slane %v2552_v23, %v13660_v25  ;;  %v2567_v42 = vrot.slane %v2553_v1, %v13660_v25  ;;  %v2964_v48 = vrot.slane %v2956_v21, %v13663_v32  ;;  %v2996_v30 = vrot.slane %v2988_v20, %v13663_v32 }
 0x4a0   : > { %v3116_v51 = vrot.slane %v3108_v27, %v13663_v32  ;;  %v3148_v28 = vrot.slane %v3140_v54, %v13663_v32  ;;  %11298 = vmatmul.mubr.msk.bf16.vlgmr.msra.gmra.mrb[28].mxu0 %vm3404_vm4, %v3374_v43  ;;  %v3109_v4 = vcombine.high %v13807_v29, %v13817_v57  ;;  %v3141_v1 = vcombine.high %v13822_v2, %v13825_v14 }
 0x4a1   : > { %v2616_v52 = vcombine.low %v2560_v16, %v2576_v13  ;;  %v2617_v53 = vcombine.high %v2560_v16, %v2576_v13  ;;  %v2632_v59 = vcombine.low %v2567_v42, %v2583_v22  ;;  %v2633_v61 = vcombine.high %v2567_v42, %v2583_v22  ;;  %11309 = vmatprep.mubr.msk.bf16.mxu0 %vm13007_vm2, %v13006_v56 }
 0x4a2   : > { %v3160_v62 = vcombine.low %v3116_v51, %v3148_v28  ;;  %v3161_v3 = vcombine.high %v3116_v51, %v3148_v28  ;;  %11304 = vmatmul.mubr.msk.bf16.vlgmr.msra.gmra.mrb[16].mxu1 %vm3404_vm4, %v3375_v26  ;;  %v3020_v35 = vcombine.low %v2964_v48, %v2996_v30  ;;  %v3021_v15 = vcombine.high %v2964_v48, %v2996_v30 }
 0x4a3   : > { %v2624_v5 = vrot.slane %v2616_v52, %v13663_v32  ;;  %v2631_v6 = vrot.slane %v2617_v53, %v13663_v32  ;;  %v2640_v10 = vrot.slane %v2632_v59, %v13663_v32  ;;  %v2647_v38 = vrot.slane %v2633_v61, %v13663_v32  ;;  %11315 = vmatprep.mubr.msk.bf16.mxu1 %vm13007_vm2, %v13006_v56 }
 0x4a4   : > { %v3388_v33 = vpack.c.bf16 %v3160_v62, %v3160_v62  ;;  %v3389_v47 = vpack.c.bf16 %v3161_v3, %v3161_v3  ;;  %v3123_v23 = vrot.slane %v3109_v4, %v13663_v32  ;;  %v2957_v54 = vcombine.high %v13831_v17, %v13834_v18 }
 0x4a5   : > { %v10495_v21 = vcombine.low %v2624_v5, %v2631_v6  ;;  %v10497_v20 = vcombine.high %v2624_v5, %v2631_v6  ;;  %v10499_v29 = vcombine.low %v2640_v10, %v2647_v38  ;;  %v10501_v57 = vcombine.high %v2640_v10, %v2647_v38 }
 0x4a6   : > { %v3777_v13 = vsel %vm3404_vm4, %v3388_v33, 0  ;;  %v3823_v45 = vsel %vm3404_vm4, %v3389_v47, 0  ;;  %v2989_v16 = vcombine.high %v13837_v19, %v13840_v58  ;;  %v3155_v2 = vrot.slane %v3141_v1, %v13663_v32 }
 0x4a7   : > { %v3172_v24 = vrot.slane %v10495_v21, %v13660_v25  ;;  %v3188_v55 = vrot.slane %v10497_v20, %v13660_v25  ;;  %v3204_v22 = vrot.slane %v10499_v29, %v13660_v25  ;;  %v3220_v27 = vrot.slane %v10501_v57, %v13660_v25  ;;  %11308 = vmatpush3.bf16.xpose.msra.mxu0 %v3777_v13 }
 0x4a8   : > { %11314 = vmatpush3.bf16.xpose.msra.mxu1 %v3823_v45  ;;  %11319 = vmatprep.subr.bf16.mxu0 %v13006_v56  ;;  %v3376_v26 = vpack.c.bf16 %v3020_v35, %v3020_v35  ;;  %v3377_v51 = vpack.c.bf16 %v3021_v15, %v3021_v15  ;;  %v3162_v28 = vcombine.low %v3123_v23, %v3155_v2  ;;  %v13929_v45 = vld [vmem:[%s512_s2] ss:$0 sm:$0xff]  ;;  %s13032_s2 = smov 90  }
 0x4a9   : > { %11325 = vmatprep.subr.bf16.mxu1 %v13006_v56  ;;  %v3228_v14 = vcombine.low %v3172_v24, %v3188_v55  ;;  %v3260_v42 = vcombine.low %v3204_v22, %v3220_v27  ;;  %v3229_v43 = vcombine.high %v3172_v24, %v3188_v55  ;;  %v3261_v48 = vcombine.high %v3204_v22, %v3220_v27 }
 0x4aa   : > { %v3163_v30 = vcombine.high %v3123_v23, %v3155_v2  ;;  %v3390_v52 = vpack.c.bf16 %v3162_v28, %v3162_v28  ;;  %v2971_v59 = vrot.slane %v2957_v54, %v13663_v32  ;;  %v3003_v61 = vrot.slane %v2989_v16, %v13663_v32 }
 0x4ab   : > { %v3236_v17 = vrot.slane %v3228_v14, %v13663_v32  ;;  %v3268_v18 = vrot.slane %v3260_v42, %v13663_v32  ;;  %v3243_v19 = vrot.slane %v3229_v43, %v13663_v32  ;;  %v3275_v58 = vrot.slane %v3261_v48, %v13663_v32 }
 0x4ac   : > { %v3391_v53 = vpack.c.bf16 %v3163_v30, %v3163_v30  ;;  %v3869_v6 = vsel %vm3404_vm4, %v3390_v52, 0  ;;  %v3022_v38 = vcombine.low %v2971_v59, %v3003_v61  ;;  %v3023_v47 = vcombine.high %v2971_v59, %v3003_v61 }
 0x4ad   : > { %v3292_v62 = vcombine.low %v3236_v17, %v3268_v18  ;;  %v3293_v3 = vcombine.high %v3236_v17, %v3268_v18  ;;  %v13903_v4 = vcombine.low %v3243_v19, %v3275_v58  ;;  %v13905_v5 = vcombine.high %v3243_v19, %v3275_v58 }
 0x4ae   : > { %11310 = vmatmul.mubr.msk.bf16.vlgmr.msra.gmra.mrb[32].mxu0 %vm3404_vm4, %v3376_v26  ;;  %v3915_v10 = vsel %vm3404_vm4, %v3391_v53, 0  ;;  %v3378_v15 = vpack.c.bf16 %v3022_v38, %v3022_v38  ;;  %v3379_v20 = vpack.c.bf16 %v3023_v47, %v3023_v47 }
 0x4af   : > { %11316 = vmatmul.mubr.msk.bf16.vlgmr.msra.gmra.mrb[20].mxu1 %vm3404_vm4, %v3377_v51  ;;  %11320 = vmatpush3.bf16.xpose.msra.mxu0 %v3869_v6  ;;  %v3392_v33 = vpack.c.bf16 %v3292_v62, %v3292_v62  ;;  %v3393_v35 = vpack.c.bf16 %v3293_v3, %v3293_v3 }
 0x4b0   : > { %11326 = vmatpush3.bf16.xpose.msra.mxu1 %v3915_v10  ;;  %11321 = vmatprep.mubr.msk.bf16.mxu0 %vm13007_vm2, %v13006_v56 }
 0x4b1   : > { %11327 = vmatprep.mubr.msk.bf16.mxu1 %vm13007_vm2, %v13006_v56  ;;  %11331 = vmatprep.subr.bf16.mxu0 %v13006_v56  ;;  %v4137_v21 = vsel %vm1650_vm1, %v3392_v33, 0  ;;  %v4183_v29 = vsel %vm1650_vm1, %v3393_v35, 0 }
 0x4b2   : > { %11337 = vmatprep.subr.bf16.mxu1 %v13006_v56 }
 0x4b6   : > { %11322 = vmatmul.mubr.msk.bf16.vlgmr.msra.gmra.mrb[36].mxu0 %vm3404_vm4, %v3378_v15 }
 0x4b7   : > { %11328 = vmatmul.mubr.msk.bf16.vlgmr.msra.gmra.mrb[24].mxu1 %vm3404_vm4, %v3379_v20  ;;  %11332 = vmatpush3.bf16.msra.mxu0 %v4137_v21 }
 0x4b8   : > { %11338 = vmatpush3.bf16.msra.mxu1 %v4183_v29  ;;  %11333 = vmatprep.mubr.msk.bf16.mxu0 %vm13007_vm2, %v13006_v56 }
 0x4b9   : > { %11343 = vmatprep.subr.bf16.mxu0 %v13006_v56  ;;  %11339 = vmatprep.mubr.msk.bf16.mxu1 %vm13007_vm2, %v13006_v56 }
 0x4ba   : > { %11349 = vmatprep.subr.bf16.mxu1 %v13006_v56 }
 0x525   : > { %v3445_v57 = vpop.f32.mrb[12].mxu0  ;;  %v3583_v13 = vpop.f32.mrb[8].mxu1 }
 0x526   : > { %v3957_v23 = vmul.f32 0.19611613, %v3445_v57  ;;  %v3960_v1 = vmul.f32 0.19611613, %v3583_v13  ;;  %v11263_v24 = vpop.f32.mrb[13].mxu0  ;;  %v11281_v55 = vpop.f32.mrb[9].mxu1 }
 0x527   : > { %v3448_v22 = vpop.f32.mrb[14].mxu0  ;;  %v3586_v27 = vpop.f32.mrb[10].mxu1 }
 0x528   : > { %v11264_v54 = vpop.f32.mrb[15].mxu0  ;;  %v11282_v16 = vpop.f32.mrb[11].mxu1  ;;  %v13932_v2 = vadd.f32 %v13929_v45, %v3957_v23  ;;  %v13937_v42 = vadd.f32 %v13929_v45, %v3960_v1 }
 0x52a   : > { %v3989_v14 = vsel %vm3988_vm10, %v13932_v2, -inf  ;;  %v3998_v51 = vsel %vm3988_vm10, %v13937_v42, -inf }
 0x52b   : > { %3990 = vmax.xlane.f32.xlu0 %v3989_v14 }
 0x52d   : > { %v3491_v43 = vpop.f32.mrb[16].mxu0 }
 0x52e   : > { %v3958_v48 = vmul.f32 0.19611613, %v3491_v43  ;;  %v11269_v26 = vpop.f32.mrb[17].mxu0 }
 0x52f   : > { %3999 = vmax.xlane.f32.xlu0 %v3998_v51  ;;  %v3494_v28 = vpop.f32.mrb[18].mxu0 }
 0x530   : > { %v11270_v30 = vpop.f32.mrb[19].mxu0  ;;  %v13942_v17 = vadd.f32 %v13929_v45, %v3958_v48 }
 0x532   : > { %v3992_v18 = vsel %vm3988_vm10, %v13942_v17, -inf }
 0x533   : > { %3993 = vmax.xlane.f32.xlu1 %v3992_v18 }
 0x535   : > { %v3537_v19 = vpop.f32.mrb[20].mxu0 }
 0x536   : > { %v3959_v58 = vmul.f32 0.19611613, %v3537_v19  ;;  %v11275_v52 = vpop.f32.mrb[21].mxu0 }
 0x537   : > { %v3540_v53 = vpop.f32.mrb[22].mxu0 }
 0x538   : > { %v11276_v59 = vpop.f32.mrb[23].mxu0  ;;  %v13947_v61 = vadd.f32 %v13929_v45, %v3959_v58 }
 0x53a   : > { %v3995_v62 = vsel %vm3988_vm10, %v13947_v61, -inf }
 0x53b   : > { %3996 = vmax.xlane.f32.xlu0 %v3995_v62 }
 0x551   : > { %2124 = vrot.lane.b32.xlu0 %v13649_v12, %s13032_s2  ;;  %s12887_s2 = sshll.u32 %s13037_s1, 4  ;;  %s12888_s2 = int_to_ptr.vmem [resolvable:$false] %s12887_s2 }
 0x56b   : > { %v3629_v3 = vpop.f32.mrb[24].mxu0 }
 0x56c   : > { %v3961_v6 = vmul.f32 0.19611613, %v3629_v3  ;;  %v11287_v10 = vpop.f32.mrb[25].mxu0 }
 0x56d   : > { %v3675_v38 = vpop.f32.mrb[12].mxu1  ;;  %v3632_v33 = vpop.f32.mrb[26].mxu0 }
 0x56e   : > { %v3962_v47 = vmul.f32 0.19611613, %v3675_v38  ;;  %v11293_v35 = vpop.f32.mrb[13].mxu1  ;;  %v11288_v15 = vpop.f32.mrb[27].mxu0  ;;  %v13953_v21 = vadd.f32 %v13929_v45, %v3961_v6 }
 0x56f   : > { %v3678_v20 = vpop.f32.mrb[14].mxu1 }
 0x570   : > { %v11294_v29 = vpop.f32.mrb[15].mxu1  ;;  %v4001_v57 = vsel %vm3988_vm10, %v13953_v21, -inf  ;;  %v13958_v13 = vadd.f32 %v13929_v45, %v3962_v47 }
 0x571   : > { %4002 = vmax.xlane.f32.xlu1 %v4001_v57 }
 0x572   : > { %v4004_v23 = vsel %vm3988_vm10, %v13958_v13, -inf }
 0x573   : > { %4005 = vmax.xlane.f32.xlu0 %v4004_v23  ;;  %v3721_v1 = vpop.f32.mrb[28].mxu0 }
 0x574   : > { %v3963_v24 = vmul.f32 0.19611613, %v3721_v1  ;;  %v11299_v55 = vpop.f32.mrb[29].mxu0 }
 0x575   : > { %v3767_v22 = vpop.f32.mrb[16].mxu1  ;;  %v3724_v27 = vpop.f32.mrb[30].mxu0 }
 0x576   : > { %v3964_v54 = vmul.f32 0.19611613, %v3767_v22  ;;  %v11305_v16 = vpop.f32.mrb[17].mxu1  ;;  %v11300_v14 = vpop.f32.mrb[31].mxu0  ;;  %v13963_v43 = vadd.f32 %v13929_v45, %v3963_v24  ;;  %v857_v22 = vsub.s32 7, %v13535_v34  ;;  %v12539_v27 = vld [vmem:[#allocation11] sm:$0xff] }
 0x577   : > { %v3770_v48 = vpop.f32.mrb[18].mxu1  ;;  %v12364_v34 = vld [vmem:[#allocation19 + $0x694] ss:$12 sps:$4 sm:$0xff]  }
 0x578   : > { %v11306_v26 = vpop.f32.mrb[19].mxu1  ;;  %v13966_v51 = vadd.f32 %v13929_v45, %v3964_v54  ;;  %v4007_v28 = vsel %vm3988_vm10, %v13963_v43, -inf  ;;  %v858_v54 = vrot.slane %v12539_v27, %v857_v22 }
 0x579   : > { %4008 = vmax.xlane.f32.xlu1 %v4007_v28 }
 0x57a   : > { %v4010_v30 = vsel %vm3988_vm10, %v13966_v51, -inf  ;;  %v13986_v16 = vadd.f32 %v13635_v60, %v858_v54 }
 0x57b   : > { %4011 = vmax.xlane.f32.xlu0 %v4010_v30 }
 0x581   : > { %v3813_v18 = vpop.f32.mrb[32].mxu0 }
 0x582   : > { %v3965_v19 = vmul.f32 0.19611613, %v3813_v18  ;;  %v3859_v58 = vpop.f32.mrb[20].mxu1  ;;  %v11311_v52 = vpop.f32.mrb[33].mxu0 }
 0x583   : > { %v3966_v53 = vmul.f32 0.19611613, %v3859_v58  ;;  %v11317_v59 = vpop.f32.mrb[21].mxu1  ;;  %v3816_v62 = vpop.f32.mrb[34].mxu0 }
 0x584   : > { %v3862_v3 = vpop.f32.mrb[22].mxu1  ;;  %v11312_v6 = vpop.f32.mrb[35].mxu0  ;;  %v13973_v10 = vadd.f32 %v13929_v45, %v3965_v19 }
 0x585   : > { %v11318_v38 = vpop.f32.mrb[23].mxu1  ;;  %v13976_v33 = vadd.f32 %v13929_v45, %v3966_v53  ;;  %v2111_v58 = vpop.permute.xlu1 %2110 }
 0x586   : > { %v4013_v47 = vsel %vm3988_vm10, %v13973_v10, -inf }
 0x587   : > { %v4016_v35 = vsel %vm3988_vm10, %v13976_v33, -inf  ;;  %4014 = vmax.xlane.f32.xlu1 %v4013_v47 }
 0x588   : > { %4017 = vmax.xlane.f32.xlu0 %v4016_v35 }
 0x589   : > { %v3905_v15 = vpop.f32.mrb[36].mxu0 }
 0x58a   : > { %v3951_v20 = vpop.f32.mrb[24].mxu1  ;;  %v11323_v29 = vpop.f32.mrb[37].mxu0  ;;  %v3967_v14 = vmul.f32 0.19611613, %v3905_v15 }
 0x58b   : > { %v11329_v57 = vpop.f32.mrb[25].mxu1  ;;  %v3908_v23 = vpop.f32.mrb[38].mxu0  ;;  %v3968_v48 = vmul.f32 0.19611613, %v3951_v20  ;;  %v2585_v20 = vcombine.high %v2111_v58, %v13747_v49 }
 0x58c   : > { %v3954_v1 = vpop.f32.mrb[26].mxu1  ;;  %v11324_v24 = vpop.f32.mrb[39].mxu0  ;;  %v13991_v26 = vadd.f32 %v13929_v45, %v3967_v14 }
 0x58d   : > { %v11330_v55 = vpop.f32.mrb[27].mxu1  ;;  %v13994_v30 = vadd.f32 %v13929_v45, %v3968_v48 }
 0x58e   : > { %v4019_v60 = vsel %vm3988_vm10, %v13991_v26, -inf  ;;  %v2599_v55 = vrot.slane %v2585_v20, %v13660_v25 }
 0x58f   : > { %v4022_v53 = vsel %vm3988_vm10, %v13994_v30, -inf }
 0x598   : > { %2136 = vrot.lane.b32.xlu1 %v13986_v16, %s13033_s3 }
 0x59e   : > { %2134 = vrot.lane.b32.xlu0 %v13649_v12, %s13033_s3  ;;  %s12889_s3 = scalar_lea.vmem %s12888_s2, 768 }
 0x5b8   : > { %v3991_v28 = vpop.xlane.xlu0 %3990 }
 0x5b9   : > { %v4025_v18 = vsub.f32 %v13932_v2, %v3991_v28 }
 0x5bb   : > { %v4037_v19 = vmul.f32 1.442695, %v4025_v18 }
 0x5bc   : > { %v4000_v52 = vpop.xlane.xlu0 %3999  ;;  %4020 = vmax.xlane.f32.xlu1 %v4019_v60 }
 0x5bd   : > { %12466 = vpow2.f32 %v4037_v19  ;;  %v4028_v59 = vsub.f32 %v13937_v42, %v4000_v52  ;;  %4023 = vmax.xlane.f32.xlu0 %v4022_v53  ;;  %v2584_v42 = vcombine.low %v2111_v58, %v13747_v49 }
 0x5bf   : > { %v4043_v62 = vmul.f32 1.442695, %v4028_v59 }
 0x5c0   : > { %v3994_v3 = vpop.xlane.xlu1 %3993 }
 0x5c1   : > { %12468 = vpow2.f32 %v4043_v62  ;;  %v4026_v45 = vsub.f32 %v13942_v17, %v3994_v3 }
 0x5c3   : > { %v4039_v2 = vmul.f32 1.442695, %v4026_v45 }
 0x5c5   : > { %12470 = vpow2.f32 %v4039_v2 }
 0x5c7   : > { %v14003_v6 = vpop.eup %12466 }
 0x5c8   : > { %v3997_v38 = vpop.xlane.xlu0 %3996  ;;  %v4061_v47 = vsel %vm3988_vm10, %v14003_v6, 0.0 }
 0x5c9   : > { %v4027_v35 = vsub.f32 %v13947_v61, %v3997_v38  ;;  %4062 = vadd.xlane.f32.xlu1 %v4061_v47  ;;  %v2592_v61 = vrot.slane %v2584_v42, %v13660_v25 }
 0x5cb   : > { %v14008_v15 = vpop.eup %12468  ;;  %v4041_v29 = vmul.f32 1.442695, %v4027_v35 }
 0x5cc   : > { %v2125_v57 = vpop.permute.xlu0 %2124  ;;  %v4070_v17 = vsel %vm3988_vm10, %v14008_v15, 0.0 }
 0x5cd   : > { %12472 = vpow2.f32 %v4041_v29  ;;  %v2600_v23 = vcombine.low %v13810_v50, %v2125_v57  ;;  %v2601_v1 = vcombine.high %v13810_v50, %v2125_v57  ;;  %4071 = vadd.xlane.f32.xlu0 %v4070_v17 }
 0x5cf   : > { %v14016_v24 = vpop.eup %12470  ;;  %v2608_v27 = vrot.slane %v2600_v23, %v13660_v25  ;;  %v2615_v49 = vrot.slane %v2601_v1, %v13660_v25 }
 0x5d0   : > { %v4064_v54 = vsel %vm3988_vm10, %v14016_v24, 0.0 }
 0x5d1   : > { %v2648_v14 = vcombine.low %v2592_v61, %v2608_v27  ;;  %v2649_v48 = vcombine.high %v2592_v61, %v2608_v27  ;;  %v2664_v28 = vcombine.low %v2599_v55, %v2615_v49  ;;  %v2665_v18 = vcombine.high %v2599_v55, %v2615_v49  ;;  %4065 = vadd.xlane.f32.xlu0 %v4064_v54 }
 0x5d3   : > { %v2656_v50 = vrot.slane %v2648_v14, %v13663_v32  ;;  %v2663_v19 = vrot.slane %v2649_v48, %v13663_v32  ;;  %v2672_v58 = vrot.slane %v2664_v28, %v13663_v32  ;;  %v2679_v60 = vrot.slane %v2665_v18, %v13663_v32 }
 0x5d5   : > { %v10496_v52 = vcombine.low %v2656_v50, %v2663_v19  ;;  %v10498_v53 = vcombine.high %v2656_v50, %v2663_v19  ;;  %v10500_v59 = vcombine.low %v2672_v58, %v2679_v60  ;;  %v10502_v62 = vcombine.high %v2672_v58, %v2679_v60 }
 0x5d7   : > { %v14028_v3 = vpop.eup %12472  ;;  %v3179_v45 = vrot.slane %v10496_v52, %v13660_v25  ;;  %v3195_v2 = vrot.slane %v10498_v53, %v13660_v25  ;;  %v3211_v38 = vrot.slane %v10500_v59, %v13660_v25  ;;  %v3227_v47 = vrot.slane %v10502_v62, %v13660_v25 }
 0x5d8   : > { %v4067_v35 = vsel %vm3988_vm10, %v14028_v3, 0.0 }
 0x5d9   : > { %4068 = vadd.xlane.f32.xlu1 %v4067_v35  ;;  %v3244_v42 = vcombine.low %v3179_v45, %v3195_v2  ;;  %v3276_v20 = vcombine.low %v3211_v38, %v3227_v47  ;;  %v3245_v29 = vcombine.high %v3179_v45, %v3195_v2  ;;  %v3277_v57 = vcombine.high %v3211_v38, %v3227_v47 }
 0x5db   : > { %v3252_v17 = vrot.slane %v3244_v42, %v13663_v32  ;;  %v3284_v23 = vrot.slane %v3276_v20, %v13663_v32  ;;  %v3259_v1 = vrot.slane %v3245_v29, %v13663_v32  ;;  %v3291_v61 = vrot.slane %v3277_v57, %v13663_v32 }
 0x5dd   : > { %v14040_v55 = vcombine.low %v3252_v17, %v3284_v23  ;;  %v14042_v27 = vcombine.high %v3252_v17, %v3284_v23  ;;  %v14044_v49 = vcombine.low %v3259_v1, %v3291_v61  ;;  %v14046_v54 = vcombine.high %v3259_v1, %v3291_v61 }
 0x5ea   : > { %2127 = vrot.lane.b32.xlu1 %v13649_v12, %s13034_s25 }
 0x5fe   : > { %v4003_v14 = vpop.xlane.xlu1 %4002 }
 0x5ff   : > { %v4029_v48 = vsub.f32 %v13953_v21, %v4003_v14 }
 0x600   : > { %v4006_v28 = vpop.xlane.xlu0 %4005 }
 0x601   : > { %v4045_v18 = vmul.f32 1.442695, %v4029_v48  ;;  %v4030_v50 = vsub.f32 %v13958_v13, %v4006_v28 }
 0x603   : > { %12474 = vpow2.f32 %v4045_v18  ;;  %v4047_v19 = vmul.f32 1.442695, %v4030_v50 }
 0x605   : > { %12476 = vpow2.f32 %v4047_v19 }
 0x606   : > { %v4009_v58 = vpop.xlane.xlu1 %4008 }
 0x607   : > { %v4031_v60 = vsub.f32 %v13963_v43, %v4009_v58 }
 0x608   : > { %v4012_v52 = vpop.xlane.xlu0 %4011 }
 0x609   : > { %v4032_v53 = vsub.f32 %v13966_v51, %v4012_v52  ;;  %v4049_v59 = vmul.f32 1.442695, %v4031_v60 }
 0x60b   : > { %v4051_v62 = vmul.f32 1.442695, %v4032_v53  ;;  %12478 = vpow2.f32 %v4049_v59 }
 0x60d   : > { %v14053_v45 = vpop.eup %12474  ;;  %12480 = vpow2.f32 %v4051_v62 }
 0x60e   : > { %v4073_v21 = vsel %vm3988_vm10, %v14053_v45, 0.0 }
 0x60f   : > { %v14057_v2 = vpop.eup %12476  ;;  %4074 = vadd.xlane.f32.xlu0 %v4073_v21 }
 0x610   : > { %v4076_v13 = vsel %vm3988_vm10, %v14057_v2, 0.0 }
 0x611   : > { %4077 = vadd.xlane.f32.xlu1 %v4076_v13  ;;  %v3394_v13 = vpack.c.bf16 %v13903_v4, %v13903_v4  ;;  %v3395_v4 = vpack.c.bf16 %v13905_v5, %v13905_v5  ;;  %v3396_v5 = vpack.c.bf16 %v14040_v55, %v14040_v55 }
 0x614   : > { %v4015_v43 = vpop.xlane.xlu1 %4014 }
 0x615   : > { %v4018_v38 = vpop.xlane.xlu0 %4017  ;;  %v4033_v51 = vsub.f32 %v13973_v10, %v4015_v43  ;;  %v14062_v47 = vpop.eup %12478 }
 0x616   : > { %v4079_v42 = vsel %vm3988_vm10, %v14062_v47, 0.0  ;;  %v4034_v61 = vsub.f32 %v13976_v33, %v4018_v38  ;;  %v4229_v38 = vsel %vm1650_vm1, %v3394_v13, 0 }
 0x617   : > { %v4053_v35 = vmul.f32 1.442695, %v4033_v51  ;;  %v14066_v20 = vpop.eup %12480  ;;  %4080 = vadd.xlane.f32.xlu0 %v4079_v42 }
 0x618   : > { %v2137_v29 = vpop.permute.xlu1 %2136  ;;  %v4082_v23 = vsel %vm3988_vm10, %v14066_v20, 0.0  ;;  %v4055_v14 = vmul.f32 1.442695, %v4034_v61  ;;  %v3397_v61 = vpack.c.bf16 %v14042_v27, %v14042_v27 }
 0x619   : > { %12482 = vpow2.f32 %v4053_v35  ;;  %v2135_v57 = vpop.permute.xlu0 %2134 }
 0x61a   : > { %v14068_v17 = vsel %vm2138_vm11, %v2135_v57, %v2137_v29  ;;  %12484 = vpow2.f32 %v4055_v14  ;;  %v4275_v57 = vsel %vm1650_vm1, %v3395_v4, 0 }
 0x61b   : > { %4083 = vadd.xlane.f32.xlu0 %v4082_v23 }
 0x623   : > { %v14072_v10 = vpop.eup %12482 }
 0x624   : > { %v4085_v1 = vsel %vm3988_vm10, %v14072_v10, 0.0  ;;  %v14081_v58 = vpop.eup %12484 }
 0x625   : > { %4086 = vadd.xlane.f32.xlu1 %v4085_v1 }
 0x631   : > { %2130 = vrot.lane.b32.xlu0 %v13649_v12, %s13035_s28  ;;  %v4088_v12 = vsel %vm3988_vm10, %v14081_v58, 0.0 }
 0x636   : > { %2141 = vrot.lane.b32.xlu1 %v13986_v16, %s13036_s26 }
 0x649   : > { %v4021_v48 = vpop.xlane.xlu1 %4020 }
 0x64a   : > { %v4024_v28 = vpop.xlane.xlu0 %4023  ;;  %v4035_v18 = vsub.f32 %v13991_v26, %v4021_v48 }
 0x64b   : > { %v4036_v50 = vsub.f32 %v13994_v30, %v4024_v28  ;;  %v4321_v28 = vsel %vm1650_vm1, %v3396_v5, 0 }
 0x64c   : > { %v4057_v19 = vmul.f32 1.442695, %v4035_v18 }
 0x64d   : > { %v4059_v60 = vmul.f32 1.442695, %v4036_v50 }
 0x64e   : > { %12486 = vpow2.f32 %v4057_v19 }
 0x64f   : > { %12488 = vpow2.f32 %v4059_v60 }
 0x650   : > { %4089 = vadd.xlane.f32.xlu0 %v4088_v12  ;;  %v3398_v12 = vpack.c.bf16 %v14044_v49, %v14044_v49 }
 0x656   : > { %v4063_v16 = vpop.xlane.xlu1 %4062 }
 0x657   : > { %12490 = vrcp.f32 %v4063_v16 }
 0x658   : > { %v14085_v33 = vpop.eup %12486 }
 0x659   : > { %v14087_v52 = vpop.eup %12488  ;;  %v4091_v26 = vsel %vm3988_vm10, %v14085_v33, 0.0 }
 0x65a   : > { %v4072_v30 = vpop.xlane.xlu0 %4071  ;;  %v4094_v53 = vsel %vm3988_vm10, %v14087_v52, 0.0  ;;  %4092 = vadd.xlane.f32.xlu1 %v4091_v26 }
 0x65b   : > { %4095 = vadd.xlane.f32.xlu0 %v4094_v53  ;;  %v3399_v53 = vpack.c.bf16 %v14046_v54, %v14046_v54 }
 0x65d   : > { %v4459_v49 = vsel %vm1650_vm1, %v3399_v53, 0 }
 0x65e   : > { %v4066_v59 = vpop.xlane.xlu0 %4065 }
 0x65f   : > { %12492 = vrcp.f32 %v4066_v59  ;;  %v4413_v59 = vsel %vm1650_vm1, %v3398_v12, 0 }
 0x660   : > { %12494 = vrcp.f32 %v4072_v30 }
 0x661   : > { %v12491_v62 = vpop.eup %12490 }
 0x662   : > { %v4098_v21 = vmul.f32 %v12491_v62, %v14003_v6 }
 0x664   : > { %v4121_v43 = vpack.c.bf16 %v4098_v21, %v4098_v21 }
 0x666   : > { %11334 = vmatmul.mubr.msk.bf16.vlgmr.msra.gmra.mrb[40].mxu0 %vm3988_vm10, %v4121_v43  ;;  %v4069_v51 = vpop.xlane.xlu1 %4068 }
 0x667   : > { %11344 = vmatpush3.bf16.msra.mxu0 %v4229_v38  ;;  %12496 = vrcp.f32 %v4069_v51  ;;  %11345 = vmatprep.mubr.msk.bf16.mxu0 %vm13007_vm2, %v13006_v56 }
 0x668   : > { %11355 = vmatprep.subr.bf16.mxu0 %v13006_v56 }
 0x669   : > { %v12493_v35 = vpop.eup %12492 }
 0x66a   : > { %v4100_v6 = vmul.f32 %v12493_v35, %v14016_v24  ;;  %v12495_v29 = vpop.eup %12494 }
 0x66b   : > { %v4104_v23 = vmul.f32 %v12495_v29, %v14008_v15  ;;  %v4367_v15 = vsel %vm1650_vm1, %v3397_v61, 0 }
 0x66c   : > { %v4122_v42 = vpack.c.bf16 %v4100_v6, %v4100_v6 }
 0x66d   : > { %v4124_v48 = vpack.c.bf16 %v4104_v23, %v4104_v23 }
 0x66e   : > { %11340 = vmatmul.mubr.msk.bf16.vlgmr.msra.gmra.mrb[28].mxu1 %vm3988_vm10, %v4122_v42 }
 0x66f   : > { %11350 = vmatpush3.bf16.msra.mxu1 %v4275_v57  ;;  %11351 = vmatprep.mubr.msk.bf16.mxu1 %vm13007_vm2, %v13006_v56 }
 0x670   : > { %11361 = vmatprep.subr.bf16.mxu1 %v13006_v56 }
 0x671   : > { %v12497_v1 = vpop.eup %12496 }
 0x672   : > { %v4102_v24 = vmul.f32 %v12497_v1, %v14028_v3  ;;  %v2128_v3 = vpop.permute.xlu1 %2127 }
 0x673   : > { %v2688_v43 = vcombine.low %v2128_v3, %v14068_v17  ;;  %v2689_v38 = vcombine.high %v2128_v3, %v14068_v17 }
 0x674   : > { %v4123_v14 = vpack.c.bf16 %v4102_v24, %v4102_v24 }
 0x675   : > { %v2696_v29 = vrot.slane %v2688_v43, %v13660_v25  ;;  %v2703_v57 = vrot.slane %v2689_v38, %v13660_v25 }
 0x676   : > { %11346 = vmatmul.mubr.msk.bf16.vlgmr.msra.gmra.mrb[44].mxu0 %vm3988_vm10, %v4123_v14  ;;  %11352 = vmatmul.mubr.msk.bf16.vlgmr.msra.gmra.mrb[32].mxu1 %vm3988_vm10, %v4124_v48 }
 0x677   : > { %11356 = vmatpush3.bf16.msra.mxu0 %v4321_v28  ;;  %11362 = vmatpush3.bf16.msra.mxu1 %v4367_v15 }
 0x678   : > { %11357 = vmatprep.mubr.msk.bf16.mxu0 %vm13007_vm2, %v13006_v56  ;;  %11367 = vmatprep.subr.bf16.mxu0 %v13006_v56 }
 0x679   : > { %11363 = vmatprep.mubr.msk.bf16.mxu1 %vm13007_vm2, %v13006_v56  ;;  %11373 = vmatprep.subr.bf16.mxu1 %v13006_v56 }
 0x69c   : > { %v4075_v55 = vpop.xlane.xlu0 %4074 }
 0x69d   : > { %12498 = vrcp.f32 %v4075_v55 }
 0x69e   : > { %v4078_v27 = vpop.xlane.xlu1 %4077 }
 0x69f   : > { %12500 = vrcp.f32 %v4078_v27 }
 0x6a4   : > { %v4081_v18 = vpop.xlane.xlu0 %4080 }
 0x6a5   : > { %12502 = vrcp.f32 %v4081_v18 }
 0x6a7   : > { %v12499_v50 = vpop.eup %12498 }
 0x6a8   : > { %v4106_v19 = vmul.f32 %v12499_v50, %v14053_v45  ;;  %v4084_v60 = vpop.xlane.xlu0 %4083 }
 0x6a9   : > { %v12501_v16 = vpop.eup %12500  ;;  %12504 = vrcp.f32 %v4084_v60 }
 0x6aa   : > { %v4108_v26 = vmul.f32 %v12501_v16, %v14057_v2  ;;  %v4125_v30 = vpack.c.bf16 %v4106_v19, %v4106_v19 }
 0x6ac   : > { %11358 = vmatmul.mubr.msk.bf16.vlgmr.msra.gmra.mrb[48].mxu0 %vm3988_vm10, %v4125_v30  ;;  %v4126_v62 = vpack.c.bf16 %v4108_v26, %v4108_v26  ;;  %v2131_v35 = vpop.permute.xlu0 %2130 }
 0x6ad   : > { %11368 = vmatpush3.bf16.msra.mxu0 %v4413_v59  ;;  %11369 = vmatprep.mubr.msk.bf16.mxu0 %vm13007_vm2, %v13006_v56 }
 0x6ae   : > { %11364 = vmatmul.mubr.msk.bf16.vlgmr.msra.gmra.mrb[36].mxu1 %vm3988_vm10, %v4126_v62  ;;  %11379 = vmatprep.subr.bf16.mxu0 %v13006_v56 }
 0x6af   : > { %v12503_v45 = vpop.eup %12502  ;;  %11374 = vmatpush3.bf16.msra.mxu1 %v4459_v49  ;;  %11375 = vmatprep.mubr.msk.bf16.mxu1 %vm13007_vm2, %v13006_v56 }
 0x6b0   : > { %v4110_v54 = vmul.f32 %v12503_v45, %v14062_v47  ;;  %11385 = vmatprep.subr.bf16.mxu1 %v13006_v56 }
 0x6b2   : > { %v4087_v2 = vpop.xlane.xlu1 %4086  ;;  %v4127_v21 = vpack.c.bf16 %v4110_v54, %v4110_v54 }
 0x6b3   : > { %v12505_v13 = vpop.eup %12504  ;;  %12506 = vrcp.f32 %v4087_v2 }
 0x6b4   : > { %v4112_v51 = vmul.f32 %v12505_v13, %v14066_v20  ;;  %11370 = vmatmul.mubr.msk.bf16.vlgmr.msra.gmra.mrb[52].mxu0 %vm3988_vm10, %v4127_v21 }
 0x6b5   : > { %11381 = vmatprep.mubr.msk.bf16.mxu0 %vm13007_vm2, %v13006_v56 }
 0x6b6   : > { %v2142_v6 = vpop.permute.xlu1 %2141  ;;  %v4128_v42 = vpack.c.bf16 %v4112_v51, %v4112_v51 }
 0x6b7   : > { %v2704_v4 = vcombine.low %v2131_v35, %v2142_v6  ;;  %v2705_v47 = vcombine.high %v2131_v35, %v2142_v6 }
 0x6b8   : > { %11376 = vmatmul.mubr.msk.bf16.vlgmr.msra.gmra.mrb[40].mxu1 %vm3988_vm10, %v4128_v42 }
 0x6b9   : > { %v2712_v23 = vrot.slane %v2704_v4, %v13660_v25  ;;  %v2719_v17 = vrot.slane %v2705_v47, %v13660_v25  ;;  %11387 = vmatprep.mubr.msk.bf16.mxu1 %vm13007_vm2, %v13006_v56 }
 0x6bb   : > { %v2720_v20 = vcombine.low %v2696_v29, %v2712_v23  ;;  %v2721_v1 = vcombine.high %v2696_v29, %v2712_v23  ;;  %v2736_v24 = vcombine.low %v2703_v57, %v2719_v17  ;;  %v2737_v5 = vcombine.high %v2703_v57, %v2719_v17 }
 0x6bd   : > { %v2728_v61 = vrot.slane %v2720_v20, %v13663_v32  ;;  %v2735_v14 = vrot.slane %v2721_v1, %v13663_v32  ;;  %v2744_v48 = vrot.slane %v2736_v24, %v13663_v32  ;;  %v2751_v28 = vrot.slane %v2737_v5, %v13663_v32  ;;  %v12507_v45 = vpop.eup %12506 }
 0x6be   : > { %v4114_v13 = vmul.f32 %v12507_v45, %v14072_v10 }
 0x6bf   : > { %v3300_v15 = vcombine.low %v2728_v61, %v2735_v14  ;;  %v10503_v3 = vcombine.high %v2728_v61, %v2735_v14  ;;  %v3316_v55 = vcombine.low %v2744_v48, %v2751_v28  ;;  %v10504_v27 = vcombine.high %v2744_v48, %v2751_v28  ;;  %v11761_v48 = vld [vmem:[#allocation13] ss:$12 sps:$4 sm:$0xff]  }
 0x6c0   : > { %v4129_v6 = vpack.c.bf16 %v4114_v13, %v4114_v13 }
 0x6c1   : > { %v3307_v18 = vrot.slane %v3300_v15, %v13660_v25  ;;  %v3315_v50 = vrot.slane %v10503_v3, %v13660_v25  ;;  %v3323_v19 = vrot.slane %v3316_v55, %v13660_v25  ;;  %v3331_v60 = vrot.slane %v10504_v27, %v13660_v25  ;;  %v11765_v15 = vld [vmem:[#allocation13 + $0x1c] ss:$12 sps:$4 sm:$0x1f]   ;;  %v11767_v3 = vld [vmem:[#allocation13 + $0x18] ss:$12 sps:$4 sm:$0x1f]  }
 0x6c2   : > { %v11768_v27 = vld [vmem:[#allocation13 + $0x20] ss:$12 sps:$4 sm:$0x1f]  }
 0x6c3   : > { %v3332_v12 = vcombine.low %v3307_v18, %v3315_v50  ;;  %v3348_v16 = vcombine.low %v3323_v19, %v3331_v60  ;;  %v3333_v26 = vcombine.high %v3307_v18, %v3315_v50  ;;  %v3349_v30 = vcombine.high %v3323_v19, %v3331_v60  ;;  %v11771_v18 = vld [vmem:[#allocation13 + $0x34] ss:$12 sps:$4 sm:$0xff]   ;;  %v11769_v50 = vld [vmem:[#allocation13 + $0x30] ss:$12 sps:$4 sm:$0xff]  }
 0x6c4   : > { %v11773_v19 = vld [vmem:[#allocation13 + $0x4c] ss:$12 sps:$4 sm:$0x1f]  }
 0x6c5   : > { %v3340_v53 = vrot.slane %v3332_v12, %v13663_v32  ;;  %v3356_v59 = vrot.slane %v3348_v16, %v13663_v32  ;;  %v3347_v62 = vrot.slane %v3333_v26, %v13663_v32  ;;  %v3363_v49 = vrot.slane %v3349_v30, %v13663_v32  ;;  %v11763_v32 = vld [vmem:[#allocation13 + $0x4] ss:$12 sps:$4 sm:$0xff]   ;;  %v11775_v16 = vld [vmem:[#allocation13 + $0x48] ss:$12 sps:$4 sm:$0x1f]  }
 0x6c6   : > { %v11772_v12 = vld [vmem:[#allocation13 + $0x38] ss:$12 sps:$4 sm:$0xff]  }
 0x6c7   : > { %v3364_v54 = vcombine.low %v3340_v53, %v3356_v59  ;;  %v3365_v2 = vcombine.high %v3340_v53, %v3356_v59  ;;  %v3366_v21 = vcombine.low %v3347_v62, %v3363_v49  ;;  %v3367_v47 = vcombine.high %v3347_v62, %v3363_v49  ;;  %v11776_v53 = vld [vmem:[#allocation13 + $0x50] ss:$12 sps:$4 sm:$0x1f]  }
 0x6c8   : > { %v4949_v49 = vsel %vm4825_vm12, %v11775_v16, 0  ;;  %v4955_v45 = vsel %vm4825_vm12, %v11776_v53, 0  ;;  %v11803_v16 = vld [vmem:[#allocation13 + $0xf4] ss:$12 sps:$4 sm:$0xff]  }
 0x6c9   : > { %v3400_v43 = vpack.c.bf16 %v3364_v54, %v3364_v54  ;;  %v3401_v25 = vpack.c.bf16 %v3365_v2, %v3365_v2  ;;  %v3402_v35 = vpack.c.bf16 %v3366_v21, %v3366_v21  ;;  %v3403_v17 = vpack.c.bf16 %v3367_v47, %v3367_v47  ;;  %v11779_v54 = vld [vmem:[#allocation13 + $0x64] ss:$12 sps:$4 sm:$0xff]   ;;  %v11777_v2 = vld [vmem:[#allocation13 + $0x60] ss:$12 sps:$4 sm:$0xff]  }
 0x6ca   : > { %v11781_v21 = vld [vmem:[#allocation13 + $0x7c] ss:$12 sps:$4 sm:$0x1f]   ;;  %v11787_v47 = vld [vmem:[#allocation13 + $0x94] ss:$12 sps:$4 sm:$0xff]  }
 0x6cb   : > { %v4505_v38 = vsel %vm1650_vm1, %v3400_v43, 0  ;;  %v4551_v51 = vsel %vm1650_vm1, %v3401_v25, 0  ;;  %v4597_v4 = vsel %vm1650_vm1, %v3402_v35, 0  ;;  %v4643_v1 = vsel %vm1650_vm1, %v3403_v17, 0  ;;  %v11780_v43 = vld [vmem:[#allocation13 + $0x68] ss:$12 sps:$4 sm:$0xff]  }
 0x6cc   : > { %11380 = vmatpush3.bf16.msra.mxu0 %v4505_v38  ;;  %11386 = vmatpush3.bf16.msra.mxu1 %v4551_v51  ;;  %v11783_v25 = vld [vmem:[#allocation13 + $0x78] ss:$12 sps:$4 sm:$0x1f]   ;;  %v11784_v35 = vld [vmem:[#allocation13 + $0x80] ss:$12 sps:$4 sm:$0x1f]  }
 0x6cd   : > { %11391 = vmatprep.subr.bf16.mxu0 %v13006_v56  ;;  %11397 = vmatprep.subr.bf16.mxu1 %v13006_v56 }
 0x6cf   : > { %11382 = vmatmul.mubr.msk.bf16.vlgmr.msra.gmra.mrb[56].mxu0 %vm3988_vm10, %v4129_v6 }
 0x6d0   : > { %11392 = vmatpush3.bf16.msra.mxu0 %v4597_v4  ;;  %11393 = vmatprep.mubr.msk.bf16.mxu0 %vm13007_vm2, %v13006_v56  ;;  %v5071_v4 = vsel %vm4825_vm12, %v11783_v25, 0 }
 0x6d1   : > { %4835 = vmatprep.subr.bf16.mxu0 %v11763_v32 }
 0x6dd   : > { %v4090_v10 = vpop.xlane.xlu0 %4089 }
 0x6de   : > { %12508 = vrcp.f32 %v4090_v10  ;;  %v5077_v10 = vsel %vm4825_vm12, %v11784_v35, 0 }
 0x6e7   : > { %v4093_v42 = vpop.xlane.xlu1 %4092 }
 0x6e8   : > { %v4096_v29 = vpop.xlane.xlu0 %4095  ;;  %12510 = vrcp.f32 %v4093_v42  ;;  %v12509_v57 = vpop.eup %12508  ;;  %v11785_v42 = vld [vmem:[#allocation13 + $0x90] ss:$12 sps:$4 sm:$0xff]  }
 0x6e9   : > { %12512 = vrcp.f32 %v4096_v29  ;;  %v4116_v23 = vmul.f32 %v12509_v57, %v14081_v58  ;;  %v11764_v58 = vld [vmem:[#allocation13 + $0x8] ss:$12 sps:$4 sm:$0xff]   ;;  %v11788_v29 = vld [vmem:[#allocation13 + $0x98] ss:$12 sps:$4 sm:$0xff]  }
 0x6ea   : > { %v11789_v57 = vld [vmem:[#allocation13 + $0xac] ss:$12 sps:$4 sm:$0x1f]  }
 0x6eb   : > { %v4130_v20 = vpack.c.bf16 %v4116_v23, %v4116_v23 }
 0x6ed   : > { %11388 = vmatmul.mubr.msk.bf16.vlgmr.msra.gmra.mrb[44].mxu1 %vm3988_vm10, %v4130_v20  ;;  %v11791_v20 = vld [vmem:[#allocation13 + $0xa8] ss:$12 sps:$4 sm:$0x1f]  }
 0x6ee   : > { %11398 = vmatpush3.bf16.msra.mxu1 %v4643_v1  ;;  %11399 = vmatprep.mubr.msk.bf16.mxu1 %vm13007_vm2, %v13006_v56 }
 0x6ef   : > { %11403 = vmatprep.subr.bf16.mxu1 %v13006_v56 }
 0x6f2   : > { %v12511_v24 = vpop.eup %12510 }
 0x6f3   : > { %v12513_v5 = vpop.eup %12512  ;;  %v4118_v61 = vmul.f32 %v12511_v24, %v14085_v33  ;;  %v4827_v33 = vsel %vm4825_vm12, %v11767_v3, 0 }
 0x6f4   : > { %v4120_v14 = vmul.f32 %v12513_v5, %v14087_v52  ;;  %v4833_v52 = vsel %vm4825_vm12, %v11768_v27, 0  ;;  %v11793_v27 = vld [vmem:[#allocation13 + $0xc0] ss:$12 sps:$4 sm:$0xff]  }
 0x6f5   : > { %v4131_v28 = vpack.c.bf16 %v4118_v61, %v4118_v61  ;;  %v11792_v61 = vld [vmem:[#allocation13 + $0xb0] ss:$12 sps:$4 sm:$0x1f]  }
 0x6f6   : > { %v4132_v55 = vpack.c.bf16 %v4120_v14, %v4120_v14  ;;  %v5199_v3 = vsel %vm4825_vm12, %v11792_v61, 0 }
 0x6f7   : > { %11394 = vmatmul.mubr.msk.bf16.vlgmr.msra.gmra.mrb[60].mxu0 %vm3988_vm10, %v4131_v28 }
 0x6f8   : > { %11400 = vmatmul.mubr.msk.bf16.vlgmr.msra.gmra.mrb[48].mxu1 %vm3988_vm10, %v4132_v55  ;;  %4836 = vmatpush1.bf16.msra.mxu0 %v11761_v48  ;;  %v11795_v55 = vld [vmem:[#allocation13 + $0xc4] ss:$12 sps:$4 sm:$0xff]  }
 0x6f9   : > { %11404 = vmatpush3.bf16.msra.mxu1 %v11764_v58  ;;  %10536 = vmatprep.subr.msk.bf16.mxu0 %vm4825_vm12, %v11765_v15  ;;  %v5193_v15 = vsel %vm4825_vm12, %v11791_v20, 0 }
 0x6fa   : > { %11405 = vmatprep.subr.bf16.mxu1 %v13006_v56  ;;  %4867 = vmatprep.mubr.bf16.mxu0 %v12997_v7 }
 0x6fb   : > { %11407 = vmatprep.mubr.msk.bf16.mxu1 %vm13007_vm2, %v13006_v56 }
 0x6fc   : > { %4838 = vmatpush1.bf16.msra.mxu0 %v4827_v33  ;;  %v11796_v33 = vld [vmem:[#allocation13 + $0xc8] ss:$12 sps:$4 sm:$0xff]  }
 0x6fd   : > { %11406 = vmatpush3.bf16.msra.mxu1 %v4833_v52  ;;  %4957 = vmatprep.subr.bf16.mxu0 %v11771_v18  ;;  %v11797_v18 = vld [vmem:[#allocation13 + $0xdc] ss:$12 sps:$4 sm:$0x1f]  }
 0x6fe   : > { %11411 = vmatprep.subr.bf16.mxu1 %v13006_v56 }
 0x739   : > { %v4173_v60 = vpop.f32.mrb[40].mxu0 }
 0x73a   : > { %v4685_v26 = vpack.c.bf16 %v4173_v60, %v4173_v60  ;;  %v11335_v30 = vpop.f32.mrb[41].mxu0 }
 0x73b   : > { %v4176_v59 = vpop.f32.mrb[42].mxu0  ;;  %v11805_v30 = vld [vmem:[#allocation13 + $0x10c] ss:$12 sps:$4 sm:$0x1f]  }
 0x73c   : > { %v11336_v62 = vpop.f32.mrb[43].mxu0  ;;  %10537 = vmatmul.mubr.msk.bf16.vlgmr.msra.gmra.mrb[64].mxu0 %vm3404_vm4, %v4685_v26  ;;  %11408 = vmatmul.mubr.msk.bf16.vlgmr.msra.gmra.mrb[52].mxu1 %vm3404_vm4, %v4685_v26  ;;  %v11801_v26 = vld [vmem:[#allocation13 + $0xf0] ss:$12 sps:$4 sm:$0xff]   ;;  %v11804_v59 = vld [vmem:[#allocation13 + $0xf8] ss:$12 sps:$4 sm:$0xff]  }
 0x73d   : > { %4958 = vmatpush1.bf16.msra.mxu0 %v11769_v50  ;;  %11412 = vmatpush3.bf16.msra.mxu1 %v11772_v12  ;;  %v11799_v50 = vld [vmem:[#allocation13 + $0xd8] ss:$12 sps:$4 sm:$0x1f]   ;;  %v11807_v62 = vld [vmem:[#allocation13 + $0x108] ss:$12 sps:$4 sm:$0x1f]  }
 0x73e   : > { %10545 = vmatprep.subr.msk.bf16.mxu0 %vm4825_vm12, %v11773_v19  ;;  %11413 = vmatprep.subr.bf16.mxu1 %v13006_v56  ;;  %v11800_v19 = vld [vmem:[#allocation13 + $0xe0] ss:$12 sps:$4 sm:$0x1f]   ;;  %v5315_v60 = vsel %vm4825_vm12, %v11799_v50, 0  ;;  %v11827_v50 = vld [vmem:[#allocation13 + $0x184] ss:$12 sps:$4 sm:$0xff]  }
 0x73f   : > { %4989 = vmatprep.mubr.bf16.mxu0 %v12997_v7  ;;  %11415 = vmatprep.mubr.msk.bf16.mxu1 %vm13007_vm2, %v13006_v56  ;;  %v5321_v12 = vsel %vm4825_vm12, %v11800_v19, 0  ;;  %v11825_v19 = vld [vmem:[#allocation13 + $0x180] ss:$12 sps:$4 sm:$0xff]  }
 0x741   : > { %v4219_v13 = vpop.f32.mrb[28].mxu1  ;;  %4960 = vmatpush1.bf16.msra.mxu0 %v4949_v49  ;;  %11414 = vmatpush3.bf16.msra.mxu1 %v4955_v45 }
 0x742   : > { %v4686_v38 = vpack.c.bf16 %v4219_v13, %v4219_v13  ;;  %v11341_v51 = vpop.f32.mrb[29].mxu1  ;;  %5079 = vmatprep.subr.bf16.mxu0 %v11779_v54  ;;  %11419 = vmatprep.subr.bf16.mxu1 %v13006_v56  ;;  %v11808_v54 = vld [vmem:[#allocation13 + $0x110] ss:$12 sps:$4 sm:$0x1f]  }
 0x743   : > { %v4222_v6 = vpop.f32.mrb[30].mxu1  ;;  %v5437_v51 = vsel %vm4825_vm12, %v11807_v62, 0  ;;  %v5443_v35 = vsel %vm4825_vm12, %v11808_v54, 0  ;;  %v11835_v62 = vld [vmem:[#allocation13 + $0x1b4] ss:$12 sps:$4 sm:$0xff]  }
 0x744   : > { %v11342_v32 = vpop.f32.mrb[31].mxu1  ;;  %10546 = vmatmul.mubr.msk.bf16.vlgmr.msra.gmra.mrb[68].mxu0 %vm3404_vm4, %v4686_v38  ;;  %11416 = vmatmul.mubr.msk.bf16.vlgmr.msra.gmra.mrb[56].mxu1 %vm3404_vm4, %v4686_v38  ;;  %v11811_v6 = vld [vmem:[#allocation13 + $0x124] ss:$12 sps:$4 sm:$0xff]  }
 0x745   : > { %5080 = vmatpush1.bf16.msra.mxu0 %v11777_v2  ;;  %11420 = vmatpush3.bf16.msra.mxu1 %v11780_v43  ;;  %v11809_v32 = vld [vmem:[#allocation13 + $0x120] ss:$12 sps:$4 sm:$0xff]  }
 0x746   : > { %10554 = vmatprep.subr.msk.bf16.mxu0 %vm4825_vm12, %v11781_v21  ;;  %11421 = vmatprep.subr.bf16.mxu1 %v13006_v56 }
 0x747   : > { %5111 = vmatprep.mubr.bf16.mxu0 %v12997_v7  ;;  %11423 = vmatprep.mubr.msk.bf16.mxu1 %vm13007_vm2, %v13006_v56 }
 0x749   : > { %v4265_v23 = vpop.f32.mrb[44].mxu0  ;;  %v4311_v17 = vpop.f32.mrb[32].mxu1  ;;  %5082 = vmatpush1.bf16.msra.mxu0 %v5071_v4  ;;  %11422 = vmatpush3.bf16.msra.mxu1 %v5077_v10  ;;  %v11813_v4 = vld [vmem:[#allocation13 + $0x13c] ss:$12 sps:$4 sm:$0x1f]  }
 0x74a   : > { %v4687_v1 = vpack.c.bf16 %v4265_v23, %v4265_v23  ;;  %v11347_v24 = vpop.f32.mrb[45].mxu0  ;;  %v11353_v5 = vpop.f32.mrb[33].mxu1  ;;  %5201 = vmatprep.subr.bf16.mxu0 %v11787_v47  ;;  %11427 = vmatprep.subr.bf16.mxu1 %v13006_v56  ;;  %v4688_v52 = vpack.c.bf16 %v4311_v17, %v4311_v17  ;;  %v11812_v47 = vld [vmem:[#allocation13 + $0x128] ss:$12 sps:$4 sm:$0xff]  }
 0x74b   : > { %v4268_v14 = vpop.f32.mrb[46].mxu0  ;;  %v4314_v48 = vpop.f32.mrb[34].mxu1  ;;  %v11816_v23 = vld [vmem:[#allocation13 + $0x140] ss:$12 sps:$4 sm:$0x1f]  }
 0x74c   : > { %v11348_v58 = vpop.f32.mrb[47].mxu0  ;;  %v11354_v28 = vpop.f32.mrb[35].mxu1  ;;  %10555 = vmatmul.mubr.msk.bf16.vlgmr.msra.gmra.mrb[72].mxu0 %vm3404_vm4, %v4687_v1  ;;  %11424 = vmatmul.mubr.msk.bf16.vlgmr.msra.gmra.mrb[60].mxu1 %vm3404_vm4, %v4687_v1  ;;  %v5565_v61 = vsel %vm4825_vm12, %v11816_v23, 0  ;;  %v11819_v14 = vld [vmem:[#allocation13 + $0x154] ss:$12 sps:$4 sm:$0xff]  }
 0x74d   : > { %5202 = vmatpush1.bf16.msra.mxu0 %v11785_v42  ;;  %11428 = vmatpush3.bf16.msra.mxu1 %v11788_v29  ;;  %v11815_v42 = vld [vmem:[#allocation13 + $0x138] ss:$12 sps:$4 sm:$0x1f]   ;;  %v11817_v28 = vld [vmem:[#allocation13 + $0x150] ss:$12 sps:$4 sm:$0xff]  }
 0x74e   : > { %10563 = vmatprep.subr.msk.bf16.mxu0 %vm4825_vm12, %v11789_v57  ;;  %11429 = vmatprep.subr.bf16.mxu1 %v13006_v56  ;;  %v5559_v5 = vsel %vm4825_vm12, %v11815_v42, 0  ;;  %v11844_v42 = vld [vmem:[#allocation13 + $0x1e8] ss:$12 sps:$4 sm:$0xff]  }
 0x74f   : > { %5233 = vmatprep.mubr.bf16.mxu0 %v12997_v7  ;;  %11431 = vmatprep.mubr.msk.bf16.mxu1 %vm13007_vm2, %v13006_v56 }
 0x751   : > { %5204 = vmatpush1.bf16.msra.mxu0 %v5193_v15  ;;  %11430 = vmatpush3.bf16.msra.mxu1 %v5199_v3  ;;  %v11820_v15 = vld [vmem:[#allocation13 + $0x158] ss:$12 sps:$4 sm:$0xff]  }
 0x752   : > { %5323 = vmatprep.subr.bf16.mxu0 %v11795_v55  ;;  %11435 = vmatprep.subr.bf16.mxu1 %v13006_v56  ;;  %v11821_v3 = vld [vmem:[#allocation13 + $0x16c] ss:$12 sps:$4 sm:$0x1f]  }
 0x754   : > { %10564 = vmatmul.mubr.msk.bf16.vlgmr.msra.gmra.mrb[76].mxu0 %vm3404_vm4, %v4688_v52  ;;  %11432 = vmatmul.mubr.msk.bf16.vlgmr.msra.gmra.mrb[64].mxu1 %vm3404_vm4, %v4688_v52 }
 0x755   : > { %5324 = vmatpush1.bf16.msra.mxu0 %v11793_v27  ;;  %11436 = vmatpush3.bf16.msra.mxu1 %v11796_v33  ;;  %v11823_v27 = vld [vmem:[#allocation13 + $0x168] ss:$12 sps:$4 sm:$0x1f]   ;;  %v11824_v33 = vld [vmem:[#allocation13 + $0x170] ss:$12 sps:$4 sm:$0x1f]  }
 0x756   : > { %10572 = vmatprep.subr.msk.bf16.mxu0 %vm4825_vm12, %v11797_v18  ;;  %11437 = vmatprep.subr.bf16.mxu1 %v13006_v56  ;;  %v5681_v18 = vsel %vm4825_vm12, %v11823_v27, 0  ;;  %v5687_v52 = vsel %vm4825_vm12, %v11824_v33, 0  ;;  %v11856_v33 = vld [vmem:[#allocation13 + $0x230] ss:$12 sps:$4 sm:$0x1f]  }
 0x757   : > { %5355 = vmatprep.mubr.bf16.mxu0 %v12997_v7  ;;  %11439 = vmatprep.mubr.msk.bf16.mxu1 %vm13007_vm2, %v13006_v56 }
 0x759   : > { %5326 = vmatpush1.bf16.msra.mxu0 %v5315_v60  ;;  %11438 = vmatpush3.bf16.msra.mxu1 %v5321_v12  ;;  %v11828_v60 = vld [vmem:[#allocation13 + $0x188] ss:$12 sps:$4 sm:$0xff]  }
 0x75a   : > { %5445 = vmatprep.subr.bf16.mxu0 %v11803_v16  ;;  %11443 = vmatprep.subr.bf16.mxu1 %v13006_v56  ;;  %v11829_v12 = vld [vmem:[#allocation13 + $0x19c] ss:$12 sps:$4 sm:$0x1f]  }
 0x77f   : > { %v4357_v53 = vpop.f32.mrb[48].mxu0 }
 0x780   : > { %v4689_v49 = vpack.c.bf16 %v4357_v53, %v4357_v53  ;;  %v11359_v45 = vpop.f32.mrb[49].mxu0 }
 0x781   : > { %v4403_v2 = vpop.f32.mrb[36].mxu1  ;;  %v4360_v21 = vpop.f32.mrb[50].mxu0  ;;  %v11837_v45 = vld [vmem:[#allocation13 + $0x1cc] ss:$12 sps:$4 sm:$0x1f]  }
 0x782   : > { %v11365_v13 = vpop.f32.mrb[37].mxu1  ;;  %v11360_v43 = vpop.f32.mrb[51].mxu0  ;;  %10573 = vmatmul.mubr.msk.bf16.vlgmr.msra.gmra.mrb[80].mxu0 %vm3404_vm4, %v4689_v49  ;;  %11440 = vmatmul.mubr.msk.bf16.vlgmr.msra.gmra.mrb[68].mxu1 %vm3404_vm4, %v4689_v49  ;;  %v4690_v29 = vpack.c.bf16 %v4403_v2, %v4403_v2  ;;  %v11833_v49 = vld [vmem:[#allocation13 + $0x1b0] ss:$12 sps:$4 sm:$0xff]   ;;  %v11836_v2 = vld [vmem:[#allocation13 + $0x1b8] ss:$12 sps:$4 sm:$0xff]  }
 0x783   : > { %v4406_v25 = vpop.f32.mrb[38].mxu1  ;;  %5446 = vmatpush1.bf16.msra.mxu0 %v11801_v26  ;;  %11444 = vmatpush3.bf16.msra.mxu1 %v11804_v59  ;;  %v11831_v26 = vld [vmem:[#allocation13 + $0x198] ss:$12 sps:$4 sm:$0x1f]  }
 0x784   : > { %v11366_v38 = vpop.f32.mrb[39].mxu1  ;;  %10581 = vmatprep.subr.msk.bf16.mxu0 %vm4825_vm12, %v11805_v30  ;;  %11445 = vmatprep.subr.bf16.mxu1 %v13006_v56  ;;  %v11832_v30 = vld [vmem:[#allocation13 + $0x1a0] ss:$12 sps:$4 sm:$0x1f]   ;;  %v5803_v53 = vsel %vm4825_vm12, %v11831_v26, 0 }
 0x785   : > { %5477 = vmatprep.mubr.bf16.mxu0 %v12997_v7  ;;  %11447 = vmatprep.mubr.msk.bf16.mxu1 %vm13007_vm2, %v13006_v56  ;;  %v5809_v59 = vsel %vm4825_vm12, %v11832_v30, 0  ;;  %v11839_v21 = vld [vmem:[#allocation13 + $0x1c8] ss:$12 sps:$4 sm:$0x1f]  }
 0x786   : > { %v11840_v25 = vld [vmem:[#allocation13 + $0x1d0] ss:$12 sps:$4 sm:$0x1f]  }
 0x787   : > { %v4449_v10 = vpop.f32.mrb[52].mxu0  ;;  %5448 = vmatpush1.bf16.msra.mxu0 %v5437_v51  ;;  %11446 = vmatpush3.bf16.msra.mxu1 %v5443_v35  ;;  %v5925_v35 = vsel %vm4825_vm12, %v11839_v21, 0 }
 0x788   : > { %v11371_v57 = vpop.f32.mrb[53].mxu0  ;;  %5567 = vmatprep.subr.bf16.mxu0 %v11811_v6  ;;  %11451 = vmatprep.subr.bf16.mxu1 %v13006_v56  ;;  %v4691_v55 = vpack.c.bf16 %v4449_v10, %v4449_v10  ;;  %v5931_v6 = vsel %vm4825_vm12, %v11840_v25, 0  ;;  %v11845_v10 = vld [vmem:[#allocation13 + $0x1fc] ss:$12 sps:$4 sm:$0x1f]  }
 0x789   : > { %v4452_v17 = vpop.f32.mrb[54].mxu0 }
 0x78a   : > { %v11372_v20 = vpop.f32.mrb[55].mxu0  ;;  %10582 = vmatmul.mubr.msk.bf16.vlgmr.msra.gmra.mrb[84].mxu0 %vm3404_vm4, %v4690_v29  ;;  %11448 = vmatmul.mubr.msk.bf16.vlgmr.msra.gmra.mrb[72].mxu1 %vm3404_vm4, %v4690_v29  ;;  %v11847_v29 = vld [vmem:[#allocation13 + $0x1f8] ss:$12 sps:$4 sm:$0x1f]  }
 0x78b   : > { %v4495_v1 = vpop.f32.mrb[40].mxu1  ;;  %5568 = vmatpush1.bf16.msra.mxu0 %v11809_v32  ;;  %11452 = vmatpush3.bf16.msra.mxu1 %v11812_v47  ;;  %v11843_v32 = vld [vmem:[#allocation13 + $0x1e4] ss:$12 sps:$4 sm:$0xff]   ;;  %v11848_v17 = vld [vmem:[#allocation13 + $0x200] ss:$12 sps:$4 sm:$0x1f]  }
 0x78c   : > { %v11377_v24 = vpop.f32.mrb[41].mxu1  ;;  %10590 = vmatprep.subr.msk.bf16.mxu0 %vm4825_vm12, %v11813_v4  ;;  %11453 = vmatprep.subr.bf16.mxu1 %v13006_v56  ;;  %v4692_v16 = vpack.c.bf16 %v4495_v1, %v4495_v1  ;;  %v11841_v4 = vld [vmem:[#allocation13 + $0x1e0] ss:$12 sps:$4 sm:$0xff]  }
 0x78d   : > { %v4498_v48 = vpop.f32.mrb[42].mxu1  ;;  %5599 = vmatprep.mubr.bf16.mxu0 %v12997_v7  ;;  %11455 = vmatprep.mubr.msk.bf16.mxu1 %vm13007_vm2, %v13006_v56  ;;  %v6047_v24 = vsel %vm4825_vm12, %v11847_v29, 0 }
 0x78e   : > { %v11378_v58 = vpop.f32.mrb[43].mxu1  ;;  %v11853_v48 = vld [vmem:[#allocation13 + $0x22c] ss:$12 sps:$4 sm:$0x1f]  }
 0x78f   : > { %5570 = vmatpush1.bf16.msra.mxu0 %v5559_v5  ;;  %11454 = vmatpush3.bf16.msra.mxu1 %v5565_v61  ;;  %v6053_v5 = vsel %vm4825_vm12, %v11848_v17, 0  ;;  %v11851_v61 = vld [vmem:[#allocation13 + $0x214] ss:$12 sps:$4 sm:$0xff]  }
 0x790   : > { %5689 = vmatprep.subr.bf16.mxu0 %v11819_v14  ;;  %11459 = vmatprep.subr.bf16.mxu1 %v13006_v56  ;;  %v11849_v14 = vld [vmem:[#allocation13 + $0x210] ss:$12 sps:$4 sm:$0xff]  }
 0x792   : > { %10591 = vmatmul.mubr.msk.bf16.vlgmr.msra.gmra.mrb[88].mxu0 %vm3404_vm4, %v4691_v55  ;;  %11456 = vmatmul.mubr.msk.bf16.vlgmr.msra.gmra.mrb[76].mxu1 %vm3404_vm4, %v4691_v55 }
 0x793   : > { %5690 = vmatpush1.bf16.msra.mxu0 %v11817_v28  ;;  %11460 = vmatpush3.bf16.msra.mxu1 %v11820_v15  ;;  %v11852_v28 = vld [vmem:[#allocation13 + $0x218] ss:$12 sps:$4 sm:$0xff]   ;;  %v11855_v15 = vld [vmem:[#allocation13 + $0x228] ss:$12 sps:$4 sm:$0x1f]  }
 0x794   : > { %10599 = vmatprep.subr.msk.bf16.mxu0 %vm4825_vm12, %v11821_v3  ;;  %11461 = vmatprep.subr.bf16.mxu1 %v13006_v56 }
 0x795   : > { %5721 = vmatprep.mubr.bf16.mxu0 %v12997_v7  ;;  %11463 = vmatprep.mubr.msk.bf16.mxu1 %vm13007_vm2, %v13006_v56 }
 0x797   : > { %5692 = vmatpush1.bf16.msra.mxu0 %v5681_v18  ;;  %11462 = vmatpush3.bf16.msra.mxu1 %v5687_v52 }
 0x798   : > { %5811 = vmatprep.subr.bf16.mxu0 %v11827_v50  ;;  %11467 = vmatprep.subr.bf16.mxu1 %v13006_v56 }
 0x79a   : > { %10600 = vmatmul.mubr.msk.bf16.vlgmr.msra.gmra.mrb[92].mxu0 %vm3404_vm4, %v4692_v16  ;;  %11464 = vmatmul.mubr.msk.bf16.vlgmr.msra.gmra.mrb[80].mxu1 %vm3404_vm4, %v4692_v16  ;;  %v6175_v16 = vsel %vm4825_vm12, %v11856_v33, 0 }
 0x79b   : > { %5812 = vmatpush1.bf16.msra.mxu0 %v11825_v19  ;;  %11468 = vmatpush3.bf16.msra.mxu1 %v11828_v60 }
 0x79c   : > { %10608 = vmatprep.subr.msk.bf16.mxu0 %vm4825_vm12, %v11829_v12  ;;  %11469 = vmatprep.subr.bf16.mxu1 %v13006_v56  ;;  %v6169_v12 = vsel %vm4825_vm12, %v11855_v15, 0 }
 0x79d   : > { %5843 = vmatprep.mubr.bf16.mxu0 %v12997_v7  ;;  %11471 = vmatprep.mubr.msk.bf16.mxu1 %vm13007_vm2, %v13006_v56 }
 0x79f   : > { %5814 = vmatpush1.bf16.msra.mxu0 %v5803_v53  ;;  %11470 = vmatpush3.bf16.msra.mxu1 %v5809_v59 }
 0x7a0   : > { %5933 = vmatprep.subr.bf16.mxu0 %v11835_v62  ;;  %11475 = vmatprep.subr.bf16.mxu1 %v13006_v56 }
 0x7a2   : > { %v4541_v54 = vpop.f32.mrb[56].mxu0 }
 0x7a3   : > { %v4693_v13 = vpack.c.bf16 %v4541_v54, %v4541_v54  ;;  %v11383_v43 = vpop.f32.mrb[57].mxu0 }
 0x7a4   : > { %v4544_v38 = vpop.f32.mrb[58].mxu0 }
 0x7a5   : > { %v11384_v51 = vpop.f32.mrb[59].mxu0  ;;  %10609 = vmatmul.mubr.msk.bf16.vlgmr.msra.gmra.mrb[96].mxu0 %vm3404_vm4, %v4693_v13  ;;  %11472 = vmatmul.mubr.msk.bf16.vlgmr.msra.gmra.mrb[84].mxu1 %vm3404_vm4, %v4693_v13 }
 0x7a6   : > { %5934 = vmatpush1.bf16.msra.mxu0 %v11833_v49  ;;  %11476 = vmatpush3.bf16.msra.mxu1 %v11836_v2 }
 0x7a7   : > { %10617 = vmatprep.subr.msk.bf16.mxu0 %vm4825_vm12, %v11837_v45  ;;  %11477 = vmatprep.subr.bf16.mxu1 %v13006_v56 }
 0x7a8   : > { %5965 = vmatprep.mubr.bf16.mxu0 %v12997_v7  ;;  %11479 = vmatprep.mubr.msk.bf16.mxu1 %vm13007_vm2, %v13006_v56 }
 0x7aa   : > { %5936 = vmatpush1.bf16.msra.mxu0 %v5925_v35  ;;  %11478 = vmatpush3.bf16.msra.mxu1 %v5931_v6 }
 0x7ab   : > { %6055 = vmatprep.subr.bf16.mxu0 %v11843_v32  ;;  %11483 = vmatprep.subr.bf16.mxu1 %v13006_v56 }
 0x7c0   : > { %v4587_v47 = vpop.f32.mrb[44].mxu1 }
 0x7c1   : > { %v4694_v57 = vpack.c.bf16 %v4587_v47, %v4587_v47  ;;  %v11389_v23 = vpop.f32.mrb[45].mxu1 }
 0x7c2   : > { %v4590_v20 = vpop.f32.mrb[46].mxu1 }
 0x7c3   : > { %v11390_v1 = vpop.f32.mrb[47].mxu1  ;;  %10618 = vmatmul.mubr.msk.bf16.vlgmr.msra.gmra.mrb[100].mxu0 %vm3404_vm4, %v4694_v57  ;;  %11480 = vmatmul.mubr.msk.bf16.vlgmr.msra.gmra.mrb[88].mxu1 %vm3404_vm4, %v4694_v57 }
 0x7c4   : > { %6056 = vmatpush1.bf16.msra.mxu0 %v11841_v4  ;;  %11484 = vmatpush3.bf16.msra.mxu1 %v11844_v42 }
 0x7c5   : > { %10626 = vmatprep.subr.msk.bf16.mxu0 %vm4825_vm12, %v11845_v10  ;;  %11485 = vmatprep.subr.bf16.mxu1 %v13006_v56 }
 0x7c6   : > { %6087 = vmatprep.mubr.bf16.mxu0 %v12997_v7  ;;  %11487 = vmatprep.mubr.msk.bf16.mxu1 %vm13007_vm2, %v13006_v56 }
 0x7c8   : > { %6058 = vmatpush1.bf16.msra.mxu0 %v6047_v24  ;;  %11486 = vmatpush3.bf16.msra.mxu1 %v6053_v5 }
 0x7c9   : > { %6177 = vmatprep.subr.bf16.mxu0 %v11851_v61  ;;  %11491 = vmatprep.subr.bf16.mxu1 %v13006_v56 }
 0x7ca   : > { %v4633_v58 = vpop.f32.mrb[60].mxu0 }
 0x7cb   : > { %v4695_v3 = vpack.c.bf16 %v4633_v58, %v4633_v58  ;;  %v11395_v55 = vpop.f32.mrb[61].mxu0  ;;  %v4679_v27 = vpop.f32.mrb[48].mxu1 }
 0x7cc   : > { %v4636_v18 = vpop.f32.mrb[62].mxu0  ;;  %v11401_v52 = vpop.f32.mrb[49].mxu1  ;;  %v4696_v26 = vpack.c.bf16 %v4679_v27, %v4679_v27 }
 0x7cd   : > { %v11396_v50 = vpop.f32.mrb[63].mxu0  ;;  %v4682_v19 = vpop.f32.mrb[50].mxu1  ;;  %10627 = vmatmul.mubr.msk.bf16.vlgmr.msra.gmra.mrb[104].mxu0 %vm3404_vm4, %v4695_v3  ;;  %11488 = vmatmul.mubr.msk.bf16.vlgmr.msra.gmra.mrb[92].mxu1 %vm3404_vm4, %v4695_v3 }
 0x7ce   : > { %v11402_v60 = vpop.f32.mrb[51].mxu1  ;;  %6178 = vmatpush1.bf16.msra.mxu0 %v11849_v14  ;;  %11492 = vmatpush3.bf16.msra.mxu1 %v11852_v28 }
 0x7cf   : > { %10635 = vmatprep.subr.msk.bf16.mxu0 %vm4825_vm12, %v11853_v48  ;;  %11493 = vmatprep.subr.bf16.mxu1 %v13006_v56 }
 0x7d0   : > { %6209 = vmatprep.mubr.bf16.mxu0 %v12997_v7  ;;  %11495 = vmatprep.mubr.msk.bf16.mxu1 %vm13007_vm2, %v13006_v56 }
 0x7d2   : > { %6180 = vmatpush1.bf16.msra.mxu0 %v6169_v12  ;;  %11494 = vmatpush3.bf16.msra.mxu1 %v6175_v16 }
 0x7d5   : > { %10636 = vmatmul.mubr.msk.bf16.vlgmr.msra.gmra.mrb[108].mxu0 %vm3404_vm4, %v4696_v26  ;;  %11496 = vmatmul.mubr.msk.bf16.vlgmr.msra.gmra.mrb[96].mxu1 %vm3404_vm4, %v4696_v26 }
 0x80f   : > { %v4869_v30 = vpop.f32.mrb[64].mxu0  ;;  %v4910_v53 = vpop.f32.mrb[52].mxu1 }
 0x810   : > { %v4871_v59 = vpop.f32.mrb[65].mxu0  ;;  %v11409_v62 = vpop.f32.mrb[53].mxu1  ;;  %v6280_v43 = vsel %vm604_vm0, %v4910_v53, 0.0 }
 0x811   : > { %v4873_v49 = vpop.f32.mrb[66].mxu0  ;;  %v4913_v45 = vpop.f32.mrb[54].mxu1 }
 0x812   : > { %v4874_v54 = vpop.f32.mrb[67].mxu0  ;;  %v11410_v2 = vpop.f32.mrb[55].mxu1 }
 0x817   : > { %v4991_v21 = vpop.f32.mrb[68].mxu0  ;;  %v5032_v13 = vpop.f32.mrb[56].mxu1 }
 0x818   : > { %v6258_v56 = vadd.f32 %v4991_v21, %v4869_v30  ;;  %v6281_v25 = vsel %vm604_vm0, %v5032_v13, 0.0  ;;  %v4993_v38 = vpop.f32.mrb[69].mxu0  ;;  %v11417_v51 = vpop.f32.mrb[57].mxu1 }
 0x819   : > { %v6282_v35 = vadd.f32 %v6281_v25, %v6280_v43  ;;  %v6269_v6 = vadd.f32 %v4993_v38, %v4871_v59  ;;  %v4995_v32 = vpop.f32.mrb[70].mxu0  ;;  %v5035_v4 = vpop.f32.mrb[58].mxu1 }
 0x81a   : > { %v4996_v10 = vpop.f32.mrb[71].mxu0  ;;  %v11418_v47 = vpop.f32.mrb[59].mxu1 }
 0x81f   : > { %v5113_v42 = vpop.f32.mrb[72].mxu0  ;;  %v5154_v29 = vpop.f32.mrb[60].mxu1 }
 0x820   : > { %v6259_v57 = vadd.f32 %v6258_v56, %v5113_v42  ;;  %v6283_v23 = vsel %vm604_vm0, %v5154_v29, 0.0  ;;  %v5115_v17 = vpop.f32.mrb[73].mxu0  ;;  %v11425_v20 = vpop.f32.mrb[61].mxu1 }
 0x821   : > { %v6284_v1 = vadd.f32 %v6283_v23, %v6282_v35  ;;  %v6270_v24 = vadd.f32 %v6269_v6, %v5115_v17  ;;  %v5117_v5 = vpop.f32.mrb[74].mxu0  ;;  %v5157_v61 = vpop.f32.mrb[62].mxu1 }
 0x822   : > { %v5118_v14 = vpop.f32.mrb[75].mxu0  ;;  %v11426_v48 = vpop.f32.mrb[63].mxu1 }
 0x827   : > { %v5235_v58 = vpop.f32.mrb[76].mxu0  ;;  %v5276_v28 = vpop.f32.mrb[64].mxu1 }
 0x828   : > { %v6260_v15 = vadd.f32 %v6259_v57, %v5235_v58  ;;  %v6285_v3 = vsel %vm604_vm0, %v5276_v28, 0.0  ;;  %v5237_v55 = vpop.f32.mrb[77].mxu0  ;;  %v11433_v27 = vpop.f32.mrb[65].mxu1 }
 0x829   : > { %v6286_v33 = vadd.f32 %v6285_v3, %v6284_v1  ;;  %v6271_v18 = vadd.f32 %v6270_v24, %v5237_v55  ;;  %v5239_v52 = vpop.f32.mrb[78].mxu0  ;;  %v5279_v50 = vpop.f32.mrb[66].mxu1 }
 0x82a   : > { %v5240_v19 = vpop.f32.mrb[79].mxu0  ;;  %v11434_v60 = vpop.f32.mrb[67].mxu1 }
 0x855   : > { %v5357_v12 = vpop.f32.mrb[80].mxu0  ;;  %v5398_v16 = vpop.f32.mrb[68].mxu1 }
 0x856   : > { %v6261_v26 = vadd.f32 %v6260_v15, %v5357_v12  ;;  %v6287_v30 = vsel %vm604_vm0, %v5398_v16, 0.0  ;;  %v5359_v53 = vpop.f32.mrb[81].mxu0  ;;  %v11441_v59 = vpop.f32.mrb[69].mxu1 }
 0x857   : > { %v6288_v62 = vadd.f32 %v6287_v30, %v6286_v33  ;;  %v6272_v49 = vadd.f32 %v6271_v18, %v5359_v53  ;;  %v5361_v45 = vpop.f32.mrb[82].mxu0  ;;  %v5401_v54 = vpop.f32.mrb[70].mxu1 }
 0x858   : > { %v5362_v2 = vpop.f32.mrb[83].mxu0  ;;  %v11442_v21 = vpop.f32.mrb[71].mxu1 }
 0x85d   : > { %v5479_v13 = vpop.f32.mrb[84].mxu0  ;;  %v5520_v43 = vpop.f32.mrb[72].mxu1 }
 0x85e   : > { %v6262_v56 = vadd.f32 %v6261_v26, %v5479_v13  ;;  %v6289_v25 = vsel %vm604_vm0, %v5520_v43, 0.0  ;;  %v5481_v38 = vpop.f32.mrb[85].mxu0  ;;  %v11449_v51 = vpop.f32.mrb[73].mxu1 }
 0x85f   : > { %v6290_v35 = vadd.f32 %v6289_v25, %v6288_v62  ;;  %v6273_v6 = vadd.f32 %v6272_v49, %v5481_v38  ;;  %v5483_v32 = vpop.f32.mrb[86].mxu0  ;;  %v5523_v4 = vpop.f32.mrb[74].mxu1 }
 0x860   : > { %v5484_v10 = vpop.f32.mrb[87].mxu0  ;;  %v11450_v47 = vpop.f32.mrb[75].mxu1 }
 0x865   : > { %v5601_v42 = vpop.f32.mrb[88].mxu0  ;;  %v5642_v29 = vpop.f32.mrb[76].mxu1 }
 0x866   : > { %v6263_v57 = vadd.f32 %v6262_v56, %v5601_v42  ;;  %v6291_v23 = vsel %vm604_vm0, %v5642_v29, 0.0  ;;  %v5603_v17 = vpop.f32.mrb[89].mxu0  ;;  %v11457_v20 = vpop.f32.mrb[77].mxu1 }
 0x867   : > { %v6292_v1 = vadd.f32 %v6291_v23, %v6290_v35  ;;  %v6274_v24 = vadd.f32 %v6273_v6, %v5603_v17  ;;  %v5605_v5 = vpop.f32.mrb[90].mxu0  ;;  %v5645_v61 = vpop.f32.mrb[78].mxu1 }
 0x868   : > { %v5606_v14 = vpop.f32.mrb[91].mxu0  ;;  %v11458_v48 = vpop.f32.mrb[79].mxu1 }
 0x86d   : > { %v5723_v58 = vpop.f32.mrb[92].mxu0  ;;  %v5764_v28 = vpop.f32.mrb[80].mxu1 }
 0x86e   : > { %v6264_v15 = vadd.f32 %v6263_v57, %v5723_v58  ;;  %v6293_v3 = vsel %vm604_vm0, %v5764_v28, 0.0  ;;  %v5725_v55 = vpop.f32.mrb[93].mxu0  ;;  %v11465_v27 = vpop.f32.mrb[81].mxu1  ;;  %v6303_v58 = vld [vmem:[#allocation14] sm:$0x7] }
 0x86f   : > { %v6294_v33 = vadd.f32 %v6293_v3, %v6292_v1  ;;  %v6275_v18 = vadd.f32 %v6274_v24, %v5725_v55  ;;  %v5727_v52 = vpop.f32.mrb[94].mxu0  ;;  %v5767_v50 = vpop.f32.mrb[82].mxu1  ;;  %v6308_v28 = vrot.slane %v6303_v58, %v13541_v37  ;;  %v6316_v55 = vrot.slane %v6303_v58, %v13566_v31 }
 0x870   : > { %v5728_v19 = vpop.f32.mrb[95].mxu0  ;;  %v11466_v60 = vpop.f32.mrb[83].mxu1  ;;  %v6312_v27 = vrot.slane %v6303_v58, %v13538_v36  ;;  %v11889_v58 = vld [vmem:[#allocation16 + $0x194] ss:$40 sps:$4 sm:$0xff]  }
 0x878   : > { %v5845_v12 = vpop.f32.mrb[96].mxu0  ;;  %v5886_v16 = vpop.f32.mrb[84].mxu1 }
 0x879   : > { %v6265_v26 = vadd.f32 %v6264_v15, %v5845_v12  ;;  %v6295_v30 = vsel %vm604_vm0, %v5886_v16, 0.0  ;;  %v5847_v53 = vpop.f32.mrb[97].mxu0  ;;  %v11473_v59 = vpop.f32.mrb[85].mxu1 }
 0x87a   : > { %v6296_v62 = vadd.f32 %v6295_v30, %v6294_v33  ;;  %v6276_v49 = vadd.f32 %v6275_v18, %v5847_v53  ;;  %v5849_v45 = vpop.f32.mrb[98].mxu0  ;;  %v5889_v54 = vpop.f32.mrb[86].mxu1 }
 0x87b   : > { %v5850_v2 = vpop.f32.mrb[99].mxu0  ;;  %v11474_v21 = vpop.f32.mrb[87].mxu1  ;;  %v12541_v54 = vld [vmem:[%s13479_s16 + $0x10] sm:$0xff] }
 0x87c   : > { %v12542_v21 = vld [vmem:[%s13479_s16 + $0x8] sm:$0xff] }
 0x896   : > { %v5967_v13 = vpop.f32.mrb[100].mxu0  ;;  %v6008_v43 = vpop.f32.mrb[88].mxu1 }
 0x897   : > { %v6266_v56 = vadd.f32 %v6265_v26, %v5967_v13  ;;  %v6297_v25 = vsel %vm604_vm0, %v6008_v43, 0.0  ;;  %v5969_v38 = vpop.f32.mrb[101].mxu0  ;;  %v11481_v51 = vpop.f32.mrb[89].mxu1 }
 0x898   : > { %v6298_v35 = vadd.f32 %v6297_v25, %v6296_v62  ;;  %v6277_v6 = vadd.f32 %v6276_v49, %v5969_v38  ;;  %v5971_v32 = vpop.f32.mrb[102].mxu0  ;;  %v6011_v4 = vpop.f32.mrb[90].mxu1  ;;  %v12540_v49 = vld [vmem:[%s13479_s16] sm:$0xff]  ;;  %v11859_v51 = vld [vmem:[#allocation16 + $0x4] ss:$40 sps:$4 sm:$0xff]   ;;  %s14482_s16 = scalar_lea.vmem [#allocation22], %s11553_s17 }
 0x899   : > { %v5972_v10 = vpop.f32.mrb[103].mxu0  ;;  %v11482_v47 = vpop.f32.mrb[91].mxu1  ;;  %v11857_v38 = vld [vmem:[#allocation16] ss:$40 sps:$4 sm:$0xff]   ;;  %v11865_v32 = vld [vmem:[#allocation16 + $0x54] ss:$40 sps:$4 sm:$0xff]   ;;  %7615 = vmatprep.subr.bf16.mxu0 %v11859_v51 }
 0x89a   : > { %v11868_v4 = vld [vmem:[#allocation16 + $0x5c] ss:$40 sps:$4 sm:$0xff]   ;;  %7616 = vmatpush1.bf16.msra.mxu0 %v11857_v38  ;;  %v11863_v10 = vld [vmem:[#allocation16 + $0x50] ss:$40 sps:$4 sm:$0xff]   ;;  %s11554_s17 = smul.u32 384, %s13124_s27  ;;  %s10092_s4 = sshll.u32 %s14482_s16, 4  ;;  %s14495_s4 = int_to_ptr.vmem [resolvable:$true] %s10092_s4 }
 0x89b   : > { %7617 = vmatprep.subr.bf16.mxu0 %v11865_v32  ;;  %v11866_v47 = vld [vmem:[#allocation16 + $0x58] ss:$40 sps:$4 sm:$0xff]   ;;  %s10078_s27 = scalar_lea.sflag [#allocation4], %s13473_s30  ;;  %s12883_s5 = scalar_lea.vmem %s14495_s4, 384 }
 0x89c   : > { %s14493_s29 = scalar_lea.hbm %s14601_s15, %s11554_s17  ;;  %p12884_p0 = scmp.ne.s32.totalorder %s14495_s4, %s12883_s5 }
 0x89d   : > { %p12890_p9 = scmp.lt.s32.totalorder %s14495_s4, %s12888_s2  ;;  %p12891_p4 = scmp.lt.s32.totalorder %s12889_s3, %s12883_s5 }
 0x89e   : > { %7618 = vmatpush1.bf16.msra.mxu0 %v11863_v10  ;;  %p12885_p12 = pnand %p12884_p0, %p14602_p5 }
 0x89f   : > { %p12892_p13 = por %p12891_p4, %p12890_p9 }
 0x8a0   : > { %v6089_v42 = vpop.f32.mrb[104].mxu0  ;;  %v6130_v29 = vpop.f32.mrb[92].mxu1  ;;  %p12886_p8 = pneg %p12885_p12 }
 0x8a1   : > { %v6267_v57 = vadd.f32 %v6266_v56, %v6089_v42  ;;  %v6299_v23 = vsel %vm604_vm0, %v6130_v29, 0.0  ;;  %v6091_v17 = vpop.f32.mrb[105].mxu0  ;;  %v11489_v20 = vpop.f32.mrb[93].mxu1  ;;  %v11871_v42 = vld [vmem:[#allocation16 + $0xa4] ss:$40 sps:$4 sm:$0xff]  }
 0x8a2   : > { %v6300_v1 = vadd.f32 %v6299_v23, %v6298_v35  ;;  %v6278_v24 = vadd.f32 %v6277_v6, %v6091_v17  ;;  %v6093_v5 = vpop.f32.mrb[106].mxu0  ;;  %v6133_v61 = vpop.f32.mrb[94].mxu1  ;;  %v11860_v35 = vld [vmem:[#allocation16 + $0x8] ss:$40 sps:$4 sm:$0xff]   ;;  %v11862_v6 = vld [vmem:[#allocation16 + $0xc] ss:$40 sps:$4 sm:$0xff]   ;;  %7619 = vmatprep.subr.bf16.mxu0 %v11871_v42  ;;  %p12893_p1 = pnand %p12892_p13, %p12886_p8 }
 0x8a3   : > { %v6094_v14 = vpop.f32.mrb[107].mxu0  ;;  %v11490_v48 = vpop.f32.mrb[95].mxu1  ;;  %7697 = vmatprep.subr.bf16.mxu1 %v11862_v6  ;;  %v11874_v29 = vld [vmem:[#allocation16 + $0xac] ss:$40 sps:$4 sm:$0xff]   ;;  %v11872_v23 = vld [vmem:[#allocation16 + $0xa8] ss:$40 sps:$4 sm:$0xff]  }
 0x8a4   : > { %7698 = vmatpush1.bf16.msra.mxu1 %v11860_v35  ;;  %v11877_v17 = vld [vmem:[#allocation16 + $0xf4] ss:$40 sps:$4 sm:$0xff]   ;;  %v11883_v5 = vld [vmem:[#allocation16 + $0x144] ss:$40 sps:$4 sm:$0xff]   ;;  %v11881_v14 = vld [vmem:[#allocation16 + $0x140] ss:$40 sps:$4 sm:$0xff]  }
 0x8a5   : > { %7699 = vmatprep.subr.bf16.mxu1 %v11868_v4  ;;  %v11880_v20 = vld [vmem:[#allocation16 + $0xfc] ss:$40 sps:$4 sm:$0xff]   ;;  %v11886_v61 = vld [vmem:[#allocation16 + $0x14c] ss:$40 sps:$4 sm:$0xff]   ;;  %v11884_v48 = vld [vmem:[#allocation16 + $0x148] ss:$40 sps:$4 sm:$0xff]  }
 0x8a8   : > { %v6211_v15 = vpop.f32.mrb[108].mxu0  ;;  %v6252_v3 = vpop.f32.mrb[96].mxu1  ;;  %7700 = vmatpush1.bf16.msra.mxu1 %v11866_v47 }
 0x8a9   : > { %v6268_v33 = vadd.f32 %v6267_v57, %v6211_v15  ;;  %v6301_v18 = vsel %vm604_vm0, %v6252_v3, 0.0  ;;  %v6213_v52 = vpop.f32.mrb[109].mxu0  ;;  %v11497_v50 = vpop.f32.mrb[97].mxu1  ;;  %v11869_v57 = vld [vmem:[#allocation16 + $0xa0] ss:$40 sps:$4 sm:$0xff]   ;;  %7701 = vmatprep.subr.bf16.mxu1 %v11874_v29 }
 0x8aa   : > { %v6302_v19 = vadd.f32 %v6301_v18, %v6300_v1  ;;  %v6279_v60 = vadd.f32 %v6278_v24, %v6213_v52  ;;  %v6215_v12 = vpop.f32.mrb[110].mxu0  ;;  %v6255_v16 = vpop.f32.mrb[98].mxu1  ;;  %7620 = vmatpush1.bf16.msra.mxu0 %v11869_v57  ;;  %v11875_v1 = vld [vmem:[#allocation16 + $0xf0] ss:$40 sps:$4 sm:$0xff]   ;;  %v11901_v52 = vld [vmem:[#allocation16 + $0x234] ss:$40 sps:$4 sm:$0xff]  }
 0x8ab   : > { %v6320_v26 = vadd.f32 %v6308_v28, %v6268_v33  ;;  %v6216_v30 = vpop.f32.mrb[111].mxu0  ;;  %v11498_v53 = vpop.f32.mrb[99].mxu1  ;;  %7621 = vmatprep.subr.bf16.mxu0 %v11877_v17  ;;  %v11878_v24 = vld [vmem:[#allocation16 + $0xf8] ss:$40 sps:$4 sm:$0xff]   ;;  %v11892_v28 = vld [vmem:[#allocation16 + $0x19c] ss:$40 sps:$4 sm:$0xff]  }
 0x8ac   : > { %v6322_v59 = vadd.f32 %v6316_v55, %v6302_v19  ;;  %v6321_v62 = vadd.f32 %v6312_v27, %v6279_v60  ;;  %7702 = vmatpush1.bf16.msra.mxu1 %v11872_v23  ;;  %v11887_v15 = vld [vmem:[#allocation16 + $0x190] ss:$40 sps:$4 sm:$0xff]   ;;  %v11895_v55 = vld [vmem:[#allocation16 + $0x1e4] ss:$40 sps:$4 sm:$0xff]   ;;  %v11893_v33 = vld [vmem:[#allocation16 + $0x1e0] ss:$40 sps:$4 sm:$0xff]  }
 0x8ad   : > { %v14321_v45 = vadd.f32 %v12540_v49, %v6320_v26  ;;  %7703 = vmatprep.subr.bf16.mxu1 %v11880_v20  ;;  %v11890_v3 = vld [vmem:[#allocation16 + $0x198] ss:$40 sps:$4 sm:$0xff]   ;;  %v11898_v27 = vld [vmem:[#allocation16 + $0x1ec] ss:$40 sps:$4 sm:$0xff]   ;;  %v11896_v18 = vld [vmem:[#allocation16 + $0x1e8] ss:$40 sps:$4 sm:$0xff]  }
 0x8ae   : > { %v14324_v2 = vadd.f32 %v12541_v54, %v6322_v59  ;;  %v14327_v13 = vadd.f32 %v12542_v21, %v6321_v62  ;;  %7622 = vmatpush1.bf16.msra.mxu0 %v11875_v1  ;;  %v11904_v50 = vld [vmem:[#allocation16 + $0x23c] ss:$40 sps:$4 sm:$0xff]   ;;  %v11899_v19 = vld [vmem:[#allocation16 + $0x230] ss:$40 sps:$4 sm:$0xff]   ;;  %v11910_v16 = vld [vmem:[#allocation16 + $0x28c] ss:$40 sps:$4 sm:$0xff]  }
 0x8af   : > { %7623 = vmatprep.subr.bf16.mxu0 %v11883_v5  ;;  %v11902_v60 = vld [vmem:[#allocation16 + $0x238] ss:$40 sps:$4 sm:$0xff]   ;;  %v11907_v12 = vld [vmem:[#allocation16 + $0x284] ss:$40 sps:$4 sm:$0xff]   ;;  %v11908_v30 = vld [vmem:[#allocation16 + $0x288] ss:$40 sps:$4 sm:$0xff]  }
 0x8b0   : > { %v6326_v43 = vadd.f32 %v14327_v13, %v14321_v45  ;;  %v6327_v56 = vsel %vm604_vm0, %v14324_v2, 0.0  ;;  %7704 = vmatpush1.bf16.msra.mxu1 %v11878_v24  ;;  %v11905_v26 = vld [vmem:[#allocation16 + $0x280] ss:$40 sps:$4 sm:$0xff]   ;;  %v11913_v53 = vld [vmem:[#allocation16 + $0x2d4] ss:$40 sps:$4 sm:$0xff]  }
 0x8b1   : > { %7705 = vmatprep.subr.bf16.mxu1 %v11886_v61  ;;  %v11916_v59 = vld [vmem:[#allocation16 + $0x2dc] ss:$40 sps:$4 sm:$0xff]   ;;  %v11911_v62 = vld [vmem:[#allocation16 + $0x2d0] ss:$40 sps:$4 sm:$0xff]   ;;  %v11922_v21 = vld [vmem:[#allocation16 + $0x32c] ss:$40 sps:$4 sm:$0xff]  }
 0x8b2   : > { %v6328_v25 = vadd.f32 %v6327_v56, %v6326_v43  ;;  %7624 = vmatpush1.bf16.msra.mxu0 %v11881_v14  ;;  %v11914_v49 = vld [vmem:[#allocation16 + $0x2d8] ss:$40 sps:$4 sm:$0xff]   ;;  %v11919_v54 = vld [vmem:[#allocation16 + $0x324] ss:$40 sps:$4 sm:$0xff]   ;;  %v11920_v56 = vld [vmem:[#allocation16 + $0x328] ss:$40 sps:$4 sm:$0xff]  }
 0x8b3   : > { %7625 = vmatprep.subr.bf16.mxu0 %v11889_v58  ;;  %v11917_v43 = vld [vmem:[#allocation16 + $0x320] ss:$40 sps:$4 sm:$0xff]   ;;  %v11923_v57 = vld [vmem:[#allocation16 + $0x370] ss:$40 sps:$4 sm:$0xff]   ;;  %v11925_v23 = vld [vmem:[#allocation16 + $0x374] ss:$40 sps:$4 sm:$0xff]  }
 0x8b4   : > { %6329 = vadd.xlane.f32.xlu0 %v6328_v25  ;;  %7706 = vmatpush1.bf16.msra.mxu1 %v11884_v48  ;;  %v11926_v17 = vld [vmem:[#allocation16 + $0x378] ss:$40 sps:$4 sm:$0xff]   ;;  %v11928_v20 = vld [vmem:[#allocation16 + $0x37c] ss:$40 sps:$4 sm:$0xff]   ;;  %v11934_v24 = vld [vmem:[#allocation16 + $0x3cc] ss:$40 sps:$4 sm:$0xff]  }
 0x8b5   : > { %7707 = vmatprep.subr.bf16.mxu1 %v11892_v28  ;;  %v11931_v1 = vld [vmem:[#allocation16 + $0x3c4] ss:$40 sps:$4 sm:$0xff]   ;;  %v11929_v5 = vld [vmem:[#allocation16 + $0x3c0] ss:$40 sps:$4 sm:$0xff]   ;;  %v11937_v14 = vld [vmem:[#allocation16 + $0x414] ss:$40 sps:$4 sm:$0xff]  }
 0x8b6   : > { %7626 = vmatpush1.bf16.msra.mxu0 %v11887_v15  ;;  %v11932_v61 = vld [vmem:[#allocation16 + $0x3c8] ss:$40 sps:$4 sm:$0xff]   ;;  %v11940_v48 = vld [vmem:[#allocation16 + $0x41c] ss:$40 sps:$4 sm:$0xff]   ;;  %v11938_v28 = vld [vmem:[#allocation16 + $0x418] ss:$40 sps:$4 sm:$0xff]  }
 0x8b7   : > { %7627 = vmatprep.subr.bf16.mxu0 %v11895_v55  ;;  %v11935_v58 = vld [vmem:[#allocation16 + $0x410] ss:$40 sps:$4 sm:$0xff]   ;;  %v11943_v15 = vld [vmem:[#allocation16 + $0x464] ss:$40 sps:$4 sm:$0xff]   ;;  %v11941_v55 = vld [vmem:[#allocation16 + $0x460] ss:$40 sps:$4 sm:$0xff]  }
 0x8b8   : > { %7708 = vmatpush1.bf16.msra.mxu1 %v11890_v3  ;;  %v11946_v3 = vld [vmem:[#allocation16 + $0x46c] ss:$40 sps:$4 sm:$0xff]  }
 0x8b9   : > { %7709 = vmatprep.subr.bf16.mxu1 %v11898_v27  ;;  %v11944_v27 = vld [vmem:[#allocation16 + $0x468] ss:$40 sps:$4 sm:$0xff]  }
 0x8ba   : > { %7628 = vmatpush1.bf16.msra.mxu0 %v11893_v33  ;;  %v11949_v33 = vld [vmem:[#allocation16 + $0x4b4] ss:$40 sps:$4 sm:$0xff]  }
 0x8bb   : > { %7629 = vmatprep.subr.bf16.mxu0 %v11901_v52  ;;  %v11947_v52 = vld [vmem:[#allocation16 + $0x4b0] ss:$40 sps:$4 sm:$0xff]  }
 0x8bc   : > { %7710 = vmatpush1.bf16.msra.mxu1 %v11896_v18  ;;  %v11952_v18 = vld [vmem:[#allocation16 + $0x4bc] ss:$40 sps:$4 sm:$0xff]  }
 0x8bd   : > { %7711 = vmatprep.subr.bf16.mxu1 %v11904_v50  ;;  %v11950_v50 = vld [vmem:[#allocation16 + $0x4b8] ss:$40 sps:$4 sm:$0xff]  }
 0x8be   : > { %7630 = vmatpush1.bf16.msra.mxu0 %v11899_v19  ;;  %v11955_v19 = vld [vmem:[#allocation16 + $0x504] ss:$40 sps:$4 sm:$0xff]  }
 0x8bf   : > { %7631 = vmatprep.subr.bf16.mxu0 %v11907_v12 }
 0x8c0   : > { %7712 = vmatpush1.bf16.msra.mxu1 %v11902_v60  ;;  %v11958_v60 = vld [vmem:[#allocation16 + $0x50c] ss:$40 sps:$4 sm:$0xff]  }
 0x8c1   : > { %7713 = vmatprep.subr.bf16.mxu1 %v11910_v16 }
 0x8c2   : > { %7632 = vmatpush1.bf16.msra.mxu0 %v11905_v26 }
 0x8c3   : > { %7633 = vmatprep.subr.bf16.mxu0 %v11913_v53 }
 0x8c4   : > { %7714 = vmatpush1.bf16.msra.mxu1 %v11908_v30 }
 0x8c5   : > { %7715 = vmatprep.subr.bf16.mxu1 %v11916_v59 }
 0x8c6   : > { %7634 = vmatpush1.bf16.msra.mxu0 %v11911_v62 }
 0x8c7   : > { %7635 = vmatprep.subr.bf16.mxu0 %v11919_v54 }
 0x8c8   : > { %7716 = vmatpush1.bf16.msra.mxu1 %v11914_v49 }
 0x8c9   : > { %7717 = vmatprep.subr.bf16.mxu1 %v11922_v21 }
 0x8ca   : > { %7636 = vmatpush1.bf16.msra.mxu0 %v11917_v43 }
 0x8cb   : > { %7637 = vmatprep.subr.bf16.mxu0 %v11925_v23 }
 0x8cc   : > { %7718 = vmatpush1.bf16.msra.mxu1 %v11920_v56  ;;  %v11953_v56 = vld [vmem:[#allocation16 + $0x500] ss:$40 sps:$4 sm:$0xff]  }
 0x8cd   : > { %7719 = vmatprep.subr.bf16.mxu1 %v11928_v20 }
 0x8ce   : > { %7638 = vmatpush1.bf16.msra.mxu0 %v11923_v57 }
 0x8cf   : > { %7639 = vmatprep.subr.bf16.mxu0 %v11931_v1 }
 0x8d0   : > { %7720 = vmatpush1.bf16.msra.mxu1 %v11926_v17 }
 0x8d1   : > { %7721 = vmatprep.subr.bf16.mxu1 %v11934_v24 }
 0x8d2   : > { %7640 = vmatpush1.bf16.msra.mxu0 %v11929_v5  ;;  %v11977_v5 = vld [vmem:[#allocation16 + $0x14] ss:$40 sps:$4 sm:$0xff]  }
 0x8d3   : > { %7641 = vmatprep.subr.bf16.mxu0 %v11937_v14  ;;  %v11975_v14 = vld [vmem:[#allocation16 + $0x10] ss:$40 sps:$4 sm:$0xff]  }
 0x8d4   : > { %7722 = vmatpush1.bf16.msra.mxu1 %v11932_v61  ;;  %v11980_v61 = vld [vmem:[#allocation16 + $0x1c] ss:$40 sps:$4 sm:$0xff]  }
 0x8d5   : > { %7723 = vmatprep.subr.bf16.mxu1 %v11940_v48 }
 0x8d6   : > { %7642 = vmatpush1.bf16.msra.mxu0 %v11935_v58  ;;  %v11983_v58 = vld [vmem:[#allocation16 + $0x64] ss:$40 sps:$4 sm:$0xff]  }
 0x8d7   : > { %7643 = vmatprep.subr.bf16.mxu0 %v11943_v15  ;;  %v11984_v15 = vld [vmem:[#allocation16 + $0x68] ss:$40 sps:$4 sm:$0xff]  }
 0x8d8   : > { %7724 = vmatpush1.bf16.msra.mxu1 %v11938_v28  ;;  %v11986_v28 = vld [vmem:[#allocation16 + $0x6c] ss:$40 sps:$4 sm:$0xff]  }
 0x8d9   : > { %7725 = vmatprep.subr.bf16.mxu1 %v11946_v3  ;;  %v11989_v3 = vld [vmem:[#allocation16 + $0xb4] ss:$40 sps:$4 sm:$0xff]  }
 0x8da   : > { %7644 = vmatpush1.bf16.msra.mxu0 %v11941_v55  ;;  %v11992_v55 = vld [vmem:[#allocation16 + $0xbc] ss:$40 sps:$4 sm:$0xff]  }
 0x8db   : > { %7645 = vmatprep.subr.bf16.mxu0 %v11949_v33  ;;  %v11990_v33 = vld [vmem:[#allocation16 + $0xb8] ss:$40 sps:$4 sm:$0xff]  }
 0x8dc   : > { %7726 = vmatpush1.bf16.msra.mxu1 %v11944_v27  ;;  %v11987_v27 = vld [vmem:[#allocation16 + $0xb0] ss:$40 sps:$4 sm:$0xff]  }
 0x8dd   : > { %7727 = vmatprep.subr.bf16.mxu1 %v11952_v18  ;;  %v11995_v18 = vld [vmem:[#allocation16 + $0x104] ss:$40 sps:$4 sm:$0xff]  }
 0x8de   : > { %7646 = vmatpush1.bf16.msra.mxu0 %v11947_v52  ;;  %v11998_v52 = vld [vmem:[#allocation16 + $0x10c] ss:$40 sps:$4 sm:$0xff]  }
 0x8df   : > { %7656 = vmatprep.subr.bf16.mxu0 %v11955_v19  ;;  %v11996_v19 = vld [vmem:[#allocation16 + $0x108] ss:$40 sps:$4 sm:$0xff]  }
 0x8e0   : > { %7728 = vmatpush1.bf16.msra.mxu1 %v11950_v50  ;;  %v11993_v50 = vld [vmem:[#allocation16 + $0x100] ss:$40 sps:$4 sm:$0xff]  }
 0x8e1   : > { %7738 = vmatprep.subr.bf16.mxu1 %v11958_v60  ;;  %v12001_v60 = vld [vmem:[#allocation16 + $0x154] ss:$40 sps:$4 sm:$0xff]  }
 0x941   : > { %v6330_v25 = vpop.xlane.xlu0 %6329 }
 0x942   : > { %v6331_v38 = vmul.f32 0.0032051282, %v6330_v25  ;;  %v11956_v25 = vld [vmem:[#allocation16 + $0x508] ss:$40 sps:$4 sm:$0xff]  }
 0x944   : > { %v6332_v51 = vsub.f32 %v14321_v45, %v6331_v38  ;;  %v6333_v35 = vsub.f32 %v14327_v13, %v6331_v38  ;;  %v14336_v6 = vsub.f32 %v14324_v2, %v6331_v38 }
 0x946   : > { %v6335_v32 = vmul.f32 %v6332_v51, %v6332_v51  ;;  %v6336_v4 = vmul.f32 %v6333_v35, %v6333_v35  ;;  %v6337_v10 = vmul.f32 %v14336_v6, %v14336_v6 }
 0x948   : > { %v6338_v47 = vadd.f32 %v6336_v4, %v6335_v32  ;;  %v6339_v42 = vsel %vm604_vm0, %v6337_v10, 0.0  ;;  %v11961_v32 = vld [vmem:[#allocation16 + $0x554] ss:$40 sps:$4 sm:$0xff]  }
 0x949   : > { %v11964_v4 = vld [vmem:[#allocation16 + $0x55c] ss:$40 sps:$4 sm:$0xff]  }
 0x94a   : > { %v6340_v29 = vadd.f32 %v6339_v42, %v6338_v47  ;;  %v6549_v10 = vld [vmem:[#allocation16 + $0x5f8] sm:$0xff]  ;;  %v11965_v47 = vld [vmem:[#allocation16 + $0x5a0] ss:$40 sps:$4 sm:$0xff]  }
 0x94b   : > { %v11968_v42 = vld [vmem:[#allocation16 + $0x5a8] ss:$40 sps:$4 sm:$0xff]   ;;  %v10831_v23 = vcombine.high %v6549_v10, %v6549_v10  ;;  %v10830_v17 = vcombine.low %v6549_v10, %v6549_v10  ;;  %v12034_v10 = vld [vmem:[#allocation16 + $0x2ec] ss:$40 sps:$4 sm:$0xff]  }
 0x94c   : > { %6341 = vadd.xlane.f32.xlu1 %v6340_v29 }
 0x94d   : > { %v7592_v1 = vsel %vm1650_vm1, %v10830_v17, 0  ;;  %v12038_v17 = vld [vmem:[#allocation16 + $0x338] ss:$40 sps:$4 sm:$0xff]  }
 0x9d9   : > { %v6342_v12 = vpop.xlane.xlu1 %6341 }
 0x9da   : > { %v6343_v16 = vmul.f32 0.0032051282, %v6342_v12  ;;  %v12004_v12 = vld [vmem:[#allocation16 + $0x15c] ss:$40 sps:$4 sm:$0xff]  }
 0x9dc   : > { %v6344_v26 = vadd.f32 1e-12, %v6343_v16  ;;  %v11999_v16 = vld [vmem:[#allocation16 + $0x150] ss:$40 sps:$4 sm:$0xff]  }
 0x9de   : > { %12514 = vrsqrt.f32 %v6344_v26  ;;  %v12002_v26 = vld [vmem:[#allocation16 + $0x158] ss:$40 sps:$4 sm:$0xff]  }
 0x9e8   : > { %v12515_v30 = vpop.eup %12514 }
 0x9e9   : > { %v6347_v53 = vmul.f32 %v12515_v30, %v6333_v35  ;;  %v6346_v59 = vmul.f32 %v12515_v30, %v6332_v51  ;;  %v6548_v51 = vld [vmem:[#allocation16 + $0x5f0] sm:$0xff]  ;;  %v6348_v35 = vmul.f32 %v12515_v30, %v14336_v6  ;;  %v12007_v30 = vld [vmem:[#allocation16 + $0x1a4] ss:$40 sps:$4 sm:$0xff]  }
 0x9ea   : > { %v10829_v29 = vcombine.high %v6548_v51, %v6548_v51  ;;  %v10828_v57 = vcombine.low %v6548_v51, %v6548_v51  ;;  %v12026_v51 = vld [vmem:[#allocation16 + $0x298] ss:$40 sps:$4 sm:$0xff]  }
 0x9eb   : > { %v6350_v62 = vmul.f32 %v6347_v53, %v13544_v40  ;;  %v6349_v49 = vmul.f32 %v6346_v59, %v13547_v41  ;;  %v11959_v40 = vld [vmem:[#allocation16 + $0x550] ss:$40 sps:$4 sm:$0xff]   ;;  %v6351_v20 = vmul.f32 %v6348_v35, %v13573_v0  ;;  %v12010_v53 = vld [vmem:[#allocation16 + $0x1ac] ss:$40 sps:$4 sm:$0xff]   ;;  %v12005_v59 = vld [vmem:[#allocation16 + $0x1a0] ss:$40 sps:$4 sm:$0xff]  }
 0x9ec   : > { %v11962_v41 = vld [vmem:[#allocation16 + $0x558] ss:$40 sps:$4 sm:$0xff]   ;;  %v7586_v6 = vsel %vm1650_vm1, %v10828_v57, 0  ;;  %v12031_v35 = vld [vmem:[#allocation16 + $0x2e4] ss:$40 sps:$4 sm:$0xff]  }
 0x9ed   : > { %v6353_v54 = vadd.f32 %v6350_v62, %v13551_v44  ;;  %v6352_v21 = vadd.f32 %v6349_v49, %v13555_v46  ;;  %v11967_v44 = vld [vmem:[#allocation16 + $0x5a4] ss:$40 sps:$4 sm:$0xff]   ;;  %v6354_v24 = vadd.f32 %v6351_v20, %v13579_v8  ;;  %v11978_v0 = vld [vmem:[#allocation16 + $0x18] ss:$40 sps:$4 sm:$0xff]   ;;  %v12008_v62 = vld [vmem:[#allocation16 + $0x1a8] ss:$40 sps:$4 sm:$0xff]  }
 0x9ee   : > { %v11970_v46 = vld [vmem:[#allocation16 + $0x5ac] ss:$40 sps:$4 sm:$0xff]   ;;  %v11981_v8 = vld [vmem:[#allocation16 + $0x60] ss:$40 sps:$4 sm:$0xff]   ;;  %v12040_v57 = vld [vmem:[#allocation16 + $0x33c] ss:$40 sps:$4 sm:$0xff]  }
 0x9ef   : > { %v14345_v43 = vpack.c.bf16 %v6353_v54, %v6353_v54  ;;  %v14347_v38 = vpack.c.bf16 %v6352_v21, %v6352_v21  ;;  %v14362_v48 = vpack.c.bf16 %v6354_v24, %v6354_v24  ;;  %v12013_v49 = vld [vmem:[#allocation16 + $0x1f4] ss:$40 sps:$4 sm:$0xff]   ;;  %v12011_v21 = vld [vmem:[#allocation16 + $0x1f0] ss:$40 sps:$4 sm:$0xff]   ;;  %v12043_v20 = vld [vmem:[#allocation16 + $0x384] ss:$40 sps:$4 sm:$0xff]  }
 0x9f0   : > { %v12016_v54 = vld [vmem:[#allocation16 + $0x1fc] ss:$40 sps:$4 sm:$0xff]   ;;  %v12044_v24 = vld [vmem:[#allocation16 + $0x388] ss:$40 sps:$4 sm:$0xff]  }
 0x9f1   : > { %7647 = vmatprep.mubr.bf16.mxu0 %v14345_v43  ;;  %7729 = vmatprep.mubr.bf16.mxu1 %v14345_v43 }
 0x9f2   : > { %7648 = vmatmul.mubr.bf16.vlgmr.msra.gmra.mrb[112].mxu0 %v14347_v38  ;;  %7730 = vmatmul.mubr.bf16.vlgmr.msra.gmra.mrb[100].mxu1 %v14347_v38 }
 0x9f3   : > { %7657 = vmatpush1.bf16.msra.mxu0 %v11953_v56  ;;  %7739 = vmatpush1.bf16.msra.mxu1 %v11956_v25  ;;  %v12014_v56 = vld [vmem:[#allocation16 + $0x1f8] ss:$40 sps:$4 sm:$0xff]   ;;  %v12019_v25 = vld [vmem:[#allocation16 + $0x244] ss:$40 sps:$4 sm:$0xff]  }
 0x9f4   : > { %7658 = vmatprep.subr.bf16.mxu0 %v11961_v32  ;;  %7740 = vmatprep.subr.bf16.mxu1 %v11964_v4  ;;  %v12022_v32 = vld [vmem:[#allocation16 + $0x24c] ss:$40 sps:$4 sm:$0xff]   ;;  %v12017_v4 = vld [vmem:[#allocation16 + $0x240] ss:$40 sps:$4 sm:$0xff]  }
 0x9f5   : > { %7688 = vmatprep.mubr.bf16.mxu0 %v12997_v7  ;;  %7770 = vmatprep.mubr.bf16.mxu1 %v12997_v7 }
 0x9f7   : > { %7659 = vmatpush1.bf16.msra.mxu0 %v11959_v40  ;;  %7741 = vmatpush1.bf16.msra.mxu1 %v11962_v41  ;;  %v12020_v40 = vld [vmem:[#allocation16 + $0x248] ss:$40 sps:$4 sm:$0xff]   ;;  %v12025_v41 = vld [vmem:[#allocation16 + $0x294] ss:$40 sps:$4 sm:$0xff]  }
 0x9f8   : > { %7660 = vmatprep.subr.bf16.mxu0 %v11967_v44  ;;  %7742 = vmatprep.subr.bf16.mxu1 %v11970_v46  ;;  %v12028_v44 = vld [vmem:[#allocation16 + $0x29c] ss:$40 sps:$4 sm:$0xff]   ;;  %v12023_v46 = vld [vmem:[#allocation16 + $0x290] ss:$40 sps:$4 sm:$0xff]  }
 0x9fb   : > { %7661 = vmatpush1.bf16.msra.mxu0 %v11965_v47  ;;  %7743 = vmatpush1.bf16.msra.mxu1 %v11968_v42  ;;  %v12029_v47 = vld [vmem:[#allocation16 + $0x2e0] ss:$40 sps:$4 sm:$0xff]  }
 0x9fc   : > { %10838 = vmatprep.subr.msk.bf16.mxu0 %vm1650_vm1, %v10829_v29  ;;  %10840 = vmatprep.subr.msk.bf16.mxu1 %vm1650_vm1, %v10831_v23  ;;  %v12032_v42 = vld [vmem:[#allocation16 + $0x2e8] ss:$40 sps:$4 sm:$0xff]   ;;  %v12037_v29 = vld [vmem:[#allocation16 + $0x334] ss:$40 sps:$4 sm:$0xff]  }
 0x9fd   : > { %v12035_v23 = vld [vmem:[#allocation16 + $0x330] ss:$40 sps:$4 sm:$0xff]  }
 0x9ff   : > { %7663 = vmatpush1.bf16.msra.mxu0 %v7586_v6  ;;  %7745 = vmatpush1.bf16.msra.mxu1 %v7592_v1  ;;  %v12046_v6 = vld [vmem:[#allocation16 + $0x38c] ss:$40 sps:$4 sm:$0xff]   ;;  %v12041_v1 = vld [vmem:[#allocation16 + $0x380] ss:$40 sps:$4 sm:$0xff]  }
 0xa00   : > { %7779 = vmatprep.subr.bf16.mxu0 %v11977_v5  ;;  %7861 = vmatprep.subr.bf16.mxu1 %v11980_v61  ;;  %v12049_v5 = vld [vmem:[#allocation16 + $0x3d4] ss:$40 sps:$4 sm:$0xff]  }
 0xa01   : > { %v12052_v61 = vld [vmem:[#allocation16 + $0x3dc] ss:$40 sps:$4 sm:$0xff]  }
 0xa02   : > { %10839 = vmatmul.mubr.msk.bf16.vlgmr.msra.gmra.mrb[112].mxu0 %vm604_vm0, %v14362_v48  ;;  %10841 = vmatmul.mubr.msk.bf16.vlgmr.msra.gmra.mrb[100].mxu1 %vm604_vm0, %v14362_v48 }
 0xa03   : > { %7780 = vmatpush1.bf16.msra.mxu0 %v11975_v14  ;;  %7811 = vmatprep.mubr.bf16.mxu0 %v14345_v43  ;;  %v12047_v14 = vld [vmem:[#allocation16 + $0x3d0] ss:$40 sps:$4 sm:$0xff]  }
 0xa04   : > { %7862 = vmatpush1.bf16.msra.mxu1 %v11978_v0  ;;  %7893 = vmatprep.mubr.bf16.mxu1 %v14345_v43  ;;  %v12050_v0 = vld [vmem:[#allocation16 + $0x3d8] ss:$40 sps:$4 sm:$0xff]  }
 0xa05   : > { %7781 = vmatprep.subr.bf16.mxu0 %v11983_v58  ;;  %7863 = vmatprep.subr.bf16.mxu1 %v11986_v28  ;;  %v12055_v58 = vld [vmem:[#allocation16 + $0x424] ss:$40 sps:$4 sm:$0xff]  }
 0xa06   : > { %v12058_v28 = vld [vmem:[#allocation16 + $0x42c] ss:$40 sps:$4 sm:$0xff]  }
 0xa07   : > { %7782 = vmatpush1.bf16.msra.mxu0 %v11981_v8  ;;  %v12053_v8 = vld [vmem:[#allocation16 + $0x420] ss:$40 sps:$4 sm:$0xff]  }
 0xa08   : > { %7864 = vmatpush1.bf16.msra.mxu1 %v11984_v15  ;;  %7783 = vmatprep.subr.bf16.mxu0 %v11989_v3  ;;  %v12056_v15 = vld [vmem:[#allocation16 + $0x428] ss:$40 sps:$4 sm:$0xff]   ;;  %v12061_v3 = vld [vmem:[#allocation16 + $0x474] ss:$40 sps:$4 sm:$0xff]  }
 0xa09   : > { %7865 = vmatprep.subr.bf16.mxu1 %v11992_v55  ;;  %v12064_v55 = vld [vmem:[#allocation16 + $0x47c] ss:$40 sps:$4 sm:$0xff]  }
 0xa0b   : > { %7784 = vmatpush1.bf16.msra.mxu0 %v11987_v27  ;;  %v12059_v27 = vld [vmem:[#allocation16 + $0x470] ss:$40 sps:$4 sm:$0xff]  }
 0xa0c   : > { %7866 = vmatpush1.bf16.msra.mxu1 %v11990_v33  ;;  %7785 = vmatprep.subr.bf16.mxu0 %v11995_v18  ;;  %v12062_v33 = vld [vmem:[#allocation16 + $0x478] ss:$40 sps:$4 sm:$0xff]   ;;  %v12067_v18 = vld [vmem:[#allocation16 + $0x4c4] ss:$40 sps:$4 sm:$0xff]  }
 0xa0d   : > { %7867 = vmatprep.subr.bf16.mxu1 %v11998_v52  ;;  %v12070_v52 = vld [vmem:[#allocation16 + $0x4cc] ss:$40 sps:$4 sm:$0xff]  }
 0xa0f   : > { %7786 = vmatpush1.bf16.msra.mxu0 %v11993_v50  ;;  %v12065_v50 = vld [vmem:[#allocation16 + $0x4c0] ss:$40 sps:$4 sm:$0xff]  }
 0xa10   : > { %7868 = vmatpush1.bf16.msra.mxu1 %v11996_v19  ;;  %7787 = vmatprep.subr.bf16.mxu0 %v12001_v60  ;;  %v12068_v19 = vld [vmem:[#allocation16 + $0x4c8] ss:$40 sps:$4 sm:$0xff]   ;;  %v12073_v60 = vld [vmem:[#allocation16 + $0x514] ss:$40 sps:$4 sm:$0xff]  }
 0xa11   : > { %7869 = vmatprep.subr.bf16.mxu1 %v12004_v12  ;;  %v12076_v12 = vld [vmem:[#allocation16 + $0x51c] ss:$40 sps:$4 sm:$0xff]  }
 0xa13   : > { %7788 = vmatpush1.bf16.msra.mxu0 %v11999_v16  ;;  %v12071_v16 = vld [vmem:[#allocation16 + $0x510] ss:$40 sps:$4 sm:$0xff]  }
 0xa14   : > { %7870 = vmatpush1.bf16.msra.mxu1 %v12002_v26  ;;  %7789 = vmatprep.subr.bf16.mxu0 %v12007_v30  ;;  %v12074_v26 = vld [vmem:[#allocation16 + $0x518] ss:$40 sps:$4 sm:$0xff]   ;;  %v12079_v30 = vld [vmem:[#allocation16 + $0x564] ss:$40 sps:$4 sm:$0xff]  }
 0xa15   : > { %7871 = vmatprep.subr.bf16.mxu1 %v12010_v53  ;;  %v12082_v53 = vld [vmem:[#allocation16 + $0x56c] ss:$40 sps:$4 sm:$0xff]  }
 0xa17   : > { %7790 = vmatpush1.bf16.msra.mxu0 %v12005_v59  ;;  %v12077_v59 = vld [vmem:[#allocation16 + $0x560] ss:$40 sps:$4 sm:$0xff]  }
 0xa18   : > { %7872 = vmatpush1.bf16.msra.mxu1 %v12008_v62  ;;  %7791 = vmatprep.subr.bf16.mxu0 %v12013_v49  ;;  %v12080_v62 = vld [vmem:[#allocation16 + $0x568] ss:$40 sps:$4 sm:$0xff]   ;;  %v12085_v49 = vld [vmem:[#allocation16 + $0x5b4] ss:$40 sps:$4 sm:$0xff]  }
 0xa19   : > { %7873 = vmatprep.subr.bf16.mxu1 %v12016_v54  ;;  %v12088_v54 = vld [vmem:[#allocation16 + $0x5bc] ss:$40 sps:$4 sm:$0xff]  }
 0xa1b   : > { %7792 = vmatpush1.bf16.msra.mxu0 %v12011_v21  ;;  %v6550_v21 = vld [vmem:[#allocation16 + $0x600] sm:$0xff] }
 0xa1c   : > { %7874 = vmatpush1.bf16.msra.mxu1 %v12014_v56  ;;  %7793 = vmatprep.subr.bf16.mxu0 %v12019_v25  ;;  %v6551_v56 = vld [vmem:[#allocation16 + $0x608] sm:$0xff]  ;;  %v12083_v25 = vld [vmem:[#allocation16 + $0x5b0] ss:$40 sps:$4 sm:$0xff]  }
 0xa1d   : > { %7875 = vmatprep.subr.bf16.mxu1 %v12022_v32  ;;  %v12086_v32 = vld [vmem:[#allocation16 + $0x5b8] ss:$40 sps:$4 sm:$0xff]  }
 0xa1f   : > { %7794 = vmatpush1.bf16.msra.mxu0 %v12017_v4  ;;  %v10833_v4 = vcombine.high %v6550_v21, %v6550_v21 }
 0xa20   : > { %7876 = vmatpush1.bf16.msra.mxu1 %v12020_v40  ;;  %7795 = vmatprep.subr.bf16.mxu0 %v12025_v41  ;;  %v10832_v40 = vcombine.low %v6550_v21, %v6550_v21  ;;  %v10835_v41 = vcombine.high %v6551_v56, %v6551_v56  ;;  %v12125_v21 = vld [vmem:[#allocation16 + $0x344] ss:$40 sps:$4 sm:$0xff]  }
 0xa21   : > { %7877 = vmatprep.subr.bf16.mxu1 %v12028_v44  ;;  %v10834_v44 = vcombine.low %v6551_v56, %v6551_v56  ;;  %v12179_v56 = vld [vmem:[#allocation19 + $0xd8] ss:$12 sps:$4 sm:$0xff]  }
 0xa23   : > { %7796 = vmatpush1.bf16.msra.mxu0 %v12023_v46  ;;  %v7598_v46 = vsel %vm1650_vm1, %v10832_v40, 0  ;;  %v12182_v40 = vld [vmem:[#allocation19 + $0xf0] ss:$12 sps:$4 sm:$0xff]  }
 0xa24   : > { %7878 = vmatpush1.bf16.msra.mxu1 %v12026_v51  ;;  %7797 = vmatprep.subr.bf16.mxu0 %v12031_v35  ;;  %v12095_v51 = vld [vmem:[#allocation16 + $0x24] ss:$40 sps:$4 sm:$0xff]   ;;  %v7604_v35 = vsel %vm1650_vm1, %v10834_v44, 0  ;;  %v12126_v44 = vld [vmem:[#allocation16 + $0x390] ss:$40 sps:$4 sm:$0xff]  }
 0xa25   : > { %7879 = vmatprep.subr.bf16.mxu1 %v12034_v10  ;;  %v12154_v10 = vld [vmem:[#allocation19 + $0x4] ss:$12 sps:$4 sm:$0xff]  }
 0xa27   : > { %7798 = vmatpush1.bf16.msra.mxu0 %v12029_v47  ;;  %v12093_v47 = vld [vmem:[#allocation16 + $0x20] ss:$40 sps:$4 sm:$0xff]  }
 0xa28   : > { %7880 = vmatpush1.bf16.msra.mxu1 %v12032_v42  ;;  %7799 = vmatprep.subr.bf16.mxu0 %v12037_v29  ;;  %v12098_v42 = vld [vmem:[#allocation16 + $0x74] ss:$40 sps:$4 sm:$0xff]   ;;  %v12152_v29 = vld [vmem:[#allocation19] ss:$12 sps:$4 sm:$0xff]  }
 0xa29   : > { %7881 = vmatprep.subr.bf16.mxu1 %v12040_v57  ;;  %v12157_v57 = vld [vmem:[#allocation19 + $0x1c] ss:$12 sps:$4 sm:$0xff]  }
 0xa2b   : > { %7800 = vmatpush1.bf16.msra.mxu0 %v12035_v23  ;;  %v12096_v23 = vld [vmem:[#allocation16 + $0x70] ss:$40 sps:$4 sm:$0xff]  }
 0xa2c   : > { %7882 = vmatpush1.bf16.msra.mxu1 %v12038_v17  ;;  %7801 = vmatprep.subr.bf16.mxu0 %v12043_v20  ;;  %v12101_v17 = vld [vmem:[#allocation16 + $0xc4] ss:$40 sps:$4 sm:$0xff]  }
 0xa2d   : > { %7883 = vmatprep.subr.bf16.mxu1 %v12046_v6  ;;  %v12155_v20 = vld [vmem:[#allocation19 + $0x18] ss:$12 sps:$4 sm:$0xff]   ;;  %v12160_v6 = vld [vmem:[#allocation19 + $0x34] ss:$12 sps:$4 sm:$0xff]  }
 0xa2f   : > { %7802 = vmatpush1.bf16.msra.mxu0 %v12041_v1  ;;  %v12099_v1 = vld [vmem:[#allocation16 + $0xc0] ss:$40 sps:$4 sm:$0xff]  }
 0xa30   : > { %7884 = vmatpush1.bf16.msra.mxu1 %v12044_v24  ;;  %7803 = vmatprep.subr.bf16.mxu0 %v12049_v5  ;;  %v12104_v24 = vld [vmem:[#allocation16 + $0x114] ss:$40 sps:$4 sm:$0xff]  }
 0xa31   : > { %7885 = vmatprep.subr.bf16.mxu1 %v12052_v61  ;;  %v12158_v5 = vld [vmem:[#allocation19 + $0x30] ss:$12 sps:$4 sm:$0xff]   ;;  %v12163_v61 = vld [vmem:[#allocation19 + $0x4c] ss:$12 sps:$4 sm:$0xff]  }
 0xa33   : > { %7804 = vmatpush1.bf16.msra.mxu0 %v12047_v14  ;;  %v12102_v14 = vld [vmem:[#allocation16 + $0x110] ss:$40 sps:$4 sm:$0xff]  }
 0xa34   : > { %7886 = vmatpush1.bf16.msra.mxu1 %v12050_v0  ;;  %7805 = vmatprep.subr.bf16.mxu0 %v12055_v58  ;;  %v12107_v0 = vld [vmem:[#allocation16 + $0x164] ss:$40 sps:$4 sm:$0xff]  }
 0xa35   : > { %7887 = vmatprep.subr.bf16.mxu1 %v12058_v28  ;;  %v12166_v58 = vld [vmem:[#allocation19 + $0x64] ss:$12 sps:$4 sm:$0xff]  }
 0xa36   : > { %v12105_v28 = vld [vmem:[#allocation16 + $0x160] ss:$40 sps:$4 sm:$0xff]  }
 0xa37   : > { %7806 = vmatpush1.bf16.msra.mxu0 %v12053_v8  ;;  %v12110_v8 = vld [vmem:[#allocation16 + $0x1b4] ss:$40 sps:$4 sm:$0xff]  }
 0xa38   : > { %7888 = vmatpush1.bf16.msra.mxu1 %v12056_v15  ;;  %7807 = vmatprep.subr.bf16.mxu0 %v12061_v3  ;;  %v12164_v15 = vld [vmem:[#allocation19 + $0x60] ss:$12 sps:$4 sm:$0xff]   ;;  %v12169_v3 = vld [vmem:[#allocation19 + $0x7c] ss:$12 sps:$4 sm:$0xff]  }
 0xa39   : > { %7889 = vmatprep.subr.bf16.mxu1 %v12064_v55  ;;  %v12108_v55 = vld [vmem:[#allocation16 + $0x1b0] ss:$40 sps:$4 sm:$0xff]  }
 0xa3b   : > { %7808 = vmatpush1.bf16.msra.mxu0 %v12059_v27  ;;  %v12113_v27 = vld [vmem:[#allocation16 + $0x204] ss:$40 sps:$4 sm:$0xff]  }
 0xa3c   : > { %7890 = vmatpush1.bf16.msra.mxu1 %v12062_v33  ;;  %7809 = vmatprep.subr.bf16.mxu0 %v12067_v18  ;;  %v12167_v33 = vld [vmem:[#allocation19 + $0x78] ss:$12 sps:$4 sm:$0xff]   ;;  %v12172_v18 = vld [vmem:[#allocation19 + $0x94] ss:$12 sps:$4 sm:$0xff]  }
 0xa3d   : > { %7891 = vmatprep.subr.bf16.mxu1 %v12070_v52  ;;  %v12111_v52 = vld [vmem:[#allocation16 + $0x200] ss:$40 sps:$4 sm:$0xff]  }
 0xa3f   : > { %7810 = vmatpush1.bf16.msra.mxu0 %v12065_v50  ;;  %v12116_v50 = vld [vmem:[#allocation16 + $0x254] ss:$40 sps:$4 sm:$0xff]  }
 0xa40   : > { %7892 = vmatpush1.bf16.msra.mxu1 %v12068_v19  ;;  %7820 = vmatprep.subr.bf16.mxu0 %v12073_v60  ;;  %v12170_v19 = vld [vmem:[#allocation19 + $0x90] ss:$12 sps:$4 sm:$0xff]   ;;  %v12175_v60 = vld [vmem:[#allocation19 + $0xac] ss:$12 sps:$4 sm:$0xff]  }
 0xa41   : > { %7902 = vmatprep.subr.bf16.mxu1 %v12076_v12  ;;  %v12114_v12 = vld [vmem:[#allocation16 + $0x250] ss:$40 sps:$4 sm:$0xff]  }
 0xa42   : > { %7812 = vmatmul.mubr.bf16.vlgmr.msra.gmra.mrb[116].mxu0 %v14347_v38 }
 0xa43   : > { %7894 = vmatmul.mubr.bf16.vlgmr.msra.gmra.mrb[104].mxu1 %v14347_v38  ;;  %7821 = vmatpush1.bf16.msra.mxu0 %v12071_v16  ;;  %v12119_v16 = vld [vmem:[#allocation16 + $0x2a4] ss:$40 sps:$4 sm:$0xff]  }
 0xa44   : > { %7903 = vmatpush1.bf16.msra.mxu1 %v12074_v26  ;;  %7822 = vmatprep.subr.bf16.mxu0 %v12079_v30  ;;  %v12173_v26 = vld [vmem:[#allocation19 + $0xa8] ss:$12 sps:$4 sm:$0xff]   ;;  %v12178_v30 = vld [vmem:[#allocation19 + $0xc4] ss:$12 sps:$4 sm:$0xff]  }
 0xa45   : > { %7904 = vmatprep.subr.bf16.mxu1 %v12082_v53  ;;  %7852 = vmatprep.mubr.bf16.mxu0 %v12997_v7  ;;  %v12117_v53 = vld [vmem:[#allocation16 + $0x2a0] ss:$40 sps:$4 sm:$0xff]  }
 0xa46   : > { %7934 = vmatprep.mubr.bf16.mxu1 %v12997_v7 }
 0xa47   : > { %7823 = vmatpush1.bf16.msra.mxu0 %v12077_v59  ;;  %v12122_v59 = vld [vmem:[#allocation16 + $0x2f4] ss:$40 sps:$4 sm:$0xff]  }
 0xa48   : > { %7905 = vmatpush1.bf16.msra.mxu1 %v12080_v62  ;;  %7824 = vmatprep.subr.bf16.mxu0 %v12085_v49  ;;  %v12176_v62 = vld [vmem:[#allocation19 + $0xc0] ss:$12 sps:$4 sm:$0xff]   ;;  %v12181_v49 = vld [vmem:[#allocation19 + $0xdc] ss:$12 sps:$4 sm:$0xff]  }
 0xa49   : > { %7906 = vmatprep.subr.bf16.mxu1 %v12088_v54  ;;  %v12120_v54 = vld [vmem:[#allocation16 + $0x2f0] ss:$40 sps:$4 sm:$0xff]  }
 0xa4b   : > { %7825 = vmatpush1.bf16.msra.mxu0 %v12083_v25  ;;  %v12184_v25 = vld [vmem:[#allocation19 + $0xf4] ss:$12 sps:$4 sm:$0xff]  }
 0xa4c   : > { %7907 = vmatpush1.bf16.msra.mxu1 %v12086_v32  ;;  %10842 = vmatprep.subr.msk.bf16.mxu0 %vm1650_vm1, %v10833_v4  ;;  %v12123_v32 = vld [vmem:[#allocation16 + $0x340] ss:$40 sps:$4 sm:$0xff]   ;;  %v12128_v4 = vld [vmem:[#allocation16 + $0x394] ss:$40 sps:$4 sm:$0xff]  }
 0xa4d   : > { %10844 = vmatprep.subr.msk.bf16.mxu1 %vm1650_vm1, %v10835_v41  ;;  %v12187_v41 = vld [vmem:[#allocation19 + $0x10c] ss:$12 sps:$4 sm:$0xff]  }
 0xa4f   : > { %7827 = vmatpush1.bf16.msra.mxu0 %v7598_v46  ;;  %v12131_v46 = vld [vmem:[#allocation16 + $0x3e4] ss:$40 sps:$4 sm:$0xff]  }
 0xa50   : > { %7909 = vmatpush1.bf16.msra.mxu1 %v7604_v35  ;;  %7943 = vmatprep.subr.bf16.mxu0 %v12095_v51  ;;  %v12185_v51 = vld [vmem:[#allocation19 + $0x108] ss:$12 sps:$4 sm:$0xff]   ;;  %v12190_v35 = vld [vmem:[#allocation19 + $0x124] ss:$12 sps:$4 sm:$0xff]  }
 0xa51   : > { %9666 = vmatprep.subr.bf16.mxu1 %v12154_v10  ;;  %v12129_v10 = vld [vmem:[#allocation16 + $0x3e0] ss:$40 sps:$4 sm:$0xff]  }
 0xa52   : > { %10843 = vmatmul.mubr.msk.bf16.vlgmr.msra.gmra.mrb[116].mxu0 %vm604_vm0, %v14362_v48 }
 0xa53   : > { %10845 = vmatmul.mubr.msk.bf16.vlgmr.msra.gmra.mrb[104].mxu1 %vm604_vm0, %v14362_v48  ;;  %7944 = vmatpush1.bf16.msra.mxu0 %v12093_v47  ;;  %v12134_v47 = vld [vmem:[#allocation16 + $0x434] ss:$40 sps:$4 sm:$0xff]  }
 0xa54   : > { %7975 = vmatprep.mubr.bf16.mxu0 %v14345_v43  ;;  %7945 = vmatprep.subr.bf16.mxu0 %v12098_v42  ;;  %v12161_v43 = vld [vmem:[#allocation19 + $0x48] ss:$12 sps:$4 sm:$0xff]   ;;  %v12188_v42 = vld [vmem:[#allocation19 + $0x120] ss:$12 sps:$4 sm:$0xff]  }
 0xa55   : > { %9667 = vmatpush1.bf16.msra.mxu1 %v12152_v29  ;;  %v12193_v29 = vld [vmem:[#allocation19 + $0x13c] ss:$12 sps:$4 sm:$0xff]  }
 0xa56   : > { %9668 = vmatprep.subr.bf16.mxu1 %v12157_v57  ;;  %v12132_v57 = vld [vmem:[#allocation16 + $0x430] ss:$40 sps:$4 sm:$0xff]  }
 0xa57   : > { %7946 = vmatpush1.bf16.msra.mxu0 %v12096_v23  ;;  %v12137_v23 = vld [vmem:[#allocation16 + $0x484] ss:$40 sps:$4 sm:$0xff]  }
 0xa58   : > { %7947 = vmatprep.subr.bf16.mxu0 %v12101_v17  ;;  %v12191_v17 = vld [vmem:[#allocation19 + $0x138] ss:$12 sps:$4 sm:$0xff]  }
 0xa59   : > { %9669 = vmatpush1.bf16.msra.mxu1 %v12155_v20  ;;  %v12196_v20 = vld [vmem:[#allocation19 + $0x154] ss:$12 sps:$4 sm:$0xff]  }
 0xa5a   : > { %9670 = vmatprep.subr.bf16.mxu1 %v12160_v6  ;;  %v12135_v6 = vld [vmem:[#allocation16 + $0x480] ss:$40 sps:$4 sm:$0xff]  }
 0xa5b   : > { %7948 = vmatpush1.bf16.msra.mxu0 %v12099_v1  ;;  %v12140_v1 = vld [vmem:[#allocation16 + $0x4d4] ss:$40 sps:$4 sm:$0xff]  }
 0xa5c   : > { %7949 = vmatprep.subr.bf16.mxu0 %v12104_v24  ;;  %v12194_v24 = vld [vmem:[#allocation19 + $0x150] ss:$12 sps:$4 sm:$0xff]  }
 0xa5d   : > { %9671 = vmatpush1.bf16.msra.mxu1 %v12158_v5  ;;  %v12199_v5 = vld [vmem:[#allocation19 + $0x16c] ss:$12 sps:$4 sm:$0xff]  }
 0xa5e   : > { %9672 = vmatprep.subr.bf16.mxu1 %v12163_v61  ;;  %v12138_v61 = vld [vmem:[#allocation16 + $0x4d0] ss:$40 sps:$4 sm:$0xff]  }
 0xa5f   : > { %7950 = vmatpush1.bf16.msra.mxu0 %v12102_v14  ;;  %v12143_v14 = vld [vmem:[#allocation16 + $0x524] ss:$40 sps:$4 sm:$0xff]  }
 0xa60   : > { %7951 = vmatprep.subr.bf16.mxu0 %v12107_v0  ;;  %v12197_v0 = vld [vmem:[#allocation19 + $0x168] ss:$12 sps:$4 sm:$0xff]  }
 0xa61   : > { %9673 = vmatpush1.bf16.msra.mxu1 %v12161_v43  ;;  %v12202_v43 = vld [vmem:[#allocation19 + $0x184] ss:$12 sps:$4 sm:$0xff]  }
 0xa62   : > { %9674 = vmatprep.subr.bf16.mxu1 %v12166_v58  ;;  %v12141_v58 = vld [vmem:[#allocation16 + $0x520] ss:$40 sps:$4 sm:$0xff]  }
 0xa63   : > { %7952 = vmatpush1.bf16.msra.mxu0 %v12105_v28  ;;  %v12146_v28 = vld [vmem:[#allocation16 + $0x574] ss:$40 sps:$4 sm:$0xff]  }
 0xa64   : > { %7953 = vmatprep.subr.bf16.mxu0 %v12110_v8  ;;  %v12144_v8 = vld [vmem:[#allocation16 + $0x570] ss:$40 sps:$4 sm:$0xff]  }
 0xa65   : > { %9675 = vmatpush1.bf16.msra.mxu1 %v12164_v15  ;;  %v12149_v15 = vld [vmem:[#allocation16 + $0x5c4] ss:$40 sps:$4 sm:$0xff]  }
 0xa66   : > { %9676 = vmatprep.subr.bf16.mxu1 %v12169_v3  ;;  %v6552_v3 = vld [vmem:[#allocation16 + $0x610] sm:$0xff] }
 0xa67   : > { %7954 = vmatpush1.bf16.msra.mxu0 %v12108_v55  ;;  %v12147_v55 = vld [vmem:[#allocation16 + $0x5c0] ss:$40 sps:$4 sm:$0xff]  }
 0xa68   : > { %7955 = vmatprep.subr.bf16.mxu0 %v12113_v27  ;;  %v10837_v27 = vcombine.high %v6552_v3, %v6552_v3 }
 0xa69   : > { %9677 = vmatpush1.bf16.msra.mxu1 %v12167_v33  ;;  %v10836_v33 = vcombine.low %v6552_v3, %v6552_v3 }
 0xa6a   : > { %9678 = vmatprep.subr.bf16.mxu1 %v12172_v18 }
 0xa6b   : > { %7956 = vmatpush1.bf16.msra.mxu0 %v12111_v52  ;;  %v7610_v18 = vsel %vm1650_vm1, %v10836_v33, 0  ;;  %v12217_v52 = vld [vmem:[#allocation19 + $0x304] ss:$12 sps:$4 sm:$0xff]  }
 0xa6c   : > { %7957 = vmatprep.subr.bf16.mxu0 %v12116_v50  ;;  %v12223_v50 = vld [vmem:[#allocation19 + $0x31c] ss:$12 sps:$4 sm:$0xff]   ;;  %v12331_v33 = vld [vmem:[#allocation19 + $0x604] ss:$12 sps:$4 sm:$0xff]  }
 0xa6d   : > { %9679 = vmatpush1.bf16.msra.mxu1 %v12170_v19  ;;  %v12221_v19 = vld [vmem:[#allocation19 + $0x318] ss:$12 sps:$4 sm:$0xff]  }
 0xa6e   : > { %9680 = vmatprep.subr.bf16.mxu1 %v12175_v60  ;;  %v12229_v60 = vld [vmem:[#allocation19 + $0x334] ss:$12 sps:$4 sm:$0xff]  }
 0xa6f   : > { %7958 = vmatpush1.bf16.msra.mxu0 %v12114_v12  ;;  %v12227_v12 = vld [vmem:[#allocation19 + $0x330] ss:$12 sps:$4 sm:$0xff]  }
 0xa70   : > { %7959 = vmatprep.subr.bf16.mxu0 %v12119_v16  ;;  %v12235_v16 = vld [vmem:[#allocation19 + $0x34c] ss:$12 sps:$4 sm:$0xff]  }
 0xa71   : > { %9681 = vmatpush1.bf16.msra.mxu1 %v12173_v26  ;;  %v12233_v26 = vld [vmem:[#allocation19 + $0x348] ss:$12 sps:$4 sm:$0xff]  }
 0xa72   : > { %9682 = vmatprep.subr.bf16.mxu1 %v12178_v30  ;;  %v12241_v30 = vld [vmem:[#allocation19 + $0x364] ss:$12 sps:$4 sm:$0xff]  }
 0xa73   : > { %7960 = vmatpush1.bf16.msra.mxu0 %v12117_v53  ;;  %v12239_v53 = vld [vmem:[#allocation19 + $0x360] ss:$12 sps:$4 sm:$0xff]  }
 0xa74   : > { %7961 = vmatprep.subr.bf16.mxu0 %v12122_v59  ;;  %v12247_v59 = vld [vmem:[#allocation19 + $0x37c] ss:$12 sps:$4 sm:$0xff]  }
 0xa75   : > { %9683 = vmatpush1.bf16.msra.mxu1 %v12176_v62  ;;  %v12245_v62 = vld [vmem:[#allocation19 + $0x378] ss:$12 sps:$4 sm:$0xff]  }
 0xa76   : > { %9684 = vmatprep.subr.bf16.mxu1 %v12181_v49  ;;  %v12251_v49 = vld [vmem:[#allocation19 + $0x390] ss:$12 sps:$4 sm:$0xff]  }
 0xa77   : > { %7962 = vmatpush1.bf16.msra.mxu0 %v12120_v54  ;;  %v12259_v54 = vld [vmem:[#allocation19 + $0x3ac] ss:$12 sps:$4 sm:$0xff]  }
 0xa78   : > { %7963 = vmatprep.subr.bf16.mxu0 %v12125_v21  ;;  %v12257_v21 = vld [vmem:[#allocation19 + $0x3a8] ss:$12 sps:$4 sm:$0xff]  }
 0xa79   : > { %9685 = vmatpush1.bf16.msra.mxu1 %v12179_v56  ;;  %v12265_v56 = vld [vmem:[#allocation19 + $0x3c4] ss:$12 sps:$4 sm:$0xff]  }
 0xa7a   : > { %9686 = vmatprep.subr.bf16.mxu1 %v12184_v25  ;;  %v12263_v25 = vld [vmem:[#allocation19 + $0x3c0] ss:$12 sps:$4 sm:$0xff]  }
 0xa7b   : > { %7964 = vmatpush1.bf16.msra.mxu0 %v12123_v32  ;;  %v12271_v32 = vld [vmem:[#allocation19 + $0x3dc] ss:$12 sps:$4 sm:$0xff]  }
 0xa7c   : > { %7965 = vmatprep.subr.bf16.mxu0 %v12128_v4  ;;  %v12269_v4 = vld [vmem:[#allocation19 + $0x3d8] ss:$12 sps:$4 sm:$0xff]  }
 0xa7d   : > { %9687 = vmatpush1.bf16.msra.mxu1 %v12182_v40  ;;  %v12277_v40 = vld [vmem:[#allocation19 + $0x3f4] ss:$12 sps:$4 sm:$0xff]  }
 0xa7e   : > { %9688 = vmatprep.subr.bf16.mxu1 %v12187_v41  ;;  %v12275_v41 = vld [vmem:[#allocation19 + $0x3f0] ss:$12 sps:$4 sm:$0xff]  }
 0xa7f   : > { %7966 = vmatpush1.bf16.msra.mxu0 %v12126_v44  ;;  %v12283_v44 = vld [vmem:[#allocation19 + $0x40c] ss:$12 sps:$4 sm:$0xff]  }
 0xa80   : > { %7967 = vmatprep.subr.bf16.mxu0 %v12131_v46  ;;  %v12281_v46 = vld [vmem:[#allocation19 + $0x408] ss:$12 sps:$4 sm:$0xff]  }
 0xa81   : > { %9689 = vmatpush1.bf16.msra.mxu1 %v12185_v51  ;;  %v12289_v51 = vld [vmem:[#allocation19 + $0x424] ss:$12 sps:$4 sm:$0xff]  }
 0xa82   : > { %9690 = vmatprep.subr.bf16.mxu1 %v12190_v35  ;;  %v14389_v35 = vld [vmem:[#allocation17] sm:$0xff] }
 0xa83   : > { %7968 = vmatpush1.bf16.msra.mxu0 %v12129_v10  ;;  %v12287_v10 = vld [vmem:[#allocation19 + $0x420] ss:$12 sps:$4 sm:$0xff]  }
 0xa84   : > { %7969 = vmatprep.subr.bf16.mxu0 %v12134_v47  ;;  %v12295_v47 = vld [vmem:[#allocation19 + $0x43c] ss:$12 sps:$4 sm:$0xff]  }
 0xa85   : > { %9691 = vmatpush1.bf16.msra.mxu1 %v12188_v42  ;;  %v6560_v42 = vrot.slane %v14389_v35, %v13541_v37 }
 0xa86   : > { %9692 = vmatprep.subr.bf16.mxu1 %v12193_v29  ;;  %v6564_v29 = vrot.slane %v14389_v35, %v13538_v36 }
 0xa87   : > { %7970 = vmatpush1.bf16.msra.mxu0 %v12132_v57  ;;  %v6572_v57 = vrot.slane %v14389_v35, %v841_v39 }
 0xa88   : > { %7971 = vmatprep.subr.bf16.mxu0 %v12137_v23  ;;  %v12293_v23 = vld [vmem:[#allocation19 + $0x438] ss:$12 sps:$4 sm:$0xff]  }
 0xa89   : > { %9693 = vmatpush1.bf16.msra.mxu1 %v12191_v17  ;;  %v12301_v17 = vld [vmem:[#allocation19 + $0x454] ss:$12 sps:$4 sm:$0xff]  }
 0xa8a   : > { %9694 = vmatprep.subr.bf16.mxu1 %v12196_v20 }
 0xa8b   : > { %7972 = vmatpush1.bf16.msra.mxu0 %v12135_v6 }
 0xa8c   : > { %7973 = vmatprep.subr.bf16.mxu0 %v12140_v1 }
 0xa8d   : > { %9695 = vmatpush1.bf16.msra.mxu1 %v12194_v24 }
 0xa8e   : > { %9696 = vmatprep.subr.bf16.mxu1 %v12199_v5 }
 0xa8f   : > { %7974 = vmatpush1.bf16.msra.mxu0 %v12138_v61 }
 0xa90   : > { %7984 = vmatprep.subr.bf16.mxu0 %v12143_v14 }
 0xa91   : > { %9697 = vmatpush1.bf16.msra.mxu1 %v12197_v0 }
 0xa92   : > { %7976 = vmatmul.mubr.bf16.vlgmr.msra.gmra.mrb[120].mxu0 %v14347_v38  ;;  %9707 = vmatprep.subr.bf16.mxu1 %v12202_v43  ;;  %v12215_v38 = vld [vmem:[#allocation19 + $0x300] ss:$12 sps:$4 sm:$0xff]  }
 0xa93   : > { %7985 = vmatpush1.bf16.msra.mxu0 %v12141_v58  ;;  %8016 = vmatprep.mubr.bf16.mxu0 %v12997_v7  ;;  %v12299_v58 = vld [vmem:[#allocation19 + $0x450] ss:$12 sps:$4 sm:$0xff]  }
 0xa94   : > { %7986 = vmatprep.subr.bf16.mxu0 %v12146_v28 }
 0xa97   : > { %7987 = vmatpush1.bf16.msra.mxu0 %v12144_v8  ;;  %v12307_v8 = vld [vmem:[#allocation19 + $0x46c] ss:$12 sps:$4 sm:$0xff]  }
 0xa98   : > { %7988 = vmatprep.subr.bf16.mxu0 %v12149_v15 }
 0xa9b   : > { %7989 = vmatpush1.bf16.msra.mxu0 %v12147_v55 }
 0xa9c   : > { %10846 = vmatprep.subr.msk.bf16.mxu0 %vm1650_vm1, %v10837_v27  ;;  %v12305_v27 = vld [vmem:[#allocation19 + $0x468] ss:$12 sps:$4 sm:$0xff]  }
 0xa9f   : > { %7991 = vmatpush1.bf16.msra.mxu0 %v7610_v18 }
 0xaa0   : > { %9748 = vmatprep.subr.bf16.mxu0 %v12217_v52 }
 0xaa2   : > { %10847 = vmatmul.mubr.msk.bf16.vlgmr.msra.gmra.mrb[120].mxu0 %vm604_vm0, %v14362_v48  ;;  %v12253_v48 = vld [vmem:[#allocation19 + $0x394] ss:$12 sps:$4 sm:$0xff]  }
 0xaa3   : > { %9749 = vmatpush1.bf16.msra.mxu0 %v12215_v38 }
 0xaa4   : > { %9750 = vmatprep.subr.bf16.mxu0 %v12223_v50 }
 0xaa7   : > { %9751 = vmatpush1.bf16.msra.mxu0 %v12221_v19 }
 0xaa8   : > { %9752 = vmatprep.subr.bf16.mxu0 %v12229_v60 }
 0xaab   : > { %9753 = vmatpush1.bf16.msra.mxu0 %v12227_v12 }
 0xaac   : > { %9754 = vmatprep.subr.bf16.mxu0 %v12235_v16 }
 0xaaf   : > { %9755 = vmatpush1.bf16.msra.mxu0 %v12233_v26 }
 0xab0   : > { %9756 = vmatprep.subr.bf16.mxu0 %v12241_v30 }
 0xab3   : > { %9757 = vmatpush1.bf16.msra.mxu0 %v12239_v53 }
 0xab4   : > { %9758 = vmatprep.subr.bf16.mxu0 %v12247_v59 }
 0xab7   : > { %9759 = vmatpush1.bf16.msra.mxu0 %v12245_v62 }
 0xab8   : > { %9760 = vmatprep.subr.bf16.mxu0 %v12253_v48  ;;  %v12200_v48 = vld [vmem:[#allocation19 + $0x180] ss:$12 sps:$4 sm:$0xff]  }
 0xabb   : > { %9761 = vmatpush1.bf16.msra.mxu0 %v12251_v49 }
 0xabc   : > { %9762 = vmatprep.subr.bf16.mxu0 %v12259_v54  ;;  %v12205_v54 = vld [vmem:[#allocation19 + $0x19c] ss:$12 sps:$4 sm:$0xff]  }
 0xabf   : > { %9763 = vmatpush1.bf16.msra.mxu0 %v12257_v21 }
 0xac0   : > { %9764 = vmatprep.subr.bf16.mxu0 %v12265_v56  ;;  %v12203_v56 = vld [vmem:[#allocation19 + $0x198] ss:$12 sps:$4 sm:$0xff]  }
 0xac3   : > { %9765 = vmatpush1.bf16.msra.mxu0 %v12263_v25  ;;  %v12208_v25 = vld [vmem:[#allocation19 + $0x1b4] ss:$12 sps:$4 sm:$0xff]  }
 0xac4   : > { %9766 = vmatprep.subr.bf16.mxu0 %v12271_v32  ;;  %v12206_v32 = vld [vmem:[#allocation19 + $0x1b0] ss:$12 sps:$4 sm:$0xff]  }
 0xac7   : > { %9767 = vmatpush1.bf16.msra.mxu0 %v12269_v4  ;;  %v12211_v4 = vld [vmem:[#allocation19 + $0x1cc] ss:$12 sps:$4 sm:$0xff]  }
 0xac8   : > { %9768 = vmatprep.subr.bf16.mxu0 %v12277_v40  ;;  %v12209_v40 = vld [vmem:[#allocation19 + $0x1c8] ss:$12 sps:$4 sm:$0xff]  }
 0xacb   : > { %9769 = vmatpush1.bf16.msra.mxu0 %v12275_v41  ;;  %v12214_v41 = vld [vmem:[#allocation19 + $0x1e4] ss:$12 sps:$4 sm:$0xff]  }
 0xacc   : > { %9770 = vmatprep.subr.bf16.mxu0 %v12283_v44  ;;  %v12212_v44 = vld [vmem:[#allocation19 + $0x1e0] ss:$12 sps:$4 sm:$0xff]  }
 0xacf   : > { %9771 = vmatpush1.bf16.msra.mxu0 %v12281_v46  ;;  %v12220_v46 = vld [vmem:[#allocation19 + $0x1fc] ss:$12 sps:$4 sm:$0xff]  }
 0xad0   : > { %9772 = vmatprep.subr.bf16.mxu0 %v12289_v51  ;;  %v12218_v51 = vld [vmem:[#allocation19 + $0x1f8] ss:$12 sps:$4 sm:$0xff]  }
 0xad3   : > { %9773 = vmatpush1.bf16.msra.mxu0 %v12287_v10  ;;  %v12226_v10 = vld [vmem:[#allocation19 + $0x214] ss:$12 sps:$4 sm:$0xff]  }
 0xad4   : > { %9774 = vmatprep.subr.bf16.mxu0 %v12295_v47  ;;  %v12224_v47 = vld [vmem:[#allocation19 + $0x210] ss:$12 sps:$4 sm:$0xff]  }
 0xad5   : > { %v7690_v20 = vpop.f32.mrb[112].mxu0  ;;  %v14398_v6 = vpop.f32.mrb[100].mxu1 }
 0xad6   : > { %v11509_v1 = vadd.f32 %v7690_v20, %v6560_v42  ;;  %v7692_v24 = vpop.f32.mrb[113].mxu0  ;;  %v7774_v5 = vpop.f32.mrb[101].mxu1  ;;  %v12232_v42 = vld [vmem:[#allocation19 + $0x22c] ss:$12 sps:$4 sm:$0xff]   ;;  %v12244_v20 = vld [vmem:[#allocation19 + $0x25c] ss:$12 sps:$4 sm:$0xff]  }
 0xad7   : > { %v11510_v61 = vadd.f32 %v7692_v24, %v6564_v29  ;;  %v11512_v14 = vadd.f32 %v7774_v5, %v6572_v57  ;;  %v7694_v0 = vpop.f32.mrb[114].mxu0  ;;  %v7776_v43 = vpop.f32.mrb[102].mxu1  ;;  %9775 = vmatpush1.bf16.msra.mxu0 %v12293_v23  ;;  %v12230_v29 = vld [vmem:[#allocation19 + $0x228] ss:$12 sps:$4 sm:$0xff]   ;;  %v12238_v57 = vld [vmem:[#allocation19 + $0x244] ss:$12 sps:$4 sm:$0xff]   ;;  %v6568_v23 = vrot.slane %v14389_v35, %v13566_v31 }
 0xad8   : > { %v8035_v28 = vmul.f32 0.70710677, %v11509_v1  ;;  %9776 = vmatprep.subr.bf16.mxu0 %v12301_v17  ;;  %v7695_v3 = vpop.f32.mrb[115].mxu0  ;;  %v7777_v55 = vpop.f32.mrb[103].mxu1  ;;  %v8025_v50 = vmul.f32 0.5, %v11509_v1 }
 0xad9   : > { %v8036_v39 = vmul.f32 0.70710677, %v11510_v61  ;;  %v8038_v15 = vmul.f32 0.70710677, %v11512_v14  ;;  %v8026_v60 = vmul.f32 0.5, %v11510_v61  ;;  %v8028_v26 = vmul.f32 0.5, %v11512_v14 }
 0xada   : > { %12516 = verf.f32 %v8035_v28  ;;  %v12236_v17 = vld [vmem:[#allocation19 + $0x240] ss:$12 sps:$4 sm:$0xff]   ;;  %v11511_v1 = vadd.f32 %v14398_v6, %v6568_v23  ;;  %v12242_v24 = vld [vmem:[#allocation19 + $0x258] ss:$12 sps:$4 sm:$0xff]   ;;  %v12248_v14 = vld [vmem:[#allocation19 + $0x270] ss:$12 sps:$4 sm:$0xff]   ;;  %v6576_v3 = vrot.slane %v14389_v35, %v845_v63 }
 0xadb   : > { %9777 = vmatpush1.bf16.msra.mxu0 %v12299_v58  ;;  %12518 = verf.f32 %v8036_v39  ;;  %v12250_v5 = vld [vmem:[#allocation19 + $0x274] ss:$12 sps:$4 sm:$0xff]   ;;  %v12256_v0 = vld [vmem:[#allocation19 + $0x28c] ss:$12 sps:$4 sm:$0xff]   ;;  %v12262_v58 = vld [vmem:[#allocation19 + $0x2a4] ss:$12 sps:$4 sm:$0xff]  }
 0xadc   : > { %9778 = vmatprep.subr.bf16.mxu0 %v12307_v8  ;;  %12520 = verf.f32 %v8038_v15  ;;  %v8037_v61 = vmul.f32 0.70710677, %v11511_v1  ;;  %v12254_v43 = vld [vmem:[#allocation19 + $0x288] ss:$12 sps:$4 sm:$0xff]   ;;  %v12260_v28 = vld [vmem:[#allocation19 + $0x2a0] ss:$12 sps:$4 sm:$0xff]  }
 0xadd   : > { %v12268_v8 = vld [vmem:[#allocation19 + $0x2bc] ss:$12 sps:$4 sm:$0xff]   ;;  %v12266_v6 = vld [vmem:[#allocation19 + $0x2b8] ss:$12 sps:$4 sm:$0xff]   ;;  %v12274_v39 = vld [vmem:[#allocation19 + $0x2d4] ss:$12 sps:$4 sm:$0xff]  }
 0xade   : > { %12522 = verf.f32 %v8037_v61  ;;  %v12272_v55 = vld [vmem:[#allocation19 + $0x2d0] ss:$12 sps:$4 sm:$0xff]  }
 0xadf   : > { %9779 = vmatpush1.bf16.msra.mxu0 %v12305_v27  ;;  %v6580_v27 = vrot.slane %v14389_v35, %v849_v11 }
 0xae0   : > { %9830 = vmatprep.subr.bf16.mxu0 %v12331_v33 }
 0xae4   : > { %v12517_v18 = vpop.eup %12516 }
 0xae5   : > { %v8055_v52 = vadd.f32 1.0, %v12517_v18  ;;  %v12519_v38 = vpop.eup %12518  ;;  %v6588_v18 = vrot.slane %v14389_v35, %v857_v22 }
 0xae6   : > { %v12521_v19 = vpop.eup %12520  ;;  %v8056_v12 = vadd.f32 1.0, %v12519_v38 }
 0xae7   : > { %v8065_v16 = vmul.f32 %v8055_v52, %v8025_v50  ;;  %v8058_v30 = vadd.f32 1.0, %v12521_v19  ;;  %v12280_v52 = vld [vmem:[#allocation19 + $0x2ec] ss:$12 sps:$4 sm:$0xff]   ;;  %v8027_v50 = vmul.f32 0.5, %v11511_v1  ;;  %v12302_v1 = vld [vmem:[#allocation19 + $0x4c8] ss:$12 sps:$4 sm:$0xff]  }
 0xae8   : > { %v8066_v53 = vmul.f32 %v8056_v12, %v8026_v60  ;;  %v12523_v15 = vpop.eup %12522 }
 0xae9   : > { %v8068_v59 = vmul.f32 %v8058_v30, %v8028_v26  ;;  %v14402_v49 = vpack.c.bf16 %v8065_v16, %v8065_v16  ;;  %v8057_v33 = vadd.f32 1.0, %v12523_v15  ;;  %v12278_v30 = vld [vmem:[#allocation19 + $0x2e8] ss:$12 sps:$4 sm:$0xff]  }
 0xaea   : > { %v14400_v62 = vpack.c.bf16 %v8066_v53, %v8066_v53  ;;  %v12313_v15 = vld [vmem:[#allocation19 + $0x4fc] ss:$12 sps:$4 sm:$0xff]  }
 0xaeb   : > { %v14405_v21 = vpack.c.bf16 %v8068_v59, %v8068_v59  ;;  %v8067_v53 = vmul.f32 %v8057_v33, %v8027_v50  ;;  %v12316_v33 = vld [vmem:[#allocation19 + $0x514] ss:$12 sps:$4 sm:$0xff]   ;;  %v12319_v50 = vld [vmem:[#allocation19 + $0x52c] ss:$12 sps:$4 sm:$0xff]  }
 0xaec   : > { %9698 = vmatprep.mubr.bf16.mxu1 %v14400_v62 }
 0xaed   : > { %9699 = vmatmul.mubr.bf16.vlgmr.msra.gmra.mrb[108].mxu1 %v14402_v49 }
 0xaee   : > { %9708 = vmatpush1.bf16.msra.mxu1 %v12200_v48  ;;  %9739 = vmatprep.mubr.bf16.mxu1 %v14405_v21 }
 0xaef   : > { %9709 = vmatprep.subr.bf16.mxu1 %v12205_v54 }
 0xaf2   : > { %9710 = vmatpush1.bf16.msra.mxu1 %v12203_v56  ;;  %v12286_v56 = vld [vmem:[#allocation19 + $0x484] ss:$12 sps:$4 sm:$0xff]  }
 0xaf3   : > { %9711 = vmatprep.subr.bf16.mxu1 %v12208_v25 }
 0xaf6   : > { %9712 = vmatpush1.bf16.msra.mxu1 %v12206_v32 }
 0xaf7   : > { %9713 = vmatprep.subr.bf16.mxu1 %v12211_v4  ;;  %v12284_v4 = vld [vmem:[#allocation19 + $0x480] ss:$12 sps:$4 sm:$0xff]  }
 0xafa   : > { %9714 = vmatpush1.bf16.msra.mxu1 %v12209_v40  ;;  %v14423_v40 = vpack.c.bf16 %v8067_v53, %v8067_v53  ;;  %v12320_v53 = vld [vmem:[#allocation19 + $0x540] ss:$12 sps:$4 sm:$0xff]  }
 0xafb   : > { %9715 = vmatprep.subr.bf16.mxu1 %v12214_v41  ;;  %v12292_v41 = vld [vmem:[#allocation19 + $0x49c] ss:$12 sps:$4 sm:$0xff]  }
 0xafe   : > { %9716 = vmatpush1.bf16.msra.mxu1 %v12212_v44  ;;  %v12290_v44 = vld [vmem:[#allocation19 + $0x498] ss:$12 sps:$4 sm:$0xff]  }
 0xaff   : > { %9717 = vmatprep.subr.bf16.mxu1 %v12220_v46  ;;  %v12298_v46 = vld [vmem:[#allocation19 + $0x4b4] ss:$12 sps:$4 sm:$0xff]  }
 0xb02   : > { %9718 = vmatpush1.bf16.msra.mxu1 %v12218_v51  ;;  %v12296_v51 = vld [vmem:[#allocation19 + $0x4b0] ss:$12 sps:$4 sm:$0xff]  }
 0xb03   : > { %9719 = vmatprep.subr.bf16.mxu1 %v12226_v10 }
 0xb06   : > { %9720 = vmatpush1.bf16.msra.mxu1 %v12224_v47  ;;  %v12304_v47 = vld [vmem:[#allocation19 + $0x4cc] ss:$12 sps:$4 sm:$0xff]  }
 0xb07   : > { %9721 = vmatprep.subr.bf16.mxu1 %v12232_v42 }
 0xb0a   : > { %9722 = vmatpush1.bf16.msra.mxu1 %v12230_v29 }
 0xb0b   : > { %9723 = vmatprep.subr.bf16.mxu1 %v12238_v57 }
 0xb0e   : > { %9724 = vmatpush1.bf16.msra.mxu1 %v12236_v17 }
 0xb0f   : > { %9725 = vmatprep.subr.bf16.mxu1 %v12244_v20 }
 0xb12   : > { %9726 = vmatpush1.bf16.msra.mxu1 %v12242_v24 }
 0xb13   : > { %9727 = vmatprep.subr.bf16.mxu1 %v12250_v5 }
 0xb16   : > { %9728 = vmatpush1.bf16.msra.mxu1 %v12248_v14  ;;  %v12310_v14 = vld [vmem:[#allocation19 + $0x4e4] ss:$12 sps:$4 sm:$0xff]  }
 0xb17   : > { %9729 = vmatprep.subr.bf16.mxu1 %v12256_v0 }
 0xb1a   : > { %9730 = vmatpush1.bf16.msra.mxu1 %v12254_v43 }
 0xb1b   : > { %9731 = vmatprep.subr.bf16.mxu1 %v12262_v58 }
 0xb1e   : > { %9732 = vmatpush1.bf16.msra.mxu1 %v12260_v28  ;;  %v12308_v28 = vld [vmem:[#allocation19 + $0x4e0] ss:$12 sps:$4 sm:$0xff]  }
 0xb1f   : > { %9733 = vmatprep.subr.bf16.mxu1 %v12268_v8  ;;  %v12329_v8 = vld [vmem:[#allocation19 + $0x600] ss:$12 sps:$4 sm:$0xff]  }
 0xb22   : > { %9734 = vmatpush1.bf16.msra.mxu1 %v12266_v6 }
 0xb23   : > { %9735 = vmatprep.subr.bf16.mxu1 %v12274_v39 }
 0xb25   : > { %v7854_v38 = vpop.f32.mrb[116].mxu0 }
 0xb26   : > { %v11513_v19 = vadd.f32 %v7854_v38, %v6576_v3  ;;  %v14421_v60 = vpop.f32.mrb[104].mxu1  ;;  %v7856_v12 = vpop.f32.mrb[117].mxu0  ;;  %9736 = vmatpush1.bf16.msra.mxu1 %v12272_v55  ;;  %v12337_v3 = vld [vmem:[#allocation19 + $0x61c] ss:$12 sps:$4 sm:$0xff]   ;;  %v12311_v55 = vld [vmem:[#allocation19 + $0x4f8] ss:$12 sps:$4 sm:$0xff]  }
 0xb27   : > { %v11514_v63 = vadd.f32 %v7856_v12, %v6580_v27  ;;  %v7938_v16 = vpop.f32.mrb[105].mxu1  ;;  %v7858_v26 = vpop.f32.mrb[118].mxu0  ;;  %9737 = vmatprep.subr.bf16.mxu1 %v12280_v52  ;;  %v12335_v27 = vld [vmem:[#allocation19 + $0x618] ss:$12 sps:$4 sm:$0xff]   ;;  %v12314_v52 = vld [vmem:[#allocation19 + $0x510] ss:$12 sps:$4 sm:$0xff]  }
 0xb28   : > { %v8039_v11 = vmul.f32 0.70710677, %v11513_v19  ;;  %v11516_v59 = vadd.f32 %v7938_v16, %v6588_v18  ;;  %v7940_v48 = vpop.f32.mrb[106].mxu1  ;;  %v7859_v54 = vpop.f32.mrb[119].mxu0  ;;  %v8029_v57 = vmul.f32 0.5, %v11513_v19 }
 0xb29   : > { %v8040_v22 = vmul.f32 0.70710677, %v11514_v63  ;;  %v7941_v32 = vpop.f32.mrb[107].mxu1  ;;  %v8030_v17 = vmul.f32 0.5, %v11514_v63  ;;  %v12343_v18 = vld [vmem:[#allocation19 + $0x634] ss:$12 sps:$4 sm:$0xff]  }
 0xb2a   : > { %12524 = verf.f32 %v8039_v11  ;;  %v8042_v25 = vmul.f32 0.70710677, %v11516_v59  ;;  %9738 = vmatpush1.bf16.msra.mxu1 %v12278_v30  ;;  %v8032_v5 = vmul.f32 0.5, %v11516_v59  ;;  %v12341_v38 = vld [vmem:[#allocation19 + $0x630] ss:$12 sps:$4 sm:$0xff]   ;;  %v6584_v30 = vrot.slane %v14389_v35, %v853_v9 }
 0xb2b   : > { %12526 = verf.f32 %v8040_v22  ;;  %9789 = vmatprep.subr.bf16.mxu1 %v12286_v56  ;;  %v12349_v19 = vld [vmem:[#allocation19 + $0x64c] ss:$12 sps:$4 sm:$0xff]   ;;  %v12317_v12 = vld [vmem:[#allocation19 + $0x528] ss:$12 sps:$4 sm:$0xff]   ;;  %v12322_v16 = vld [vmem:[#allocation19 + $0x544] ss:$12 sps:$4 sm:$0xff]  }
 0xb2c   : > { %12528 = verf.f32 %v8042_v25  ;;  %v12347_v63 = vld [vmem:[#allocation19 + $0x648] ss:$12 sps:$4 sm:$0xff]   ;;  %v12355_v26 = vld [vmem:[#allocation19 + $0x664] ss:$12 sps:$4 sm:$0xff]   ;;  %v12353_v11 = vld [vmem:[#allocation19 + $0x660] ss:$12 sps:$4 sm:$0xff]   ;;  %v11515_v54 = vadd.f32 %v14421_v60, %v6584_v30 }
 0xb2d   : > { %9740 = vmatmul.mubr.bf16.vlgmr.msra.gmra.mrb[112].mxu1 %v14423_v40  ;;  %v12325_v59 = vld [vmem:[#allocation19 + $0x55c] ss:$12 sps:$4 sm:$0xff]   ;;  %v12323_v56 = vld [vmem:[#allocation19 + $0x558] ss:$12 sps:$4 sm:$0xff]   ;;  %v12328_v25 = vld [vmem:[#allocation19 + $0x574] ss:$12 sps:$4 sm:$0xff]  }
 0xb2e   : > { %9790 = vmatpush1.bf16.msra.mxu1 %v12284_v4  ;;  %v12361_v48 = vld [vmem:[#allocation19 + $0x67c] ss:$12 sps:$4 sm:$0xff]   ;;  %v12359_v22 = vld [vmem:[#allocation19 + $0x678] ss:$12 sps:$4 sm:$0xff]   ;;  %v8041_v32 = vmul.f32 0.70710677, %v11515_v54 }
 0xb2f   : > { %9791 = vmatprep.subr.bf16.mxu1 %v12292_v41  ;;  %v12326_v9 = vld [vmem:[#allocation19 + $0x570] ss:$12 sps:$4 sm:$0xff]   ;;  %v12334_v4 = vld [vmem:[#allocation19 + $0x58c] ss:$12 sps:$4 sm:$0xff]   ;;  %v12332_v60 = vld [vmem:[#allocation19 + $0x588] ss:$12 sps:$4 sm:$0xff]  }
 0xb30   : > { %v12362_v35 = vld [vmem:[#allocation19 + $0x690] ss:$12 sps:$4 sm:$0xff]   ;;  %v12369_v41 = vld [vmem:[#allocation19 + $0x6ac] ss:$12 sps:$4 sm:$0xff]   ;;  %12530 = verf.f32 %v8041_v32  ;;  %v12385_v32 = vld [vmem:[#allocation19 + $0x128] ss:$12 sps:$4 sm:$0xff]  }
 0xb31   : > { %v12376_v30 = vld [vmem:[#allocation19 + $0x38] ss:$12 sps:$4 sm:$0xff]  }
 0xb32   : > { %9792 = vmatpush1.bf16.msra.mxu1 %v12290_v44  ;;  %v12367_v44 = vld [vmem:[#allocation19 + $0x6a8] ss:$12 sps:$4 sm:$0xff]  }
 0xb33   : > { %9793 = vmatprep.subr.bf16.mxu1 %v12298_v46  ;;  %v12340_v46 = vld [vmem:[#allocation19 + $0x5a4] ss:$12 sps:$4 sm:$0xff]  }
 0xb34   : > { %v12525_v10 = vpop.eup %12524 }
 0xb35   : > { %v8059_v42 = vadd.f32 1.0, %v12525_v10  ;;  %v12527_v29 = vpop.eup %12526  ;;  %v12338_v10 = vld [vmem:[#allocation19 + $0x5a0] ss:$12 sps:$4 sm:$0xff]  }
 0xb36   : > { %v12529_v23 = vpop.eup %12528  ;;  %v8060_v20 = vadd.f32 1.0, %v12527_v29  ;;  %9794 = vmatpush1.bf16.msra.mxu1 %v12296_v51  ;;  %v12374_v51 = vld [vmem:[#allocation19 + $0x6c4] ss:$12 sps:$4 sm:$0xff]   ;;  %v12379_v29 = vld [vmem:[#allocation19 + $0x6dc] ss:$12 sps:$4 sm:$0xff]  }
 0xb37   : > { %v8069_v24 = vmul.f32 %v8059_v42, %v8029_v57  ;;  %v8062_v61 = vadd.f32 1.0, %v12529_v23  ;;  %9795 = vmatprep.subr.bf16.mxu1 %v12304_v47  ;;  %v12372_v47 = vld [vmem:[#allocation19 + $0x6c0] ss:$12 sps:$4 sm:$0xff]   ;;  %v12346_v42 = vld [vmem:[#allocation19 + $0x5bc] ss:$12 sps:$4 sm:$0xff]  }
 0xb38   : > { %v8070_v0 = vmul.f32 %v8060_v20, %v8030_v17  ;;  %v12344_v57 = vld [vmem:[#allocation19 + $0x5b8] ss:$12 sps:$4 sm:$0xff]   ;;  %v12352_v17 = vld [vmem:[#allocation19 + $0x5d4] ss:$12 sps:$4 sm:$0xff]  }
 0xb39   : > { %v8072_v43 = vmul.f32 %v8062_v61, %v8032_v5  ;;  %v14428_v6 = vpack.c.bf16 %v8069_v24, %v8069_v24  ;;  %v12377_v23 = vld [vmem:[#allocation19 + $0x6d8] ss:$12 sps:$4 sm:$0xff]   ;;  %v12384_v20 = vld [vmem:[#allocation19 + $0x6f4] ss:$12 sps:$4 sm:$0xff]   ;;  %v12350_v24 = vld [vmem:[#allocation19 + $0x5d0] ss:$12 sps:$4 sm:$0xff]  }
 0xb3a   : > { %9796 = vmatpush1.bf16.msra.mxu1 %v12302_v1  ;;  %v14426_v58 = vpack.c.bf16 %v8070_v0, %v8070_v0  ;;  %v12531_v1 = vpop.eup %12530  ;;  %v12382_v5 = vld [vmem:[#allocation19 + $0x6f0] ss:$12 sps:$4 sm:$0xff]   ;;  %v12389_v0 = vld [vmem:[#allocation19 + $0x70c] ss:$12 sps:$4 sm:$0xff]  }
 0xb3b   : > { %9797 = vmatprep.subr.bf16.mxu1 %v12310_v14  ;;  %v14430_v39 = vpack.c.bf16 %v8072_v43, %v8072_v43  ;;  %v8061_v61 = vadd.f32 1.0, %v12531_v1  ;;  %v12358_v14 = vld [vmem:[#allocation19 + $0x5ec] ss:$12 sps:$4 sm:$0xff]   ;;  %v8031_v43 = vmul.f32 0.5, %v11515_v54  ;;  %v12403_v1 = vld [vmem:[#allocation19 + $0x3c8] ss:$12 sps:$4 sm:$0xff]  }
 0xb3c   : > { %9780 = vmatprep.mubr.bf16.mxu0 %v14426_v58 }
 0xb3d   : > { %9821 = vmatprep.mubr.bf16.mxu1 %v14430_v39  ;;  %9781 = vmatmul.mubr.bf16.vlgmr.msra.gmra.mrb[124].mxu0 %v14428_v6 }
 0xb3e   : > { %9798 = vmatpush1.bf16.msra.mxu1 %v12308_v28  ;;  %9831 = vmatpush1.bf16.msra.mxu0 %v12329_v8  ;;  %v12356_v28 = vld [vmem:[#allocation19 + $0x5e8] ss:$12 sps:$4 sm:$0xff]  }
 0xb3f   : > { %9799 = vmatprep.subr.bf16.mxu1 %v12313_v15  ;;  %9832 = vmatprep.subr.bf16.mxu0 %v12337_v3  ;;  %v12387_v8 = vld [vmem:[#allocation19 + $0x708] ss:$12 sps:$4 sm:$0xff]   ;;  %v8071_v15 = vmul.f32 %v8061_v61, %v8031_v43  ;;  %v12407_v43 = vld [vmem:[#allocation19 + $0x3e0] ss:$12 sps:$4 sm:$0xff]  }
 0xb40   : > { %v12365_v3 = vld [vmem:[#allocation19 + $0xc8] ss:$12 sps:$4 sm:$0xff]  }
 0xb42   : > { %9800 = vmatpush1.bf16.msra.mxu1 %v12311_v55  ;;  %9833 = vmatpush1.bf16.msra.mxu0 %v12335_v27  ;;  %v12394_v55 = vld [vmem:[#allocation19 + $0x724] ss:$12 sps:$4 sm:$0xff]   ;;  %v12366_v27 = vld [vmem:[#allocation19 + $0x8] ss:$12 sps:$4 sm:$0xff]  }
 0xb43   : > { %9801 = vmatprep.subr.bf16.mxu1 %v12316_v33  ;;  %9834 = vmatprep.subr.bf16.mxu0 %v12343_v18  ;;  %v14439_v33 = vpack.c.bf16 %v8071_v15, %v8071_v15  ;;  %v12370_v18 = vld [vmem:[#allocation19 + $0xe0] ss:$12 sps:$4 sm:$0xff]   ;;  %v12410_v15 = vld [vmem:[#allocation19 + $0x278] ss:$12 sps:$4 sm:$0xff]  }
 0xb46   : > { %9802 = vmatpush1.bf16.msra.mxu1 %v12314_v52  ;;  %9835 = vmatpush1.bf16.msra.mxu0 %v12341_v38  ;;  %v12392_v52 = vld [vmem:[#allocation19 + $0x720] ss:$12 sps:$4 sm:$0xff]   ;;  %v12399_v38 = vld [vmem:[#allocation19 + $0x73c] ss:$12 sps:$4 sm:$0xff]  }
 0xb47   : > { %9803 = vmatprep.subr.bf16.mxu1 %v12319_v50  ;;  %9836 = vmatprep.subr.bf16.mxu0 %v12349_v19  ;;  %v12371_v50 = vld [vmem:[#allocation19 + $0x20] ss:$12 sps:$4 sm:$0xff]   ;;  %v6554_v19 = vld [vmem:[#allocation17 + $0x8] sm:$0x3] }
 0xb4a   : > { %9804 = vmatpush1.bf16.msra.mxu1 %v12317_v12  ;;  %9837 = vmatpush1.bf16.msra.mxu0 %v12347_v63  ;;  %v12375_v12 = vld [vmem:[#allocation19 + $0xf8] ss:$12 sps:$4 sm:$0xff]  }
 0xb4b   : > { %9805 = vmatprep.subr.bf16.mxu1 %v12322_v16  ;;  %9838 = vmatprep.subr.bf16.mxu0 %v12355_v26  ;;  %v12397_v63 = vld [vmem:[#allocation19 + $0x738] ss:$12 sps:$4 sm:$0xff]   ;;  %v12402_v16 = vld [vmem:[#allocation19 + $0x248] ss:$12 sps:$4 sm:$0xff]   ;;  %v6592_v26 = vrot.slane %v6554_v19, %v13541_v37 }
 0xb4e   : > { %9806 = vmatpush1.bf16.msra.mxu1 %v12320_v53  ;;  %9839 = vmatpush1.bf16.msra.mxu0 %v12353_v11  ;;  %v6596_v53 = vrot.slane %v6554_v19, %v13538_v36  ;;  %v12380_v11 = vld [vmem:[#allocation19 + $0x110] ss:$12 sps:$4 sm:$0xff]   ;;  %v12421_v19 = vld [vmem:[#allocation19 + $0x368] ss:$12 sps:$4 sm:$0xff]  }
 0xb4f   : > { %9807 = vmatprep.subr.bf16.mxu1 %v12325_v59  ;;  %9840 = vmatprep.subr.bf16.mxu0 %v12361_v48 }
 0xb52   : > { %9808 = vmatpush1.bf16.msra.mxu1 %v12323_v56  ;;  %9841 = vmatpush1.bf16.msra.mxu0 %v12359_v22  ;;  %v12381_v22 = vld [vmem:[#allocation19 + $0x50] ss:$12 sps:$4 sm:$0xff]  }
 0xb53   : > { %9809 = vmatprep.subr.bf16.mxu1 %v12328_v25  ;;  %9842 = vmatprep.subr.bf16.mxu0 %v12364_v34 }
 0xb56   : > { %9810 = vmatpush1.bf16.msra.mxu1 %v12326_v9  ;;  %9843 = vmatpush1.bf16.msra.mxu0 %v12362_v35  ;;  %v12386_v35 = vld [vmem:[#allocation19 + $0x68] ss:$12 sps:$4 sm:$0xff]  }
 0xb57   : > { %9811 = vmatprep.subr.bf16.mxu1 %v12334_v4  ;;  %9844 = vmatprep.subr.bf16.mxu0 %v12369_v41  ;;  %v12390_v4 = vld [vmem:[#allocation19 + $0x140] ss:$12 sps:$4 sm:$0xff]  }
 0xb58   : > { %v12391_v41 = vld [vmem:[#allocation19 + $0x80] ss:$12 sps:$4 sm:$0xff]  }
 0xb5a   : > { %9812 = vmatpush1.bf16.msra.mxu1 %v12332_v60  ;;  %9845 = vmatpush1.bf16.msra.mxu0 %v12367_v44  ;;  %v12395_v60 = vld [vmem:[#allocation19 + $0x158] ss:$12 sps:$4 sm:$0xff]  }
 0xb5b   : > { %9813 = vmatprep.subr.bf16.mxu1 %v12340_v46  ;;  %9846 = vmatprep.subr.bf16.mxu0 %v12374_v51  ;;  %v12396_v44 = vld [vmem:[#allocation19 + $0x98] ss:$12 sps:$4 sm:$0xff]   ;;  %v12400_v51 = vld [vmem:[#allocation19 + $0x170] ss:$12 sps:$4 sm:$0xff]  }
 0xb5e   : > { %9814 = vmatpush1.bf16.msra.mxu1 %v12338_v10  ;;  %9847 = vmatpush1.bf16.msra.mxu0 %v12372_v47 }
 0xb5f   : > { %9815 = vmatprep.subr.bf16.mxu1 %v12346_v42  ;;  %9848 = vmatprep.subr.bf16.mxu0 %v12379_v29 }
 0xb62   : > { %9816 = vmatpush1.bf16.msra.mxu1 %v12344_v57  ;;  %9849 = vmatpush1.bf16.msra.mxu0 %v12377_v23 }
 0xb63   : > { %9817 = vmatprep.subr.bf16.mxu1 %v12352_v17  ;;  %9850 = vmatprep.subr.bf16.mxu0 %v12384_v20  ;;  %v12401_v17 = vld [vmem:[#allocation19 + $0xb0] ss:$12 sps:$4 sm:$0xff]  }
 0xb66   : > { %9818 = vmatpush1.bf16.msra.mxu1 %v12350_v24  ;;  %9851 = vmatpush1.bf16.msra.mxu0 %v12382_v5  ;;  %v12404_v5 = vld [vmem:[#allocation19 + $0x188] ss:$12 sps:$4 sm:$0xff]  }
 0xb67   : > { %9819 = vmatprep.subr.bf16.mxu1 %v12358_v14  ;;  %9852 = vmatprep.subr.bf16.mxu0 %v12389_v0  ;;  %v12405_v14 = vld [vmem:[#allocation19 + $0x308] ss:$12 sps:$4 sm:$0xff]   ;;  %v12406_v0 = vld [vmem:[#allocation19 + $0x260] ss:$12 sps:$4 sm:$0xff]  }
 0xb6a   : > { %9820 = vmatpush1.bf16.msra.mxu1 %v12356_v28  ;;  %9853 = vmatpush1.bf16.msra.mxu0 %v12387_v8  ;;  %v12408_v28 = vld [vmem:[#allocation19 + $0x1a0] ss:$12 sps:$4 sm:$0xff]  }
 0xb6b   : > { %11171 = vmatprep.subr.bf16.mxu1 %v12365_v3  ;;  %9854 = vmatprep.subr.bf16.mxu0 %v12394_v55  ;;  %v12409_v8 = vld [vmem:[#allocation19 + $0x320] ss:$12 sps:$4 sm:$0xff]   ;;  %v12411_v3 = vld [vmem:[#allocation19 + $0x3f8] ss:$12 sps:$4 sm:$0xff]  }
 0xb6c   : > { %v12412_v55 = vld [vmem:[#allocation19 + $0x1b8] ss:$12 sps:$4 sm:$0xff]  }
 0xb6d   : > { %9822 = vmatmul.mubr.bf16.vlgmr.msra.gmra.mrb[116].mxu1 %v14439_v33 }
 0xb6e   : > { %11172 = vmatpush3.bf16.msra.mxu1 %v12366_v27  ;;  %9903 = vmatprep.mubr.bf16.mxu1 %v14400_v62  ;;  %v12413_v27 = vld [vmem:[#allocation19 + $0x338] ss:$12 sps:$4 sm:$0xff]  }
 0xb6f   : > { %11173 = vmatprep.subr.bf16.mxu1 %v12370_v18  ;;  %9855 = vmatpush1.bf16.msra.mxu0 %v12392_v52  ;;  %v12414_v18 = vld [vmem:[#allocation19 + $0x290] ss:$12 sps:$4 sm:$0xff]  }
 0xb70   : > { %9856 = vmatprep.subr.bf16.mxu0 %v12399_v38  ;;  %v12416_v52 = vld [vmem:[#allocation19 + $0x1d0] ss:$12 sps:$4 sm:$0xff]   ;;  %v12418_v38 = vld [vmem:[#allocation19 + $0x2a8] ss:$12 sps:$4 sm:$0xff]  }
 0xb72   : > { %11174 = vmatpush3.bf16.msra.mxu1 %v12371_v50  ;;  %v12419_v50 = vld [vmem:[#allocation19 + $0x428] ss:$12 sps:$4 sm:$0xff]  }
 0xb73   : > { %11175 = vmatprep.subr.bf16.mxu1 %v12375_v12  ;;  %9857 = vmatpush1.bf16.msra.mxu0 %v12397_v63  ;;  %v12422_v12 = vld [vmem:[#allocation19 + $0x2c0] ss:$12 sps:$4 sm:$0xff]  }
 0xb74   : > { %11193 = vmatprep.subr.bf16.mxu0 %v12402_v16  ;;  %v12423_v63 = vld [vmem:[#allocation19 + $0x440] ss:$12 sps:$4 sm:$0xff]  }
 0xb75   : > { %v8018_v59 = vpop.f32.mrb[120].mxu0  ;;  %v12424_v16 = vld [vmem:[#allocation19 + $0x200] ss:$12 sps:$4 sm:$0xff]  }
 0xb76   : > { %v11517_v62 = vadd.f32 %v8018_v59, %v6592_v26  ;;  %v8020_v48 = vpop.f32.mrb[121].mxu0  ;;  %11176 = vmatpush3.bf16.msra.mxu1 %v12376_v30  ;;  %v12425_v26 = vld [vmem:[#allocation19 + $0x380] ss:$12 sps:$4 sm:$0xff]   ;;  %v12426_v30 = vld [vmem:[#allocation19 + $0x2d8] ss:$12 sps:$4 sm:$0xff]  }
 0xb77   : > { %v11518_v54 = vadd.f32 %v8020_v48, %v6596_v53  ;;  %v8022_v56 = vpop.f32.mrb[122].mxu0  ;;  %11177 = vmatprep.subr.bf16.mxu1 %v12380_v11  ;;  %v12427_v53 = vld [vmem:[#allocation19 + $0x458] ss:$12 sps:$4 sm:$0xff]   ;;  %v12431_v48 = vld [vmem:[#allocation19 + $0x470] ss:$12 sps:$4 sm:$0xff]  }
 0xb78   : > { %v8043_v25 = vmul.f32 0.70710677, %v11517_v62  ;;  %v8023_v34 = vpop.f32.mrb[123].mxu0  ;;  %v8033_v47 = vmul.f32 0.5, %v11517_v62  ;;  %v12428_v11 = vld [vmem:[#allocation19 + $0x218] ss:$12 sps:$4 sm:$0xff]  }
 0xb79   : > { %v8044_v9 = vmul.f32 0.70710677, %v11518_v54  ;;  %v8034_v29 = vmul.f32 0.5, %v11518_v54  ;;  %v12429_v59 = vld [vmem:[#allocation19 + $0x398] ss:$12 sps:$4 sm:$0xff]  }
 0xb7a   : > { %12532 = verf.f32 %v8043_v25  ;;  %11178 = vmatpush3.bf16.msra.mxu1 %v12381_v22  ;;  %v12430_v62 = vld [vmem:[#allocation19 + $0x2f0] ss:$12 sps:$4 sm:$0xff]   ;;  %v12434_v22 = vld [vmem:[#allocation19 + $0x548] ss:$12 sps:$4 sm:$0xff]  }
 0xb7b   : > { %12534 = verf.f32 %v8044_v9  ;;  %11179 = vmatprep.subr.bf16.mxu1 %v12385_v32  ;;  %v12432_v54 = vld [vmem:[#allocation19 + $0x230] ss:$12 sps:$4 sm:$0xff]   ;;  %v12435_v25 = vld [vmem:[#allocation19 + $0x488] ss:$12 sps:$4 sm:$0xff]   ;;  %v12437_v32 = vld [vmem:[#allocation19 + $0x560] ss:$12 sps:$4 sm:$0xff]  }
 0xb7c   : > { %v12433_v56 = vld [vmem:[#allocation19 + $0x3b0] ss:$12 sps:$4 sm:$0xff]   ;;  %v12436_v34 = vld [vmem:[#allocation19 + $0x608] ss:$12 sps:$4 sm:$0xff]   ;;  %v12438_v9 = vld [vmem:[#allocation19 + $0x4a0] ss:$12 sps:$4 sm:$0xff]  }
 0xb7e   : > { %11180 = vmatpush3.bf16.msra.mxu1 %v12386_v35  ;;  %v12439_v35 = vld [vmem:[#allocation19 + $0x620] ss:$12 sps:$4 sm:$0xff]  }
 0xb7f   : > { %11181 = vmatprep.subr.bf16.mxu1 %v12390_v4  ;;  %v12440_v4 = vld [vmem:[#allocation19 + $0x578] ss:$12 sps:$4 sm:$0xff]  }
 0xb82   : > { %11182 = vmatpush3.bf16.msra.mxu1 %v12391_v41  ;;  %v12441_v41 = vld [vmem:[#allocation19 + $0x4b8] ss:$12 sps:$4 sm:$0xff]  }
 0xb83   : > { %11183 = vmatprep.subr.bf16.mxu1 %v12395_v60  ;;  %v12443_v60 = vld [vmem:[#allocation19 + $0x590] ss:$12 sps:$4 sm:$0xff]  }
 0xb84   : > { %v12533_v46 = vpop.eup %12532 }
 0xb85   : > { %v12535_v10 = vpop.eup %12534  ;;  %v8063_v42 = vadd.f32 1.0, %v12533_v46  ;;  %v12447_v46 = vld [vmem:[#allocation19 + $0x4e8] ss:$12 sps:$4 sm:$0xff]  }
 0xb86   : > { %v8064_v57 = vadd.f32 1.0, %v12535_v10  ;;  %11184 = vmatpush3.bf16.msra.mxu1 %v12396_v44  ;;  %v12446_v44 = vld [vmem:[#allocation19 + $0x5a8] ss:$12 sps:$4 sm:$0xff]   ;;  %v12449_v10 = vld [vmem:[#allocation19 + $0x5c0] ss:$12 sps:$4 sm:$0xff]  }
 0xb87   : > { %v8073_v23 = vmul.f32 %v8063_v42, %v8033_v47  ;;  %11185 = vmatprep.subr.bf16.mxu1 %v12400_v51  ;;  %v12448_v51 = vld [vmem:[#allocation19 + $0x668] ss:$12 sps:$4 sm:$0xff]   ;;  %v12450_v47 = vld [vmem:[#allocation19 + $0x500] ss:$12 sps:$4 sm:$0xff]  }
 0xb88   : > { %v8074_v20 = vmul.f32 %v8064_v57, %v8034_v29  ;;  %v12451_v42 = vld [vmem:[#allocation19 + $0x680] ss:$12 sps:$4 sm:$0xff]   ;;  %v12452_v29 = vld [vmem:[#allocation19 + $0x5d8] ss:$12 sps:$4 sm:$0xff]  }
 0xb89   : > { %v14447_v61 = vpack.c.bf16 %v8073_v23, %v8073_v23 }
 0xb8a   : > { %v14445_v24 = vpack.c.bf16 %v8074_v20, %v8074_v20  ;;  %11186 = vmatpush3.bf16.msra.mxu1 %v12401_v17  ;;  %v12453_v17 = vld [vmem:[#allocation19 + $0x518] ss:$12 sps:$4 sm:$0xff]  }
 0xb8b   : > { %11215 = vmatprep.subr.bf16.mxu1 %v12403_v1  ;;  %v12454_v1 = vld [vmem:[#allocation19 + $0x698] ss:$12 sps:$4 sm:$0xff]  }
 0xb8c   : > { %11082 = vmatprep.mubr.msk.bf16.mxu0 %vm9662_vm13, %v14445_v24 }
 0xb8d   : > { %9863 = vmatmul.mubr.bf16.vlgmr.msra.gmra.mrb[128].mxu0 %v14447_v61  ;;  %9904 = vmatmul.mubr.bf16.vlgmr.msra.gmra.mrb[120].mxu1 %v14402_v49  ;;  %v12415_v49 = vld [vmem:[#allocation19 + $0x410] ss:$12 sps:$4 sm:$0xff]  }
 0xb8e   : > { %11194 = vmatpush3.bf16.msra.mxu0 %v12404_v5  ;;  %11216 = vmatpush3.bf16.msra.mxu1 %v12405_v14  ;;  %v12456_v14 = vld [vmem:[#allocation19 + $0x530] ss:$12 sps:$4 sm:$0xff]  }
 0xb8f   : > { %9983 = vmatprep.mubr.bf16.mxu1 %v14426_v58  ;;  %9943 = vmatprep.mubr.bf16.mxu0 %v14405_v21  ;;  %v12417_v58 = vld [vmem:[#allocation19 + $0x350] ss:$12 sps:$4 sm:$0xff]   ;;  %v12420_v21 = vld [vmem:[#allocation19 + $0x1e8] ss:$12 sps:$4 sm:$0xff]  }
 0xb90   : > { %11195 = vmatprep.subr.bf16.mxu0 %v12406_v0  ;;  %11217 = vmatprep.subr.bf16.mxu1 %v12407_v43  ;;  %v12457_v0 = vld [vmem:[#allocation19 + $0x6b0] ss:$12 sps:$4 sm:$0xff]   ;;  %v12458_v43 = vld [vmem:[#allocation19 + $0x6c8] ss:$12 sps:$4 sm:$0xff]  }
 0xb92   : > { %11196 = vmatpush3.bf16.msra.mxu0 %v12408_v28  ;;  %11218 = vmatpush3.bf16.msra.mxu1 %v12409_v8  ;;  %v12459_v28 = vld [vmem:[#allocation19 + $0x6e0] ss:$12 sps:$4 sm:$0xff]   ;;  %v12460_v8 = vld [vmem:[#allocation19 + $0x6f8] ss:$12 sps:$4 sm:$0xff]  }
 0xb93   : > { %11197 = vmatprep.subr.bf16.mxu0 %v12410_v15  ;;  %11219 = vmatprep.subr.bf16.mxu1 %v12411_v3  ;;  %v12461_v15 = vld [vmem:[#allocation19 + $0x710] ss:$12 sps:$4 sm:$0xff]   ;;  %v12462_v3 = vld [vmem:[#allocation19 + $0x728] ss:$12 sps:$4 sm:$0xff]  }
 0xb96   : > { %11198 = vmatpush3.bf16.msra.mxu0 %v12412_v55  ;;  %11220 = vmatpush3.bf16.msra.mxu1 %v12413_v27  ;;  %v12463_v55 = vld [vmem:[#allocation19 + $0x740] ss:$12 sps:$4 sm:$0xff]  }
 0xb97   : > { %11199 = vmatprep.subr.bf16.mxu0 %v12414_v18  ;;  %11221 = vmatprep.subr.bf16.mxu1 %v12415_v49 }
 0xb9a   : > { %11200 = vmatpush3.bf16.msra.mxu0 %v12416_v52  ;;  %11222 = vmatpush3.bf16.msra.mxu1 %v12417_v58 }
 0xb9b   : > { %11201 = vmatprep.subr.bf16.mxu0 %v12418_v38  ;;  %11223 = vmatprep.subr.bf16.mxu1 %v12419_v50 }
 0xb9e   : > { %11202 = vmatpush3.bf16.msra.mxu0 %v12420_v21  ;;  %11224 = vmatpush3.bf16.msra.mxu1 %v12421_v19 }
 0xb9f   : > { %11203 = vmatprep.subr.bf16.mxu0 %v12422_v12  ;;  %11225 = vmatprep.subr.bf16.mxu1 %v12423_v63 }
 0xba2   : > { %11204 = vmatpush3.bf16.msra.mxu0 %v12424_v16  ;;  %11226 = vmatpush3.bf16.msra.mxu1 %v12425_v26 }
 0xba3   : > { %11205 = vmatprep.subr.bf16.mxu0 %v12426_v30  ;;  %11227 = vmatprep.subr.bf16.mxu1 %v12427_v53 }
 0xba6   : > { %11206 = vmatpush3.bf16.msra.mxu0 %v12428_v11  ;;  %11228 = vmatpush3.bf16.msra.mxu1 %v12429_v59 }
 0xba7   : > { %11207 = vmatprep.subr.bf16.mxu0 %v12430_v62  ;;  %11229 = vmatprep.subr.bf16.mxu1 %v12431_v48 }
 0xbaa   : > { %11208 = vmatpush3.bf16.msra.mxu0 %v12432_v54  ;;  %11230 = vmatpush3.bf16.msra.mxu1 %v12433_v56 }
 0xbab   : > { %11237 = vmatprep.subr.bf16.mxu0 %v12434_v22  ;;  %10031 = vmatprep.subr.bf16.mxu1 %v12997_v7 }
 0xbad   : > { %9944 = vmatmul.mubr.bf16.vlgmr.msra.gmra.mrb[132].mxu0 %v14423_v40  ;;  %9984 = vmatmul.mubr.bf16.vlgmr.msra.gmra.mrb[124].mxu1 %v14428_v6  ;;  %v12442_v40 = vld [vmem:[#allocation19 + $0x638] ss:$12 sps:$4 sm:$0xff]   ;;  %v12444_v6 = vld [vmem:[#allocation19 + $0x4d0] ss:$12 sps:$4 sm:$0xff]  }
 0xbae   : > { %11238 = vmatpush3.bf16.msra.mxu0 %v12435_v25  ;;  %10023 = vmatprep.mubr.bf16.mxu0 %v14430_v39  ;;  %v12445_v39 = vld [vmem:[#allocation19 + $0x650] ss:$12 sps:$4 sm:$0xff]  }
 0xbaf   : > { %10032 = vmatpush1.bf16.msra.mxu1 %v12436_v34  ;;  %11083 = vmatprep.mubr.msk.bf16.mxu1 %vm9662_vm13, %v14445_v24  ;;  %v12455_v24 = vld [vmem:[#allocation19 + $0x5f0] ss:$12 sps:$4 sm:$0xff]  }
 0xbb0   : > { %11239 = vmatprep.subr.bf16.mxu0 %v12437_v32  ;;  %10033 = vmatprep.subr.bf16.mxu1 %v12997_v7 }
 0xbb2   : > { %11240 = vmatpush3.bf16.msra.mxu0 %v12438_v9 }
 0xbb3   : > { %10034 = vmatpush1.bf16.msra.mxu1 %v12439_v35  ;;  %11241 = vmatprep.subr.bf16.mxu0 %v12440_v4 }
 0xbb4   : > { %10035 = vmatprep.subr.bf16.mxu1 %v12997_v7 }
 0xbb6   : > { %11242 = vmatpush3.bf16.msra.mxu0 %v12441_v41 }
 0xbb7   : > { %10036 = vmatpush1.bf16.msra.mxu1 %v12442_v40  ;;  %11243 = vmatprep.subr.bf16.mxu0 %v12443_v60 }
 0xbb8   : > { %10037 = vmatprep.subr.bf16.mxu1 %v12997_v7 }
 0xbba   : > { %11244 = vmatpush3.bf16.msra.mxu0 %v12444_v6 }
 0xbbb   : > { %10038 = vmatpush1.bf16.msra.mxu1 %v12445_v39  ;;  %11245 = vmatprep.subr.bf16.mxu0 %v12446_v44 }
 0xbbc   : > { %10039 = vmatprep.subr.bf16.mxu1 %v12997_v7 }
 0xbbe   : > { %11246 = vmatpush3.bf16.msra.mxu0 %v12447_v46 }
 0xbbf   : > { %10040 = vmatpush1.bf16.msra.mxu1 %v12448_v51  ;;  %11247 = vmatprep.subr.bf16.mxu0 %v12449_v10 }
 0xbc0   : > { %10041 = vmatprep.subr.bf16.mxu1 %v12997_v7  ;;  %v9700_v57 = vpop.f32.mrb[108].mxu1 }
 0xbc1   : > { %v9702_v23 = vpop.f32.mrb[109].mxu1 }
 0xbc2   : > { %11248 = vmatpush3.bf16.msra.mxu0 %v12450_v47  ;;  %v9704_v20 = vpop.f32.mrb[110].mxu1 }
 0xbc3   : > { %10042 = vmatpush1.bf16.msra.mxu1 %v12451_v42  ;;  %11249 = vmatprep.subr.bf16.mxu0 %v12452_v29  ;;  %v9705_v5 = vpop.f32.mrb[111].mxu1 }
 0xbc4   : > { %10043 = vmatprep.subr.bf16.mxu1 %v12997_v7 }
 0xbc6   : > { %11250 = vmatpush3.bf16.msra.mxu0 %v12453_v17 }
 0xbc7   : > { %10044 = vmatpush1.bf16.msra.mxu1 %v12454_v1  ;;  %11251 = vmatprep.subr.bf16.mxu0 %v12455_v24 }
 0xbc8   : > { %10045 = vmatprep.subr.bf16.mxu1 %v12997_v7 }
 0xbca   : > { %11252 = vmatpush3.bf16.msra.mxu0 %v12456_v14 }
 0xbcb   : > { %10046 = vmatpush1.bf16.msra.mxu1 %v12457_v0 }
 0xbcc   : > { %10047 = vmatprep.subr.bf16.mxu1 %v12997_v7 }
 0xbcd   : > { %10024 = vmatmul.mubr.bf16.vlgmr.msra.gmra.mrb[136].mxu0 %v14439_v33  ;;  %v8397_v33 = vld [vmem:[#allocation20] sm:$0x7] }
 0xbce   : > { %v8402_v27 = vrot.slane %v8397_v33, %v13541_v37  ;;  %v8406_v18 = vrot.slane %v8397_v33, %v13538_v36  ;;  %v8410_v6 = vrot.slane %v8397_v33, %v13566_v31 }
 0xbcf   : > { %10048 = vmatpush1.bf16.msra.mxu1 %v12458_v43 }
 0xbd0   : > { %10049 = vmatprep.subr.bf16.mxu1 %v12997_v7  ;;  %v9701_v49 = vadd.f32 %v9700_v57, %v8402_v27  ;;  %v9703_v52 = vadd.f32 %v9702_v23, %v8406_v18 }
 0xbd3   : > { %10050 = vmatpush1.bf16.msra.mxu1 %v12459_v28 }
 0xbd4   : > { %10051 = vmatprep.subr.bf16.mxu1 %v12997_v7 }
 0xbd7   : > { %10052 = vmatpush1.bf16.msra.mxu1 %v12460_v8 }
 0xbd8   : > { %10053 = vmatprep.subr.bf16.mxu1 %v12997_v7 }
 0xbdb   : > { %10054 = vmatpush1.bf16.msra.mxu1 %v12461_v15 }
 0xbdc   : > { %10055 = vmatprep.subr.bf16.mxu1 %v12997_v7 }
 0xbdf   : > { %10056 = vmatpush1.bf16.msra.mxu1 %v12462_v3 }
 0xbe0   : > { %10057 = vmatprep.subr.bf16.mxu1 %v12997_v7 }
 0xbe3   : > { %10058 = vmatpush1.bf16.msra.mxu1 %v12463_v55 }
 0xbe6   : > { %10064 = vmatmul.mubr.bf16.vlgmr.msra.gmra.mrb[128].mxu1 %v14447_v61 }
 0xc00   : > { %v9741_v58 = vpop.f32.mrb[112].mxu1 }
 0xc01   : > { %v9742_v38 = vadd.f32 %v9741_v58, %v9701_v49  ;;  %v9743_v50 = vpop.f32.mrb[113].mxu1 }
 0xc02   : > { %v9744_v21 = vadd.f32 %v9743_v50, %v9703_v52  ;;  %v9745_v19 = vpop.f32.mrb[114].mxu1 }
 0xc03   : > { %v9746_v12 = vpop.f32.mrb[115].mxu1 }
 0xc10   : > { %v9782_v63 = vpop.f32.mrb[124].mxu0 }
 0xc11   : > { %v9783_v16 = vadd.f32 %v9782_v63, %v9742_v38  ;;  %v9784_v26 = vpop.f32.mrb[125].mxu0 }
 0xc12   : > { %v9785_v7 = vadd.f32 %v9784_v26, %v9744_v21  ;;  %v9786_v30 = vpop.f32.mrb[126].mxu0 }
 0xc13   : > { %v9787_v53 = vpop.f32.mrb[127].mxu0 }
 0xc40   : > { %v9823_v61 = vpop.f32.mrb[116].mxu1 }
 0xc41   : > { %v9824_v11 = vadd.f32 %v9823_v61, %v9783_v16  ;;  %v9825_v59 = vpop.f32.mrb[117].mxu1 }
 0xc42   : > { %v9826_v37 = vadd.f32 %v9825_v59, %v9785_v7  ;;  %v9827_v36 = vpop.f32.mrb[118].mxu1 }
 0xc43   : > { %v9828_v62 = vpop.f32.mrb[119].mxu1 }
 0xc60   : > { %v9864_v48 = vpop.f32.mrb[128].mxu0  ;;  %v11187_v54 = vpop.f32.mrb[120].mxu1 }
 0xc61   : > { %v9865_v56 = vadd.f32 %v9864_v48, %v9824_v11  ;;  %v9866_v22 = vpop.f32.mrb[129].mxu0  ;;  %v11188_v25 = vpop.f32.mrb[121].mxu1 }
 0xc62   : > { %v9867_v34 = vadd.f32 %v9866_v22, %v9826_v37  ;;  %v9868_v32 = vpop.f32.mrb[130].mxu0  ;;  %v11189_v35 = vadd.f32 %v11188_v25, %v11187_v54  ;;  %v11190_v4 = vpop.f32.mrb[122].mxu1 }
 0xc63   : > { %v10071_v9 = vadd.f32 %v9865_v56, %v14321_v45  ;;  %v9869_v41 = vpop.f32.mrb[131].mxu0  ;;  %v11191_v60 = vpop.f32.mrb[123].mxu1 }
 0xc64   : > { %v10072_v40 = vadd.f32 %v9867_v34, %v14327_v13  ;;  %v9906_v51 = vadd.f32 %v11189_v35, %v8410_v6 }
 0xc65   : > { %10074 = vst [vmem:[%s14482_s16] sm:$0xff] %v10071_v9 }
 0xc66   : > { %10075 = vst [vmem:[%s14482_s16 + $0x8] sm:$0xff] %v10072_v40 }
 0xc80   : > { %v11209_v39 = vpop.f32.mrb[132].mxu0  ;;  %v11231_v44 = vpop.f32.mrb[124].mxu1 }
 0xc81   : > { %v11210_v46 = vpop.f32.mrb[133].mxu0  ;;  %v11232_v10 = vpop.f32.mrb[125].mxu1 }
 0xc82   : > { %v11211_v45 = vadd.f32 %v11210_v46, %v11209_v39  ;;  %v11212_v47 = vpop.f32.mrb[134].mxu0  ;;  %v11233_v13 = vadd.f32 %v11232_v10, %v11231_v44  ;;  %v11234_v42 = vpop.f32.mrb[126].mxu1 }
 0xc83   : > { %v11213_v29 = vpop.f32.mrb[135].mxu0  ;;  %v11235_v23 = vpop.f32.mrb[127].mxu1 }
 0xc84   : > { %v9946_v57 = vadd.f32 %v11211_v45, %v9906_v51 }
 0xc86   : > { %v9986_v17 = vadd.f32 %v11233_v13, %v9946_v57 }
 0xca0   : > { %v11253_v20 = vpop.f32.mrb[136].mxu0 }
 0xca1   : > { %v11254_v1 = vpop.f32.mrb[137].mxu0 }
 0xca2   : > { %v11255_v31 = vadd.f32 %v11254_v1, %v11253_v20  ;;  %v11256_v24 = vpop.f32.mrb[138].mxu0 }
 0xca3   : > { %v11257_v5 = vpop.f32.mrb[139].mxu0 }
 0xca4   : > { %v10026_v14 = vadd.f32 %v11255_v31, %v9986_v17 }
 0xcb9   : > { %v10065_v0 = vpop.f32.mrb[128].mxu1 }
 0xcba   : > { %v10066_v43 = vadd.f32 %v10065_v0, %v10026_v14  ;;  %v10067_v28 = vpop.f32.mrb[129].mxu1 }
 0xcbb   : > { %v10068_v8 = vpop.f32.mrb[130].mxu1 }
 0xcbc   : > { %v10073_v15 = vadd.f32 %v10066_v43, %v14324_v2  ;;  %v10069_v3 = vpop.f32.mrb[131].mxu1 }
 0xcbe   : > { %10076 = vst.msk [vmem:[%s14482_s16 + $0x10] sm:$0xff] %vm604_vm0, %v10073_v15 }
 0xcbf   : > { %12896 = shalt.err (!%p12893_p1)
}
 0xcc0   : > { %s12897_s30 = scalar_lea.hbm %s14493_s29, 384  ;;  %s12901_s26 = scalar_lea.hbm %s14601_s15, 768 }
 0xcc1   : > { %p12898_p3 = scmp.ne.s32.totalorder %s14493_s29, %s12897_s30  ;;  %p12902_p11 = scmp.lt.u32.totalorder %s14493_s29, %s14601_s15 }
 0xcc2   : > { %p12903_p6 = scmp.lt.u32.totalorder %s12901_s26, %s12897_s30  ;;  %p12905_p0 = scmp.lt.u32.totalorder %s12897_s30, %s14493_s29 }
 0xcc3   : > { %p12899_p2 = pnand %p12898_p3, %p14602_p5 }
 0xcc4   : > { %p12904_p7 = por %p12903_p6, %p12902_p11 }
 0xcc5   : > { %p12900_p10 = pneg %p12899_p2 }
 0xcc6   : > { %p12906_p12 = por %p12905_p0, %p12904_p7 }
 0xcc8   : > { %p12907_p8 = pnand %p12906_p12, %p12900_p10 }
 0xcca   : > { %12910 = shalt.err (!%p12907_p8)
}
 0xccb   : > { %11599 = dma.vmem_to_hbm [thread:$0]  (%p14602_p5), %s14495_s4, 384, %s14493_s29, %s10078_s27  }
 0xccc PF: > { %s10104_s19 = sand.u32 1, %s12965_s21   ;;  %p14603_p9 = scmp.ne.s32.totalorder %s14581_s12, 0 }
 0xccd   : > { %p14604_p4 = scmp.ge.s32.totalorder %s12977_s24, 2  ;;  %s10105_s14 = scalar_lea.sflag [#allocation4], %s10104_s19 }
 0xccf   : > { %p11640_p13 = pnand %p14604_p4, %p14603_p9 }
 0xcd1   : > { %12960 = dma.done.wait (!%p11640_p13), %s10105_s14, 384  }
 0xcd2   : > { %12962 = vsyncadd (!%p11640_p13), %s10105_s14, 4294966912  ;;  %p33_p1 = scmp.ge.s32.totalorder %s13370_s13, 4   ;;  %s14605_s21 = smov %s12969_s22 }
 0xcd3   : > { %s14606_s22 = smov %s12973_s23  ;;  %s14607_s23 = smov %s13381_s18 }
 0xcd4   : > { %s14608_s24 = smov %s13370_s13  ;;  %35 = sbr.rel (!%p33_p1) target bundleno = 20 (0x14), region = 166 }
 0xcdb   :  { %10110 = vsyncpa [#allocation3], 1 }
 0xcdc   :  { %10112 = vsyncpa [#allocation3 + $0x1], 1 }
 0xcdd   :  { %10113 = vsyncpa [#allocation6], 1 }
 0xcde   :  { %10115 = vsyncpa [#allocation6 + $0x1], 1 }
 0xcdf   :  { %10116 = vsyncpa [#allocation9], 1 }
 0xce0   :  { %10117 = vsyncpa [#allocation12], 1 }
 0xce1   :  { %10118 = vsyncpa [#allocation15], 1 }
 0xce2   :  { %10119 = vsyncpa [#allocation18], 1 }
 0xce3   :  { %10120 = vsyncpa [#allocation21], 1 }
 0xce4   :  { %10121 = vsyncpa [#allocation4], 1 }
 0xce5   :  { %10123 = vsyncpa [#allocation4 + $0x1], 1 }

</bundles_post_ra>
